<compile_context>
chip_gen: v5e
topology: v5e:2x2
jax: 0.10.0
libtpu: 0.0.40
codegen_flags: <defaults>
</compile_context>

<pallas_src>
import functools
import math

import jax
import jax.numpy as jnp
import numpy as np
from jax import lax
from jax.experimental import pallas as pl
from jax.experimental.pallas import tpu as pltpu

_NEG_INF = -1e32
_NN = (((1,), (0,)), ((), ()))   # a @ b
_NT = (((1,), (1,)), ((), ()))   # a @ b.T  (contract last dims of both)


def _softmax_rows(x):
    """Row softmax with the divide replaced by an EUP reciprocal + multiply."""
    x_max = jnp.max(x, axis=-1, keepdims=True)
    e = jnp.exp(x - x_max)
    return e * pl.reciprocal(jnp.sum(e, axis=-1, keepdims=True), approx=False)


def _split_hi_lo(x):
    """Split an f32 array into bf16 hi/lo words with x ~= hi + lo."""
    hi = x.astype(jnp.bfloat16)
    lo = (x - hi.astype(jnp.float32)).astype(jnp.bfloat16)
    return hi, lo


def _dot_f32(a, b, dims=_NN):
    """~f32-accurate matmul built from 3 single-pass bf16 MXU matmuls (bf16_3x),
    f32 accumulation.  2x fewer MXU passes than Precision.HIGHEST while staying
    on the plain bf16 MXU lowering path."""
    dg = functools.partial(lax.dot_general, dimension_numbers=dims,
                           preferred_element_type=jnp.float32)
    a_hi, a_lo = _split_hi_lo(a)
    b_hi, b_lo = _split_hi_lo(b)
    return dg(a_hi, b_hi) + dg(a_lo, b_hi) + dg(a_hi, b_lo)


def _dot_exact_rhs(a, b_bf16, dims=_NN):
    """f32-accurate matmul when the RHS is exactly representable in bf16
    (e.g. a 0/1 matrix): only the LHS needs a hi/lo split -> 2 MXU passes."""
    dg = functools.partial(lax.dot_general, dimension_numbers=dims,
                           preferred_element_type=jnp.float32)
    a_hi, a_lo = _split_hi_lo(a)
    return dg(a_hi, b_bf16) + dg(a_lo, b_bf16)


def _mha_forget_kernel(
    mask_ref,                     # (Tq, S) f32 {0, 1}
    ng_ref,                       # (H,)    f32 in SMEM: -softplus(gamma_h)
    q_ref, k_ref, v_ref,          # (1, Tq, E), (1, S, E), (1, S, E)
    wq_ref, bq_ref,               # (E, E), (1, E)
    wk_ref, bk_ref,
    wv_ref, bv_ref,
    wo_ref, bo_ref,               # (E, E), (1, E)
    out_ref,                      # (1, Tq, E)
    *, n_heads, d_k, scale, zero_pad, forget):
    qi = pl.program_id(1)
    Tq = q_ref.shape[1]
    S = k_ref.shape[1]

    # Fused, lane-dense projections: one (rows, E) @ (E, E) matmul each.
    # 1/sqrt(d_k) is folded into q (Tq*E multiplies instead of Tq*S).
    q_all = (_dot_f32(q_ref[0].astype(jnp.float32), wq_ref[...]) + bq_ref[...]) * scale
    k_all = _dot_f32(k_ref[0].astype(jnp.float32), wk_ref[...]) + bk_ref[...]
    v_all = _dot_f32(v_ref[0].astype(jnp.float32), wv_ref[...]) + bv_ref[...]

    mask = mask_ref[...]                                    # (Tq, S)
    mask_bias = jnp.where(mask > 0.0, 0.0, _NEG_INF)        # reused by both softmaxes

    row_g = lax.broadcasted_iota(jnp.int32, (Tq, S), 0) + qi * Tq   # global query idx
    col = lax.broadcasted_iota(jnp.int32, (Tq, S), 1)

    if forget:
        position_effect = jnp.abs(col - row_g).astype(jnp.float32)
        # suffix_ones[j', j] = 1 iff j' > j (strictly lower triangular), so
        # p @ suffix_ones[i, j] = sum_{j' > j} p[i, j'] == total - cumsum
        # (one MXU matmul instead of a lane-axis cumsum).
        r2 = lax.broadcasted_iota(jnp.int32, (S, S), 0)
        c2 = lax.broadcasted_iota(jnp.int32, (S, S), 1)
        suffix_ones = jnp.where(r2 > c2, 1.0, 0.0).astype(jnp.bfloat16)

    head_outs = []
    for h in range(n_heads):
        sl = slice(h * d_k, (h + 1) * d_k)
        q_h = q_all[:, sl]                    # (Tq, d_k), pre-scaled
        k_h = k_all[:, sl]                    # (S, d_k)
        v_h = v_all[:, sl]                    # (S, d_k)

        scores = _dot_f32(q_h, k_h, _NT)      # (Tq, S)

        if forget:
            # "no-grad" branch: masked softmax, then the probability mass
            # strictly to the right of each key position.
            p = _softmax_rows(scores + mask_bias) * mask
            remaining = _dot_exact_rhs(p, suffix_ones)                 # (Tq, S)
            dist = jnp.sqrt(jnp.maximum(remaining * position_effect, 0.0))
            total_effect = jnp.clip(jnp.exp(dist * ng_ref[h]), 1e-5, 1e5)
            scores = scores * total_effect

        attn = _softmax_rows(scores + mask_bias)
        if zero_pad:
            attn = jnp.where(row_g == 0, 0.0, attn)   # zero first global query row
        # TODO(synk): dropout on `attn` skipped (eval mode).

        head_outs.append(_dot_f32(attn, v_h))         # (Tq, d_k)

    concat = jnp.concatenate(head_outs, axis=-1)       # (Tq, E)
    out = _dot_f32(concat, wo_ref[...]) + bo_ref[...]  # single fused out_proj
    out_ref[0] = out.astype(out_ref.dtype)


def _pick_q_tile(S):
    if S <= 256:
        return S
    for t in (256, 128, 64, 32, 16, 8):
        if S % t == 0:
            return t
    return S


def multi_head_attention(q_in, k_in, v_in, mask, params, *, n_heads, zero_pad,
                         forget=True, kq_same=False):
    bs, S, E = q_in.shape
    assert E % n_heads == 0
    d_k = E // n_heads
    Tq = _pick_q_tile(S)
    nq = S // Tq

    # torch Linear weight is (out_features, in_features); projection is x @ W^T + b.
    wk_t = jnp.transpose(params["wk"], (1, 0))
    wv_t = jnp.transpose(params["wv"], (1, 0))
    wo_t = jnp.transpose(params["wo"], (1, 0))
    if kq_same:
        wq_t, bq = wk_t, params["bk"]
    else:
        wq_t, bq = jnp.transpose(params["wq"], (1, 0)), params["bq"]
    bq = bq.reshape(1, E)
    bk = params["bk"].reshape(1, E)
    bv = params["bv"].reshape(1, E)
    bo = params["bo"].reshape(1, E)

    neg_gamma = (-jax.nn.softplus(params["gammas"])).reshape(n_heads).astype(jnp.float32)
    mask_f = mask.astype(jnp.float32).reshape(S, S)

    kernel = functools.partial(
        _mha_forget_kernel,
        n_heads=n_heads, d_k=d_k, scale=1.0 / math.sqrt(d_k),
        zero_pad=bool(zero_pad), forget=bool(forget))

    grid_spec = pltpu.PrefetchScalarGridSpec(
        num_scalar_prefetch=0,
        grid=(bs, nq),
        in_specs=[
            pl.BlockSpec((Tq, S), lambda b, qi: (qi, 0)),             # mask rows
            pl.BlockSpec(memory_space=pltpu.MemorySpace.SMEM),        # -softplus(gamma)
            pl.BlockSpec((1, Tq, E), lambda b, qi: (b, qi, 0)),       # q input rows
            pl.BlockSpec((1, S, E), lambda b, qi: (b, 0, 0)),         # k input
            pl.BlockSpec((1, S, E), lambda b, qi: (b, 0, 0)),         # v input
            pl.BlockSpec((E, E), lambda b, qi: (0, 0)),               # Wq^T (full)
            pl.BlockSpec((1, E), lambda b, qi: (0, 0)),               # bq
            pl.BlockSpec((E, E), lambda b, qi: (0, 0)),               # Wk^T (full)
            pl.BlockSpec((1, E), lambda b, qi: (0, 0)),               # bk
            pl.BlockSpec((E, E), lambda b, qi: (0, 0)),               # Wv^T (full)
            pl.BlockSpec((1, E), lambda b, qi: (0, 0)),               # bv
            pl.BlockSpec((E, E), lambda b, qi: (0, 0)),               # Wo^T (full)
            pl.BlockSpec((1, E), lambda b, qi: (0, 0)),               # bo
        ],
        out_specs=pl.BlockSpec((1, Tq, E), lambda b, qi: (b, qi, 0)),
    )

    return pl.pallas_call(
        kernel,
        out_shape=jax.ShapeDtypeStruct((bs, S, E), q_in.dtype),
        grid_spec=grid_spec,
        compiler_params=pltpu.CompilerParams(
            dimension_semantics=("parallel", "parallel"),
            vmem_limit_bytes=32 * 1024 * 1024),
    )(mask_f, neg_gamma, q_in, k_in, v_in,
      wq_t, bq, wk_t, bk, wv_t, bv, wo_t, bo)


def _mha_reference(q_in, k_in, v_in, mask, params, *, n_heads, zero_pad,
                   forget=True, kq_same=False):
    """Plain-JAX reference mirroring the PyTorch module (dropout = identity)."""
    bs, S, E = q_in.shape
    d_k = E // n_heads
    P = lax.Precision.HIGHEST

    def linear(x, w, b):
        return jnp.einsum("bse,oe->bso", x, w, precision=P) + b

    def split(x):
        return x.reshape(bs, S, n_heads, d_k).transpose(0, 2, 1, 3)

    k = split(linear(k_in, params["wk"], params["bk"]))
    qw, qb = (params["wk"], params["bk"]) if kq_same else (params["wq"], params["bq"])
    q = split(linear(q_in, qw, qb))
    v = split(linear(v_in, params["wv"], params["bv"]))

    scores = jnp.einsum("bhqd,bhkd->bhqk", q, k, precision=P) / math.sqrt(d_k)
    m = mask.astype(jnp.float32)[None, None]

    if forget:
        scores_ = jnp.where(m > 0, scores, _NEG_INF)
        scores_ = jax.nn.softmax(scores_, axis=-1)
        scores_ = scores_ * m
        distcum = jnp.cumsum(scores_, axis=-1)
        disttotal = jnp.sum(scores_, axis=-1, keepdims=True)
        x1 = jnp.arange(S)[None, :]
        x2 = jnp.arange(S)[:, None]
        position_effect = jnp.abs(x1 - x2).astype(jnp.float32)[None, None]
        dist_scores = jnp.sqrt(jnp.maximum((disttotal - distcum) * position_effect, 0.0))
        gamma = -1.0 * jax.nn.softplus(params["gammas"])[None]   # (1, h, 1, 1)
        total_effect = jnp.clip(jnp.exp(dist_scores * gamma), 1e-5, 1e5)
        scores = scores * total_effect

    scores = jnp.where(m > 0, scores, _NEG_INF)
    scores = jax.nn.softmax(scores, axis=-1)
    if zero_pad:
        scores = jnp.concatenate(
            [jnp.zeros_like(scores[:, :, :1, :]), scores[:, :, 1:, :]], axis=2)
    out = jnp.einsum("bhqk,bhkd->bhqd", scores, v, precision=P)
    concat = out.transpose(0, 2, 1, 3).reshape(bs, S, E)
    return jnp.einsum("bse,oe->bso", concat, params["wo"], precision=P) + params["bo"]


if __name__ == "__main__":
    bs, S, E, H = 2, 32, 32, 4   # batch=2, seq=32, embedding=32, heads=4 (d_k=8)
    key = jax.random.PRNGKey(0)
    ks = jax.random.split(key, 12)

    def xavier(k, shape):
        fan_out, fan_in = shape
        a = math.sqrt(6.0 / (fan_in + fan_out))
        return jax.random.uniform(k, shape, jnp.float32, -a, a)

    params = {
        "wq": xavier(ks[0], (E, E)), "bq": 0.1 * jax.random.normal(ks[1], (E,), jnp.float32),
        "wk": xavier(ks[2], (E, E)), "bk": 0.1 * jax.random.normal(ks[3], (E,), jnp.float32),
        "wv": xavier(ks[4], (E, E)), "bv": 0.1 * jax.random.normal(ks[5], (E,), jnp.float32),
        "wo": xavier(ks[6], (E, E)), "bo": 0.1 * jax.random.normal(ks[7], (E,), jnp.float32),
        "gammas": 0.5 * jax.random.normal(ks[8], (H, 1, 1), jnp.float32),
    }
    q_in = jax.random.normal(ks[9], (bs, S, E), dtype=jnp.float32)
    k_in = jax.random.normal(ks[10], (bs, S, E), dtype=jnp.float32)
    v_in = jax.random.normal(ks[11], (bs, S, E), dtype=jnp.float32)

    # AKT-style causal mask (mask_flag=0): key j visible to query i iff j < i,
    # paired with zero_pad=True exactly as the PyTorch model uses it.
    idx = jnp.arange(S)
    mask = (idx[None, :] < idx[:, None]).astype(jnp.float32)

    out = multi_head_attention(q_in, k_in, v_in, mask, params,
                               n_heads=H, zero_pad=True, forget=True, kq_same=False)
    out = jax.block_until_ready(out)

    ref = jax.block_until_ready(
        _mha_reference(q_in, k_in, v_in, mask, params,
                       n_heads=H, zero_pad=True, forget=True, kq_same=False))

    np.testing.assert_allclose(np.asarray(out), np.asarray(ref), rtol=2e-2, atol=5e-3)
    print("KERNEL_OK")
</pallas_src>

<mosaic_0001>
module attributes {stable_mosaic.version = 11 : i64} {
  func.func @_mha_forget_kernel(%arg0: i32, %arg1: i32, %arg2: memref<32x32xf32, #tpu.memory_space<vmem>>, %arg3: memref<4xf32, #tpu.memory_space<smem>>, %arg4: memref<1x32x32xf32, #tpu.memory_space<vmem>>, %arg5: memref<1x32x32xf32, #tpu.memory_space<vmem>>, %arg6: memref<1x32x32xf32, #tpu.memory_space<vmem>>, %arg7: memref<32x32xf32, #tpu.memory_space<vmem>>, %arg8: memref<1x32xf32, #tpu.memory_space<vmem>>, %arg9: memref<32x32xf32, #tpu.memory_space<vmem>>, %arg10: memref<1x32xf32, #tpu.memory_space<vmem>>, %arg11: memref<32x32xf32, #tpu.memory_space<vmem>>, %arg12: memref<1x32xf32, #tpu.memory_space<vmem>>, %arg13: memref<32x32xf32, #tpu.memory_space<vmem>>, %arg14: memref<1x32xf32, #tpu.memory_space<vmem>>, %arg15: memref<1x32x32xf32, #tpu.memory_space<vmem>>) attributes {dimension_semantics = [#tpu.dimension_semantics<parallel>, #tpu.dimension_semantics<parallel>], iteration_bounds = array<i64: 2, 1>, scalar_prefetch = 0 : i64, scratch_operands = 0 : i64, tpu.core_type = #tpu.core_type<tc>, window_params = [{transform_indices = @transform_0, window_bounds = array<i64: 32, 32>}, {transform_indices = @transform_1, window_bounds = array<i64: 4>}, {transform_indices = @transform_2, window_bounds = array<i64: 1, 32, 32>}, {transform_indices = @transform_3, window_bounds = array<i64: 1, 32, 32>}, {transform_indices = @transform_4, window_bounds = array<i64: 1, 32, 32>}, {pipeline_mode = #tpu.pipeline_mode<synchronous>, transform_indices = @transform_5, window_bounds = array<i64: 32, 32>}, {pipeline_mode = #tpu.pipeline_mode<synchronous>, transform_indices = @transform_6, window_bounds = array<i64: 1, 32>}, {pipeline_mode = #tpu.pipeline_mode<synchronous>, transform_indices = @transform_7, window_bounds = array<i64: 32, 32>}, {pipeline_mode = #tpu.pipeline_mode<synchronous>, transform_indices = @transform_8, window_bounds = array<i64: 1, 32>}, {pipeline_mode = #tpu.pipeline_mode<synchronous>, transform_indices = @transform_9, window_bounds = array<i64: 32, 32>}, {pipeline_mode = #tpu.pipeline_mode<synchronous>, transform_indices = @transform_10, window_bounds = array<i64: 1, 32>}, {pipeline_mode = #tpu.pipeline_mode<synchronous>, transform_indices = @transform_11, window_bounds = array<i64: 32, 32>}, {pipeline_mode = #tpu.pipeline_mode<synchronous>, transform_indices = @transform_12, window_bounds = array<i64: 1, 32>}, {transform_indices = @transform_13, window_bounds = array<i64: 1, 32, 32>}]} {
    %c0 = arith.constant 0 : index
    %c0_0 = arith.constant 0 : index
    %c0_1 = arith.constant 0 : index
    %0 = vector.load %arg4[%c0, %c0_0, %c0_1] : memref<1x32x32xf32, #tpu.memory_space<vmem>>, vector<1x32x32xf32>
    %1 = vector.shape_cast %0 : vector<1x32x32xf32> to vector<32x32xf32>
    %c0_2 = arith.constant 0 : index
    %c0_3 = arith.constant 0 : index
    %2 = vector.load %arg7[%c0_2, %c0_3] : memref<32x32xf32, #tpu.memory_space<vmem>>, vector<32x32xf32>
    %3 = arith.truncf %1 : vector<32x32xf32> to vector<32x32xbf16>
    %4 = arith.extf %3 : vector<32x32xbf16> to vector<32x32xf32>
    %5 = arith.subf %1, %4 : vector<32x32xf32>
    %6 = arith.truncf %5 : vector<32x32xf32> to vector<32x32xbf16>
    %7 = arith.truncf %2 : vector<32x32xf32> to vector<32x32xbf16>
    %8 = arith.extf %7 : vector<32x32xbf16> to vector<32x32xf32>
    %9 = arith.subf %2, %8 : vector<32x32xf32>
    %10 = arith.truncf %9 : vector<32x32xf32> to vector<32x32xbf16>
    %cst = arith.constant dense<0.000000e+00> : vector<32x32xf32>
    %11 = tpu.matmul %3, %7, %cst {dimension_numbers = #tpu.dot_dimension_numbers<[1], [0], [0], [1], [0, 0, 1, 1], [], []>} : vector<32x32xbf16>, vector<32x32xbf16>, vector<32x32xf32> -> vector<32x32xf32>
    %cst_4 = arith.constant dense<0.000000e+00> : vector<32x32xf32>
    %12 = tpu.matmul %6, %7, %cst_4 {dimension_numbers = #tpu.dot_dimension_numbers<[1], [0], [0], [1], [0, 0, 1, 1], [], []>} : vector<32x32xbf16>, vector<32x32xbf16>, vector<32x32xf32> -> vector<32x32xf32>
    %13 = arith.addf %11, %12 : vector<32x32xf32>
    %cst_5 = arith.constant dense<0.000000e+00> : vector<32x32xf32>
    %14 = tpu.matmul %3, %10, %cst_5 {dimension_numbers = #tpu.dot_dimension_numbers<[1], [0], [0], [1], [0, 0, 1, 1], [], []>} : vector<32x32xbf16>, vector<32x32xbf16>, vector<32x32xf32> -> vector<32x32xf32>
    %15 = arith.addf %13, %14 : vector<32x32xf32>
    %c0_6 = arith.constant 0 : index
    %c0_7 = arith.constant 0 : index
    %16 = vector.load %arg8[%c0_6, %c0_7] : memref<1x32xf32, #tpu.memory_space<vmem>>, vector<1x32xf32>
    %17 = vector.broadcast %16 : vector<1x32xf32> to vector<32x32xf32>
    %18 = arith.addf %15, %17 : vector<32x32xf32>
    %cst_8 = arith.constant 0.353553385 : f32
    %19 = vector.broadcast %cst_8 : f32 to vector<32x32xf32>
    %20 = arith.mulf %18, %19 : vector<32x32xf32>
    %c0_9 = arith.constant 0 : index
    %c0_10 = arith.constant 0 : index
    %c0_11 = arith.constant 0 : index
    %21 = vector.load %arg5[%c0_9, %c0_10, %c0_11] : memref<1x32x32xf32, #tpu.memory_space<vmem>>, vector<1x32x32xf32>
    %22 = vector.shape_cast %21 : vector<1x32x32xf32> to vector<32x32xf32>
    %c0_12 = arith.constant 0 : index
    %c0_13 = arith.constant 0 : index
    %23 = vector.load %arg9[%c0_12, %c0_13] : memref<32x32xf32, #tpu.memory_space<vmem>>, vector<32x32xf32>
    %24 = arith.truncf %22 : vector<32x32xf32> to vector<32x32xbf16>
    %25 = arith.extf %24 : vector<32x32xbf16> to vector<32x32xf32>
    %26 = arith.subf %22, %25 : vector<32x32xf32>
    %27 = arith.truncf %26 : vector<32x32xf32> to vector<32x32xbf16>
    %28 = arith.truncf %23 : vector<32x32xf32> to vector<32x32xbf16>
    %29 = arith.extf %28 : vector<32x32xbf16> to vector<32x32xf32>
    %30 = arith.subf %23, %29 : vector<32x32xf32>
    %31 = arith.truncf %30 : vector<32x32xf32> to vector<32x32xbf16>
    %cst_14 = arith.constant dense<0.000000e+00> : vector<32x32xf32>
    %32 = tpu.matmul %24, %28, %cst_14 {dimension_numbers = #tpu.dot_dimension_numbers<[1], [0], [0], [1], [0, 0, 1, 1], [], []>} : vector<32x32xbf16>, vector<32x32xbf16>, vector<32x32xf32> -> vector<32x32xf32>
    %cst_15 = arith.constant dense<0.000000e+00> : vector<32x32xf32>
    %33 = tpu.matmul %27, %28, %cst_15 {dimension_numbers = #tpu.dot_dimension_numbers<[1], [0], [0], [1], [0, 0, 1, 1], [], []>} : vector<32x32xbf16>, vector<32x32xbf16>, vector<32x32xf32> -> vector<32x32xf32>
    %34 = arith.addf %32, %33 : vector<32x32xf32>
    %cst_16 = arith.constant dense<0.000000e+00> : vector<32x32xf32>
    %35 = tpu.matmul %24, %31, %cst_16 {dimension_numbers = #tpu.dot_dimension_numbers<[1], [0], [0], [1], [0, 0, 1, 1], [], []>} : vector<32x32xbf16>, vector<32x32xbf16>, vector<32x32xf32> -> vector<32x32xf32>
    %36 = arith.addf %34, %35 : vector<32x32xf32>
    %c0_17 = arith.constant 0 : index
    %c0_18 = arith.constant 0 : index
    %37 = vector.load %arg10[%c0_17, %c0_18] : memref<1x32xf32, #tpu.memory_space<vmem>>, vector<1x32xf32>
    %38 = vector.broadcast %37 : vector<1x32xf32> to vector<32x32xf32>
    %39 = arith.addf %36, %38 : vector<32x32xf32>
    %c0_19 = arith.constant 0 : index
    %c0_20 = arith.constant 0 : index
    %c0_21 = arith.constant 0 : index
    %40 = vector.load %arg6[%c0_19, %c0_20, %c0_21] : memref<1x32x32xf32, #tpu.memory_space<vmem>>, vector<1x32x32xf32>
    %41 = vector.shape_cast %40 : vector<1x32x32xf32> to vector<32x32xf32>
    %c0_22 = arith.constant 0 : index
    %c0_23 = arith.constant 0 : index
    %42 = vector.load %arg11[%c0_22, %c0_23] : memref<32x32xf32, #tpu.memory_space<vmem>>, vector<32x32xf32>
    %43 = arith.truncf %41 : vector<32x32xf32> to vector<32x32xbf16>
    %44 = arith.extf %43 : vector<32x32xbf16> to vector<32x32xf32>
    %45 = arith.subf %41, %44 : vector<32x32xf32>
    %46 = arith.truncf %45 : vector<32x32xf32> to vector<32x32xbf16>
    %47 = arith.truncf %42 : vector<32x32xf32> to vector<32x32xbf16>
    %48 = arith.extf %47 : vector<32x32xbf16> to vector<32x32xf32>
    %49 = arith.subf %42, %48 : vector<32x32xf32>
    %50 = arith.truncf %49 : vector<32x32xf32> to vector<32x32xbf16>
    %cst_24 = arith.constant dense<0.000000e+00> : vector<32x32xf32>
    %51 = tpu.matmul %43, %47, %cst_24 {dimension_numbers = #tpu.dot_dimension_numbers<[1], [0], [0], [1], [0, 0, 1, 1], [], []>} : vector<32x32xbf16>, vector<32x32xbf16>, vector<32x32xf32> -> vector<32x32xf32>
    %cst_25 = arith.constant dense<0.000000e+00> : vector<32x32xf32>
    %52 = tpu.matmul %46, %47, %cst_25 {dimension_numbers = #tpu.dot_dimension_numbers<[1], [0], [0], [1], [0, 0, 1, 1], [], []>} : vector<32x32xbf16>, vector<32x32xbf16>, vector<32x32xf32> -> vector<32x32xf32>
    %53 = arith.addf %51, %52 : vector<32x32xf32>
    %cst_26 = arith.constant dense<0.000000e+00> : vector<32x32xf32>
    %54 = tpu.matmul %43, %50, %cst_26 {dimension_numbers = #tpu.dot_dimension_numbers<[1], [0], [0], [1], [0, 0, 1, 1], [], []>} : vector<32x32xbf16>, vector<32x32xbf16>, vector<32x32xf32> -> vector<32x32xf32>
    %55 = arith.addf %53, %54 : vector<32x32xf32>
    %c0_27 = arith.constant 0 : index
    %c0_28 = arith.constant 0 : index
    %56 = vector.load %arg12[%c0_27, %c0_28] : memref<1x32xf32, #tpu.memory_space<vmem>>, vector<1x32xf32>
    %57 = vector.broadcast %56 : vector<1x32xf32> to vector<32x32xf32>
    %58 = arith.addf %55, %57 : vector<32x32xf32>
    %c0_29 = arith.constant 0 : index
    %c0_30 = arith.constant 0 : index
    %59 = vector.load %arg2[%c0_29, %c0_30] : memref<32x32xf32, #tpu.memory_space<vmem>>, vector<32x32xf32>
    %cst_31 = arith.constant 0.000000e+00 : f32
    %60 = vector.broadcast %cst_31 : f32 to vector<32x32xf32>
    %61 = arith.cmpf ogt, %59, %60 : vector<32x32xf32>
    %cst_32 = arith.constant 0.000000e+00 : f32
    %cst_33 = arith.constant -1.000000e+32 : f32
    %62 = vector.broadcast %cst_32 : f32 to vector<32x32xf32>
    %63 = vector.broadcast %cst_33 : f32 to vector<32x32xf32>
    %64 = arith.select %61, %62, %63 : vector<32x32xi1>, vector<32x32xf32>
    %65 = tpu.iota {dimensions = array<i32: 0>} : vector<32x32xi32>
    %c32_i32 = arith.constant 32 : i32
    %66 = arith.muli %arg1, %c32_i32 : i32
    %67 = vector.broadcast %66 : i32 to vector<32x32xi32>
    %68 = arith.addi %65, %67 : vector<32x32xi32>
    %69 = tpu.iota {dimensions = array<i32: 1>} : vector<32x32xi32>
    %70 = arith.subi %69, %68 : vector<32x32xi32>
    %71 = math.absi %70 : vector<32x32xi32>
    %72 = arith.sitofp %71 : vector<32x32xi32> to vector<32x32xf32>
    %73 = tpu.iota {dimensions = array<i32: 0>} : vector<32x32xi32>
    %74 = tpu.iota {dimensions = array<i32: 1>} : vector<32x32xi32>
    %75 = arith.cmpi sgt, %73, %74 : vector<32x32xi32>
    %cst_34 = arith.constant 1.000000e+00 : f32
    %cst_35 = arith.constant 0.000000e+00 : f32
    %76 = vector.broadcast %cst_34 : f32 to vector<32x32xf32>
    %77 = vector.broadcast %cst_35 : f32 to vector<32x32xf32>
    %78 = arith.select %75, %76, %77 : vector<32x32xi1>, vector<32x32xf32>
    %79 = arith.truncf %78 : vector<32x32xf32> to vector<32x32xbf16>
    %80 = vector.extract_strided_slice %20 {offsets = [0, 0], sizes = [32, 8], strides = [1, 1]} : vector<32x32xf32> to vector<32x8xf32>
    %81 = vector.extract_strided_slice %39 {offsets = [0, 0], sizes = [32, 8], strides = [1, 1]} : vector<32x32xf32> to vector<32x8xf32>
    %82 = vector.extract_strided_slice %58 {offsets = [0, 0], sizes = [32, 8], strides = [1, 1]} : vector<32x32xf32> to vector<32x8xf32>
    %83 = arith.truncf %80 : vector<32x8xf32> to vector<32x8xbf16>
    %84 = arith.extf %83 : vector<32x8xbf16> to vector<32x8xf32>
    %85 = arith.subf %80, %84 : vector<32x8xf32>
    %86 = arith.truncf %85 : vector<32x8xf32> to vector<32x8xbf16>
    %87 = arith.truncf %81 : vector<32x8xf32> to vector<32x8xbf16>
    %88 = arith.extf %87 : vector<32x8xbf16> to vector<32x8xf32>
    %89 = arith.subf %81, %88 : vector<32x8xf32>
    %90 = arith.truncf %89 : vector<32x8xf32> to vector<32x8xbf16>
    %cst_36 = arith.constant dense<0.000000e+00> : vector<32x32xf32>
    %91 = tpu.matmul %83, %87, %cst_36 {dimension_numbers = #tpu.dot_dimension_numbers<[1], [1], [0], [0], [0, 0, 1, 0], [], []>} : vector<32x8xbf16>, vector<32x8xbf16>, vector<32x32xf32> -> vector<32x32xf32>
    %cst_37 = arith.constant dense<0.000000e+00> : vector<32x32xf32>
    %92 = tpu.matmul %86, %87, %cst_37 {dimension_numbers = #tpu.dot_dimension_numbers<[1], [1], [0], [0], [0, 0, 1, 0], [], []>} : vector<32x8xbf16>, vector<32x8xbf16>, vector<32x32xf32> -> vector<32x32xf32>
    %93 = arith.addf %91, %92 : vector<32x32xf32>
    %cst_38 = arith.constant dense<0.000000e+00> : vector<32x32xf32>
    %94 = tpu.matmul %83, %90, %cst_38 {dimension_numbers = #tpu.dot_dimension_numbers<[1], [1], [0], [0], [0, 0, 1, 0], [], []>} : vector<32x8xbf16>, vector<32x8xbf16>, vector<32x32xf32> -> vector<32x32xf32>
    %95 = arith.addf %93, %94 : vector<32x32xf32>
    %96 = arith.addf %95, %64 : vector<32x32xf32>
    %cst_39 = arith.constant dense<0xFF800000> : vector<32xf32>
    %97 = vector.multi_reduction <maximumf>, %96, %cst_39 [1] : vector<32x32xf32> to vector<32xf32>
    %98 = vector.shape_cast %97 : vector<32xf32> to vector<32x1xf32>
    %99 = vector.broadcast %98 : vector<32x1xf32> to vector<32x32xf32>
    %100 = arith.subf %96, %99 : vector<32x32xf32>
    %101 = math.exp %100 : vector<32x32xf32>
    %cst_40 = arith.constant dense<0.000000e+00> : vector<32xf32>
    %102 = vector.multi_reduction <add>, %101, %cst_40 [1] : vector<32x32xf32> to vector<32xf32>
    %103 = vector.shape_cast %102 : vector<32xf32> to vector<32x1xf32>
    %104 = tpu.reciprocal %103 : vector<32x1xf32> -> vector<32x1xf32>
    %105 = vector.broadcast %104 : vector<32x1xf32> to vector<32x32xf32>
    %106 = arith.mulf %101, %105 : vector<32x32xf32>
    %107 = arith.mulf %106, %59 : vector<32x32xf32>
    %108 = arith.truncf %107 : vector<32x32xf32> to vector<32x32xbf16>
    %109 = arith.extf %108 : vector<32x32xbf16> to vector<32x32xf32>
    %110 = arith.subf %107, %109 : vector<32x32xf32>
    %111 = arith.truncf %110 : vector<32x32xf32> to vector<32x32xbf16>
    %cst_41 = arith.constant dense<0.000000e+00> : vector<32x32xf32>
    %112 = tpu.matmul %108, %79, %cst_41 {dimension_numbers = #tpu.dot_dimension_numbers<[1], [0], [0], [1], [0, 0, 1, 1], [], []>} : vector<32x32xbf16>, vector<32x32xbf16>, vector<32x32xf32> -> vector<32x32xf32>
    %cst_42 = arith.constant dense<0.000000e+00> : vector<32x32xf32>
    %113 = tpu.matmul %111, %79, %cst_42 {dimension_numbers = #tpu.dot_dimension_numbers<[1], [0], [0], [1], [0, 0, 1, 1], [], []>} : vector<32x32xbf16>, vector<32x32xbf16>, vector<32x32xf32> -> vector<32x32xf32>
    %114 = arith.addf %112, %113 : vector<32x32xf32>
    %115 = arith.mulf %114, %72 : vector<32x32xf32>
    %cst_43 = arith.constant 0.000000e+00 : f32
    %116 = vector.broadcast %cst_43 : f32 to vector<32x32xf32>
    %117 = arith.maximumf %115, %116 : vector<32x32xf32>
    %118 = math.sqrt %117 : vector<32x32xf32>
    %c0_44 = arith.constant 0 : index
    %119 = memref.load %arg3[%c0_44] : memref<4xf32, #tpu.memory_space<smem>>
    %120 = vector.broadcast %119 : f32 to vector<32x32xf32>
    %121 = arith.mulf %118, %120 : vector<32x32xf32>
    %122 = math.exp %121 : vector<32x32xf32>
    %cst_45 = arith.constant 9.99999974E-6 : f32
    %cst_46 = arith.constant 1.000000e+05 : f32
    %123 = vector.broadcast %cst_45 : f32 to vector<32x32xf32>
    %124 = arith.maximumf %123, %122 : vector<32x32xf32>
    %125 = vector.broadcast %cst_46 : f32 to vector<32x32xf32>
    %126 = arith.minimumf %125, %124 : vector<32x32xf32>
    %127 = arith.mulf %95, %126 : vector<32x32xf32>
    %128 = arith.addf %127, %64 : vector<32x32xf32>
    %cst_47 = arith.constant dense<0xFF800000> : vector<32xf32>
    %129 = vector.multi_reduction <maximumf>, %128, %cst_47 [1] : vector<32x32xf32> to vector<32xf32>
    %130 = vector.shape_cast %129 : vector<32xf32> to vector<32x1xf32>
    %131 = vector.broadcast %130 : vector<32x1xf32> to vector<32x32xf32>
    %132 = arith.subf %128, %131 : vector<32x32xf32>
    %133 = math.exp %132 : vector<32x32xf32>
    %cst_48 = arith.constant dense<0.000000e+00> : vector<32xf32>
    %134 = vector.multi_reduction <add>, %133, %cst_48 [1] : vector<32x32xf32> to vector<32xf32>
    %135 = vector.shape_cast %134 : vector<32xf32> to vector<32x1xf32>
    %136 = tpu.reciprocal %135 : vector<32x1xf32> -> vector<32x1xf32>
    %137 = vector.broadcast %136 : vector<32x1xf32> to vector<32x32xf32>
    %138 = arith.mulf %133, %137 : vector<32x32xf32>
    %c0_i32 = arith.constant 0 : i32
    %139 = vector.broadcast %c0_i32 : i32 to vector<32x32xi32>
    %140 = arith.cmpi eq, %68, %139 : vector<32x32xi32>
    %cst_49 = arith.constant 0.000000e+00 : f32
    %141 = vector.broadcast %cst_49 : f32 to vector<32x32xf32>
    %142 = arith.select %140, %141, %138 : vector<32x32xi1>, vector<32x32xf32>
    %143 = arith.truncf %142 : vector<32x32xf32> to vector<32x32xbf16>
    %144 = arith.extf %143 : vector<32x32xbf16> to vector<32x32xf32>
    %145 = arith.subf %142, %144 : vector<32x32xf32>
    %146 = arith.truncf %145 : vector<32x32xf32> to vector<32x32xbf16>
    %147 = arith.truncf %82 : vector<32x8xf32> to vector<32x8xbf16>
    %148 = arith.extf %147 : vector<32x8xbf16> to vector<32x8xf32>
    %149 = arith.subf %82, %148 : vector<32x8xf32>
    %150 = arith.truncf %149 : vector<32x8xf32> to vector<32x8xbf16>
    %cst_50 = arith.constant dense<0.000000e+00> : vector<32x8xf32>
    %151 = tpu.matmul %143, %147, %cst_50 {dimension_numbers = #tpu.dot_dimension_numbers<[1], [0], [0], [1], [0, 0, 1, 1], [], []>} : vector<32x32xbf16>, vector<32x8xbf16>, vector<32x8xf32> -> vector<32x8xf32>
    %cst_51 = arith.constant dense<0.000000e+00> : vector<32x8xf32>
    %152 = tpu.matmul %146, %147, %cst_51 {dimension_numbers = #tpu.dot_dimension_numbers<[1], [0], [0], [1], [0, 0, 1, 1], [], []>} : vector<32x32xbf16>, vector<32x8xbf16>, vector<32x8xf32> -> vector<32x8xf32>
    %153 = arith.addf %151, %152 : vector<32x8xf32>
    %cst_52 = arith.constant dense<0.000000e+00> : vector<32x8xf32>
    %154 = tpu.matmul %143, %150, %cst_52 {dimension_numbers = #tpu.dot_dimension_numbers<[1], [0], [0], [1], [0, 0, 1, 1], [], []>} : vector<32x32xbf16>, vector<32x8xbf16>, vector<32x8xf32> -> vector<32x8xf32>
    %155 = arith.addf %153, %154 : vector<32x8xf32>
    %156 = vector.extract_strided_slice %20 {offsets = [0, 8], sizes = [32, 8], strides = [1, 1]} : vector<32x32xf32> to vector<32x8xf32>
    %157 = vector.extract_strided_slice %39 {offsets = [0, 8], sizes = [32, 8], strides = [1, 1]} : vector<32x32xf32> to vector<32x8xf32>
    %158 = vector.extract_strided_slice %58 {offsets = [0, 8], sizes = [32, 8], strides = [1, 1]} : vector<32x32xf32> to vector<32x8xf32>
    %159 = arith.truncf %156 : vector<32x8xf32> to vector<32x8xbf16>
    %160 = arith.extf %159 : vector<32x8xbf16> to vector<32x8xf32>
    %161 = arith.subf %156, %160 : vector<32x8xf32>
    %162 = arith.truncf %161 : vector<32x8xf32> to vector<32x8xbf16>
    %163 = arith.truncf %157 : vector<32x8xf32> to vector<32x8xbf16>
    %164 = arith.extf %163 : vector<32x8xbf16> to vector<32x8xf32>
    %165 = arith.subf %157, %164 : vector<32x8xf32>
    %166 = arith.truncf %165 : vector<32x8xf32> to vector<32x8xbf16>
    %cst_53 = arith.constant dense<0.000000e+00> : vector<32x32xf32>
    %167 = tpu.matmul %159, %163, %cst_53 {dimension_numbers = #tpu.dot_dimension_numbers<[1], [1], [0], [0], [0, 0, 1, 0], [], []>} : vector<32x8xbf16>, vector<32x8xbf16>, vector<32x32xf32> -> vector<32x32xf32>
    %cst_54 = arith.constant dense<0.000000e+00> : vector<32x32xf32>
    %168 = tpu.matmul %162, %163, %cst_54 {dimension_numbers = #tpu.dot_dimension_numbers<[1], [1], [0], [0], [0, 0, 1, 0], [], []>} : vector<32x8xbf16>, vector<32x8xbf16>, vector<32x32xf32> -> vector<32x32xf32>
    %169 = arith.addf %167, %168 : vector<32x32xf32>
    %cst_55 = arith.constant dense<0.000000e+00> : vector<32x32xf32>
    %170 = tpu.matmul %159, %166, %cst_55 {dimension_numbers = #tpu.dot_dimension_numbers<[1], [1], [0], [0], [0, 0, 1, 0], [], []>} : vector<32x8xbf16>, vector<32x8xbf16>, vector<32x32xf32> -> vector<32x32xf32>
    %171 = arith.addf %169, %170 : vector<32x32xf32>
    %172 = arith.addf %171, %64 : vector<32x32xf32>
    %cst_56 = arith.constant dense<0xFF800000> : vector<32xf32>
    %173 = vector.multi_reduction <maximumf>, %172, %cst_56 [1] : vector<32x32xf32> to vector<32xf32>
    %174 = vector.shape_cast %173 : vector<32xf32> to vector<32x1xf32>
    %175 = vector.broadcast %174 : vector<32x1xf32> to vector<32x32xf32>
    %176 = arith.subf %172, %175 : vector<32x32xf32>
    %177 = math.exp %176 : vector<32x32xf32>
    %cst_57 = arith.constant dense<0.000000e+00> : vector<32xf32>
    %178 = vector.multi_reduction <add>, %177, %cst_57 [1] : vector<32x32xf32> to vector<32xf32>
    %179 = vector.shape_cast %178 : vector<32xf32> to vector<32x1xf32>
    %180 = tpu.reciprocal %179 : vector<32x1xf32> -> vector<32x1xf32>
    %181 = vector.broadcast %180 : vector<32x1xf32> to vector<32x32xf32>
    %182 = arith.mulf %177, %181 : vector<32x32xf32>
    %183 = arith.mulf %182, %59 : vector<32x32xf32>
    %184 = arith.truncf %183 : vector<32x32xf32> to vector<32x32xbf16>
    %185 = arith.extf %184 : vector<32x32xbf16> to vector<32x32xf32>
    %186 = arith.subf %183, %185 : vector<32x32xf32>
    %187 = arith.truncf %186 : vector<32x32xf32> to vector<32x32xbf16>
    %cst_58 = arith.constant dense<0.000000e+00> : vector<32x32xf32>
    %188 = tpu.matmul %184, %79, %cst_58 {dimension_numbers = #tpu.dot_dimension_numbers<[1], [0], [0], [1], [0, 0, 1, 1], [], []>} : vector<32x32xbf16>, vector<32x32xbf16>, vector<32x32xf32> -> vector<32x32xf32>
    %cst_59 = arith.constant dense<0.000000e+00> : vector<32x32xf32>
    %189 = tpu.matmul %187, %79, %cst_59 {dimension_numbers = #tpu.dot_dimension_numbers<[1], [0], [0], [1], [0, 0, 1, 1], [], []>} : vector<32x32xbf16>, vector<32x32xbf16>, vector<32x32xf32> -> vector<32x32xf32>
    %190 = arith.addf %188, %189 : vector<32x32xf32>
    %191 = arith.mulf %190, %72 : vector<32x32xf32>
    %cst_60 = arith.constant 0.000000e+00 : f32
    %192 = vector.broadcast %cst_60 : f32 to vector<32x32xf32>
    %193 = arith.maximumf %191, %192 : vector<32x32xf32>
    %194 = math.sqrt %193 : vector<32x32xf32>
    %c1 = arith.constant 1 : index
    %195 = memref.load %arg3[%c1] : memref<4xf32, #tpu.memory_space<smem>>
    %196 = vector.broadcast %195 : f32 to vector<32x32xf32>
    %197 = arith.mulf %194, %196 : vector<32x32xf32>
    %198 = math.exp %197 : vector<32x32xf32>
    %cst_61 = arith.constant 9.99999974E-6 : f32
    %cst_62 = arith.constant 1.000000e+05 : f32
    %199 = vector.broadcast %cst_61 : f32 to vector<32x32xf32>
    %200 = arith.maximumf %199, %198 : vector<32x32xf32>
    %201 = vector.broadcast %cst_62 : f32 to vector<32x32xf32>
    %202 = arith.minimumf %201, %200 : vector<32x32xf32>
    %203 = arith.mulf %171, %202 : vector<32x32xf32>
    %204 = arith.addf %203, %64 : vector<32x32xf32>
    %cst_63 = arith.constant dense<0xFF800000> : vector<32xf32>
    %205 = vector.multi_reduction <maximumf>, %204, %cst_63 [1] : vector<32x32xf32> to vector<32xf32>
    %206 = vector.shape_cast %205 : vector<32xf32> to vector<32x1xf32>
    %207 = vector.broadcast %206 : vector<32x1xf32> to vector<32x32xf32>
    %208 = arith.subf %204, %207 : vector<32x32xf32>
    %209 = math.exp %208 : vector<32x32xf32>
    %cst_64 = arith.constant dense<0.000000e+00> : vector<32xf32>
    %210 = vector.multi_reduction <add>, %209, %cst_64 [1] : vector<32x32xf32> to vector<32xf32>
    %211 = vector.shape_cast %210 : vector<32xf32> to vector<32x1xf32>
    %212 = tpu.reciprocal %211 : vector<32x1xf32> -> vector<32x1xf32>
    %213 = vector.broadcast %212 : vector<32x1xf32> to vector<32x32xf32>
    %214 = arith.mulf %209, %213 : vector<32x32xf32>
    %c0_i32_65 = arith.constant 0 : i32
    %215 = vector.broadcast %c0_i32_65 : i32 to vector<32x32xi32>
    %216 = arith.cmpi eq, %68, %215 : vector<32x32xi32>
    %cst_66 = arith.constant 0.000000e+00 : f32
    %217 = vector.broadcast %cst_66 : f32 to vector<32x32xf32>
    %218 = arith.select %216, %217, %214 : vector<32x32xi1>, vector<32x32xf32>
    %219 = arith.truncf %218 : vector<32x32xf32> to vector<32x32xbf16>
    %220 = arith.extf %219 : vector<32x32xbf16> to vector<32x32xf32>
    %221 = arith.subf %218, %220 : vector<32x32xf32>
    %222 = arith.truncf %221 : vector<32x32xf32> to vector<32x32xbf16>
    %223 = arith.truncf %158 : vector<32x8xf32> to vector<32x8xbf16>
    %224 = arith.extf %223 : vector<32x8xbf16> to vector<32x8xf32>
    %225 = arith.subf %158, %224 : vector<32x8xf32>
    %226 = arith.truncf %225 : vector<32x8xf32> to vector<32x8xbf16>
    %cst_67 = arith.constant dense<0.000000e+00> : vector<32x8xf32>
    %227 = tpu.matmul %219, %223, %cst_67 {dimension_numbers = #tpu.dot_dimension_numbers<[1], [0], [0], [1], [0, 0, 1, 1], [], []>} : vector<32x32xbf16>, vector<32x8xbf16>, vector<32x8xf32> -> vector<32x8xf32>
    %cst_68 = arith.constant dense<0.000000e+00> : vector<32x8xf32>
    %228 = tpu.matmul %222, %223, %cst_68 {dimension_numbers = #tpu.dot_dimension_numbers<[1], [0], [0], [1], [0, 0, 1, 1], [], []>} : vector<32x32xbf16>, vector<32x8xbf16>, vector<32x8xf32> -> vector<32x8xf32>
    %229 = arith.addf %227, %228 : vector<32x8xf32>
    %cst_69 = arith.constant dense<0.000000e+00> : vector<32x8xf32>
    %230 = tpu.matmul %219, %226, %cst_69 {dimension_numbers = #tpu.dot_dimension_numbers<[1], [0], [0], [1], [0, 0, 1, 1], [], []>} : vector<32x32xbf16>, vector<32x8xbf16>, vector<32x8xf32> -> vector<32x8xf32>
    %231 = arith.addf %229, %230 : vector<32x8xf32>
    %232 = vector.extract_strided_slice %20 {offsets = [0, 16], sizes = [32, 8], strides = [1, 1]} : vector<32x32xf32> to vector<32x8xf32>
    %233 = vector.extract_strided_slice %39 {offsets = [0, 16], sizes = [32, 8], strides = [1, 1]} : vector<32x32xf32> to vector<32x8xf32>
    %234 = vector.extract_strided_slice %58 {offsets = [0, 16], sizes = [32, 8], strides = [1, 1]} : vector<32x32xf32> to vector<32x8xf32>
    %235 = arith.truncf %232 : vector<32x8xf32> to vector<32x8xbf16>
    %236 = arith.extf %235 : vector<32x8xbf16> to vector<32x8xf32>
    %237 = arith.subf %232, %236 : vector<32x8xf32>
    %238 = arith.truncf %237 : vector<32x8xf32> to vector<32x8xbf16>
    %239 = arith.truncf %233 : vector<32x8xf32> to vector<32x8xbf16>
    %240 = arith.extf %239 : vector<32x8xbf16> to vector<32x8xf32>
    %241 = arith.subf %233, %240 : vector<32x8xf32>
    %242 = arith.truncf %241 : vector<32x8xf32> to vector<32x8xbf16>
    %cst_70 = arith.constant dense<0.000000e+00> : vector<32x32xf32>
    %243 = tpu.matmul %235, %239, %cst_70 {dimension_numbers = #tpu.dot_dimension_numbers<[1], [1], [0], [0], [0, 0, 1, 0], [], []>} : vector<32x8xbf16>, vector<32x8xbf16>, vector<32x32xf32> -> vector<32x32xf32>
    %cst_71 = arith.constant dense<0.000000e+00> : vector<32x32xf32>
    %244 = tpu.matmul %238, %239, %cst_71 {dimension_numbers = #tpu.dot_dimension_numbers<[1], [1], [0], [0], [0, 0, 1, 0], [], []>} : vector<32x8xbf16>, vector<32x8xbf16>, vector<32x32xf32> -> vector<32x32xf32>
    %245 = arith.addf %243, %244 : vector<32x32xf32>
    %cst_72 = arith.constant dense<0.000000e+00> : vector<32x32xf32>
    %246 = tpu.matmul %235, %242, %cst_72 {dimension_numbers = #tpu.dot_dimension_numbers<[1], [1], [0], [0], [0, 0, 1, 0], [], []>} : vector<32x8xbf16>, vector<32x8xbf16>, vector<32x32xf32> -> vector<32x32xf32>
    %247 = arith.addf %245, %246 : vector<32x32xf32>
    %248 = arith.addf %247, %64 : vector<32x32xf32>
    %cst_73 = arith.constant dense<0xFF800000> : vector<32xf32>
    %249 = vector.multi_reduction <maximumf>, %248, %cst_73 [1] : vector<32x32xf32> to vector<32xf32>
    %250 = vector.shape_cast %249 : vector<32xf32> to vector<32x1xf32>
    %251 = vector.broadcast %250 : vector<32x1xf32> to vector<32x32xf32>
    %252 = arith.subf %248, %251 : vector<32x32xf32>
    %253 = math.exp %252 : vector<32x32xf32>
    %cst_74 = arith.constant dense<0.000000e+00> : vector<32xf32>
    %254 = vector.multi_reduction <add>, %253, %cst_74 [1] : vector<32x32xf32> to vector<32xf32>
    %255 = vector.shape_cast %254 : vector<32xf32> to vector<32x1xf32>
    %256 = tpu.reciprocal %255 : vector<32x1xf32> -> vector<32x1xf32>
    %257 = vector.broadcast %256 : vector<32x1xf32> to vector<32x32xf32>
    %258 = arith.mulf %253, %257 : vector<32x32xf32>
    %259 = arith.mulf %258, %59 : vector<32x32xf32>
    %260 = arith.truncf %259 : vector<32x32xf32> to vector<32x32xbf16>
    %261 = arith.extf %260 : vector<32x32xbf16> to vector<32x32xf32>
    %262 = arith.subf %259, %261 : vector<32x32xf32>
    %263 = arith.truncf %262 : vector<32x32xf32> to vector<32x32xbf16>
    %cst_75 = arith.constant dense<0.000000e+00> : vector<32x32xf32>
    %264 = tpu.matmul %260, %79, %cst_75 {dimension_numbers = #tpu.dot_dimension_numbers<[1], [0], [0], [1], [0, 0, 1, 1], [], []>} : vector<32x32xbf16>, vector<32x32xbf16>, vector<32x32xf32> -> vector<32x32xf32>
    %cst_76 = arith.constant dense<0.000000e+00> : vector<32x32xf32>
    %265 = tpu.matmul %263, %79, %cst_76 {dimension_numbers = #tpu.dot_dimension_numbers<[1], [0], [0], [1], [0, 0, 1, 1], [], []>} : vector<32x32xbf16>, vector<32x32xbf16>, vector<32x32xf32> -> vector<32x32xf32>
    %266 = arith.addf %264, %265 : vector<32x32xf32>
    %267 = arith.mulf %266, %72 : vector<32x32xf32>
    %cst_77 = arith.constant 0.000000e+00 : f32
    %268 = vector.broadcast %cst_77 : f32 to vector<32x32xf32>
    %269 = arith.maximumf %267, %268 : vector<32x32xf32>
    %270 = math.sqrt %269 : vector<32x32xf32>
    %c2 = arith.constant 2 : index
    %271 = memref.load %arg3[%c2] : memref<4xf32, #tpu.memory_space<smem>>
    %272 = vector.broadcast %271 : f32 to vector<32x32xf32>
    %273 = arith.mulf %270, %272 : vector<32x32xf32>
    %274 = math.exp %273 : vector<32x32xf32>
    %cst_78 = arith.constant 9.99999974E-6 : f32
    %cst_79 = arith.constant 1.000000e+05 : f32
    %275 = vector.broadcast %cst_78 : f32 to vector<32x32xf32>
    %276 = arith.maximumf %275, %274 : vector<32x32xf32>
    %277 = vector.broadcast %cst_79 : f32 to vector<32x32xf32>
    %278 = arith.minimumf %277, %276 : vector<32x32xf32>
    %279 = arith.mulf %247, %278 : vector<32x32xf32>
    %280 = arith.addf %279, %64 : vector<32x32xf32>
    %cst_80 = arith.constant dense<0xFF800000> : vector<32xf32>
    %281 = vector.multi_reduction <maximumf>, %280, %cst_80 [1] : vector<32x32xf32> to vector<32xf32>
    %282 = vector.shape_cast %281 : vector<32xf32> to vector<32x1xf32>
    %283 = vector.broadcast %282 : vector<32x1xf32> to vector<32x32xf32>
    %284 = arith.subf %280, %283 : vector<32x32xf32>
    %285 = math.exp %284 : vector<32x32xf32>
    %cst_81 = arith.constant dense<0.000000e+00> : vector<32xf32>
    %286 = vector.multi_reduction <add>, %285, %cst_81 [1] : vector<32x32xf32> to vector<32xf32>
    %287 = vector.shape_cast %286 : vector<32xf32> to vector<32x1xf32>
    %288 = tpu.reciprocal %287 : vector<32x1xf32> -> vector<32x1xf32>
    %289 = vector.broadcast %288 : vector<32x1xf32> to vector<32x32xf32>
    %290 = arith.mulf %285, %289 : vector<32x32xf32>
    %c0_i32_82 = arith.constant 0 : i32
    %291 = vector.broadcast %c0_i32_82 : i32 to vector<32x32xi32>
    %292 = arith.cmpi eq, %68, %291 : vector<32x32xi32>
    %cst_83 = arith.constant 0.000000e+00 : f32
    %293 = vector.broadcast %cst_83 : f32 to vector<32x32xf32>
    %294 = arith.select %292, %293, %290 : vector<32x32xi1>, vector<32x32xf32>
    %295 = arith.truncf %294 : vector<32x32xf32> to vector<32x32xbf16>
    %296 = arith.extf %295 : vector<32x32xbf16> to vector<32x32xf32>
    %297 = arith.subf %294, %296 : vector<32x32xf32>
    %298 = arith.truncf %297 : vector<32x32xf32> to vector<32x32xbf16>
    %299 = arith.truncf %234 : vector<32x8xf32> to vector<32x8xbf16>
    %300 = arith.extf %299 : vector<32x8xbf16> to vector<32x8xf32>
    %301 = arith.subf %234, %300 : vector<32x8xf32>
    %302 = arith.truncf %301 : vector<32x8xf32> to vector<32x8xbf16>
    %cst_84 = arith.constant dense<0.000000e+00> : vector<32x8xf32>
    %303 = tpu.matmul %295, %299, %cst_84 {dimension_numbers = #tpu.dot_dimension_numbers<[1], [0], [0], [1], [0, 0, 1, 1], [], []>} : vector<32x32xbf16>, vector<32x8xbf16>, vector<32x8xf32> -> vector<32x8xf32>
    %cst_85 = arith.constant dense<0.000000e+00> : vector<32x8xf32>
    %304 = tpu.matmul %298, %299, %cst_85 {dimension_numbers = #tpu.dot_dimension_numbers<[1], [0], [0], [1], [0, 0, 1, 1], [], []>} : vector<32x32xbf16>, vector<32x8xbf16>, vector<32x8xf32> -> vector<32x8xf32>
    %305 = arith.addf %303, %304 : vector<32x8xf32>
    %cst_86 = arith.constant dense<0.000000e+00> : vector<32x8xf32>
    %306 = tpu.matmul %295, %302, %cst_86 {dimension_numbers = #tpu.dot_dimension_numbers<[1], [0], [0], [1], [0, 0, 1, 1], [], []>} : vector<32x32xbf16>, vector<32x8xbf16>, vector<32x8xf32> -> vector<32x8xf32>
    %307 = arith.addf %305, %306 : vector<32x8xf32>
    %308 = vector.extract_strided_slice %20 {offsets = [0, 24], sizes = [32, 8], strides = [1, 1]} : vector<32x32xf32> to vector<32x8xf32>
    %309 = vector.extract_strided_slice %39 {offsets = [0, 24], sizes = [32, 8], strides = [1, 1]} : vector<32x32xf32> to vector<32x8xf32>
    %310 = vector.extract_strided_slice %58 {offsets = [0, 24], sizes = [32, 8], strides = [1, 1]} : vector<32x32xf32> to vector<32x8xf32>
    %311 = arith.truncf %308 : vector<32x8xf32> to vector<32x8xbf16>
    %312 = arith.extf %311 : vector<32x8xbf16> to vector<32x8xf32>
    %313 = arith.subf %308, %312 : vector<32x8xf32>
    %314 = arith.truncf %313 : vector<32x8xf32> to vector<32x8xbf16>
    %315 = arith.truncf %309 : vector<32x8xf32> to vector<32x8xbf16>
    %316 = arith.extf %315 : vector<32x8xbf16> to vector<32x8xf32>
    %317 = arith.subf %309, %316 : vector<32x8xf32>
    %318 = arith.truncf %317 : vector<32x8xf32> to vector<32x8xbf16>
    %cst_87 = arith.constant dense<0.000000e+00> : vector<32x32xf32>
    %319 = tpu.matmul %311, %315, %cst_87 {dimension_numbers = #tpu.dot_dimension_numbers<[1], [1], [0], [0], [0, 0, 1, 0], [], []>} : vector<32x8xbf16>, vector<32x8xbf16>, vector<32x32xf32> -> vector<32x32xf32>
    %cst_88 = arith.constant dense<0.000000e+00> : vector<32x32xf32>
    %320 = tpu.matmul %314, %315, %cst_88 {dimension_numbers = #tpu.dot_dimension_numbers<[1], [1], [0], [0], [0, 0, 1, 0], [], []>} : vector<32x8xbf16>, vector<32x8xbf16>, vector<32x32xf32> -> vector<32x32xf32>
    %321 = arith.addf %319, %320 : vector<32x32xf32>
    %cst_89 = arith.constant dense<0.000000e+00> : vector<32x32xf32>
    %322 = tpu.matmul %311, %318, %cst_89 {dimension_numbers = #tpu.dot_dimension_numbers<[1], [1], [0], [0], [0, 0, 1, 0], [], []>} : vector<32x8xbf16>, vector<32x8xbf16>, vector<32x32xf32> -> vector<32x32xf32>
    %323 = arith.addf %321, %322 : vector<32x32xf32>
    %324 = arith.addf %323, %64 : vector<32x32xf32>
    %cst_90 = arith.constant dense<0xFF800000> : vector<32xf32>
    %325 = vector.multi_reduction <maximumf>, %324, %cst_90 [1] : vector<32x32xf32> to vector<32xf32>
    %326 = vector.shape_cast %325 : vector<32xf32> to vector<32x1xf32>
    %327 = vector.broadcast %326 : vector<32x1xf32> to vector<32x32xf32>
    %328 = arith.subf %324, %327 : vector<32x32xf32>
    %329 = math.exp %328 : vector<32x32xf32>
    %cst_91 = arith.constant dense<0.000000e+00> : vector<32xf32>
    %330 = vector.multi_reduction <add>, %329, %cst_91 [1] : vector<32x32xf32> to vector<32xf32>
    %331 = vector.shape_cast %330 : vector<32xf32> to vector<32x1xf32>
    %332 = tpu.reciprocal %331 : vector<32x1xf32> -> vector<32x1xf32>
    %333 = vector.broadcast %332 : vector<32x1xf32> to vector<32x32xf32>
    %334 = arith.mulf %329, %333 : vector<32x32xf32>
    %335 = arith.mulf %334, %59 : vector<32x32xf32>
    %336 = arith.truncf %335 : vector<32x32xf32> to vector<32x32xbf16>
    %337 = arith.extf %336 : vector<32x32xbf16> to vector<32x32xf32>
    %338 = arith.subf %335, %337 : vector<32x32xf32>
    %339 = arith.truncf %338 : vector<32x32xf32> to vector<32x32xbf16>
    %cst_92 = arith.constant dense<0.000000e+00> : vector<32x32xf32>
    %340 = tpu.matmul %336, %79, %cst_92 {dimension_numbers = #tpu.dot_dimension_numbers<[1], [0], [0], [1], [0, 0, 1, 1], [], []>} : vector<32x32xbf16>, vector<32x32xbf16>, vector<32x32xf32> -> vector<32x32xf32>
    %cst_93 = arith.constant dense<0.000000e+00> : vector<32x32xf32>
    %341 = tpu.matmul %339, %79, %cst_93 {dimension_numbers = #tpu.dot_dimension_numbers<[1], [0], [0], [1], [0, 0, 1, 1], [], []>} : vector<32x32xbf16>, vector<32x32xbf16>, vector<32x32xf32> -> vector<32x32xf32>
    %342 = arith.addf %340, %341 : vector<32x32xf32>
    %343 = arith.mulf %342, %72 : vector<32x32xf32>
    %cst_94 = arith.constant 0.000000e+00 : f32
    %344 = vector.broadcast %cst_94 : f32 to vector<32x32xf32>
    %345 = arith.maximumf %343, %344 : vector<32x32xf32>
    %346 = math.sqrt %345 : vector<32x32xf32>
    %c3 = arith.constant 3 : index
    %347 = memref.load %arg3[%c3] : memref<4xf32, #tpu.memory_space<smem>>
    %348 = vector.broadcast %347 : f32 to vector<32x32xf32>
    %349 = arith.mulf %346, %348 : vector<32x32xf32>
    %350 = math.exp %349 : vector<32x32xf32>
    %cst_95 = arith.constant 9.99999974E-6 : f32
    %cst_96 = arith.constant 1.000000e+05 : f32
    %351 = vector.broadcast %cst_95 : f32 to vector<32x32xf32>
    %352 = arith.maximumf %351, %350 : vector<32x32xf32>
    %353 = vector.broadcast %cst_96 : f32 to vector<32x32xf32>
    %354 = arith.minimumf %353, %352 : vector<32x32xf32>
    %355 = arith.mulf %323, %354 : vector<32x32xf32>
    %356 = arith.addf %355, %64 : vector<32x32xf32>
    %cst_97 = arith.constant dense<0xFF800000> : vector<32xf32>
    %357 = vector.multi_reduction <maximumf>, %356, %cst_97 [1] : vector<32x32xf32> to vector<32xf32>
    %358 = vector.shape_cast %357 : vector<32xf32> to vector<32x1xf32>
    %359 = vector.broadcast %358 : vector<32x1xf32> to vector<32x32xf32>
    %360 = arith.subf %356, %359 : vector<32x32xf32>
    %361 = math.exp %360 : vector<32x32xf32>
    %cst_98 = arith.constant dense<0.000000e+00> : vector<32xf32>
    %362 = vector.multi_reduction <add>, %361, %cst_98 [1] : vector<32x32xf32> to vector<32xf32>
    %363 = vector.shape_cast %362 : vector<32xf32> to vector<32x1xf32>
    %364 = tpu.reciprocal %363 : vector<32x1xf32> -> vector<32x1xf32>
    %365 = vector.broadcast %364 : vector<32x1xf32> to vector<32x32xf32>
    %366 = arith.mulf %361, %365 : vector<32x32xf32>
    %c0_i32_99 = arith.constant 0 : i32
    %367 = vector.broadcast %c0_i32_99 : i32 to vector<32x32xi32>
    %368 = arith.cmpi eq, %68, %367 : vector<32x32xi32>
    %cst_100 = arith.constant 0.000000e+00 : f32
    %369 = vector.broadcast %cst_100 : f32 to vector<32x32xf32>
    %370 = arith.select %368, %369, %366 : vector<32x32xi1>, vector<32x32xf32>
    %371 = arith.truncf %370 : vector<32x32xf32> to vector<32x32xbf16>
    %372 = arith.extf %371 : vector<32x32xbf16> to vector<32x32xf32>
    %373 = arith.subf %370, %372 : vector<32x32xf32>
    %374 = arith.truncf %373 : vector<32x32xf32> to vector<32x32xbf16>
    %375 = arith.truncf %310 : vector<32x8xf32> to vector<32x8xbf16>
    %376 = arith.extf %375 : vector<32x8xbf16> to vector<32x8xf32>
    %377 = arith.subf %310, %376 : vector<32x8xf32>
    %378 = arith.truncf %377 : vector<32x8xf32> to vector<32x8xbf16>
    %cst_101 = arith.constant dense<0.000000e+00> : vector<32x8xf32>
    %379 = tpu.matmul %371, %375, %cst_101 {dimension_numbers = #tpu.dot_dimension_numbers<[1], [0], [0], [1], [0, 0, 1, 1], [], []>} : vector<32x32xbf16>, vector<32x8xbf16>, vector<32x8xf32> -> vector<32x8xf32>
    %cst_102 = arith.constant dense<0.000000e+00> : vector<32x8xf32>
    %380 = tpu.matmul %374, %375, %cst_102 {dimension_numbers = #tpu.dot_dimension_numbers<[1], [0], [0], [1], [0, 0, 1, 1], [], []>} : vector<32x32xbf16>, vector<32x8xbf16>, vector<32x8xf32> -> vector<32x8xf32>
    %381 = arith.addf %379, %380 : vector<32x8xf32>
    %cst_103 = arith.constant dense<0.000000e+00> : vector<32x8xf32>
    %382 = tpu.matmul %371, %378, %cst_103 {dimension_numbers = #tpu.dot_dimension_numbers<[1], [0], [0], [1], [0, 0, 1, 1], [], []>} : vector<32x32xbf16>, vector<32x8xbf16>, vector<32x8xf32> -> vector<32x8xf32>
    %383 = arith.addf %381, %382 : vector<32x8xf32>
    %384 = tpu.concatenate %155, %231, %307, %383 in 1 : vector<32x8xf32>, vector<32x8xf32>, vector<32x8xf32>, vector<32x8xf32> -> vector<32x32xf32>
    %c0_104 = arith.constant 0 : index
    %c0_105 = arith.constant 0 : index
    %385 = vector.load %arg13[%c0_104, %c0_105] : memref<32x32xf32, #tpu.memory_space<vmem>>, vector<32x32xf32>
    %386 = arith.truncf %384 : vector<32x32xf32> to vector<32x32xbf16>
    %387 = arith.extf %386 : vector<32x32xbf16> to vector<32x32xf32>
    %388 = arith.subf %384, %387 : vector<32x32xf32>
    %389 = arith.truncf %388 : vector<32x32xf32> to vector<32x32xbf16>
    %390 = arith.truncf %385 : vector<32x32xf32> to vector<32x32xbf16>
    %391 = arith.extf %390 : vector<32x32xbf16> to vector<32x32xf32>
    %392 = arith.subf %385, %391 : vector<32x32xf32>
    %393 = arith.truncf %392 : vector<32x32xf32> to vector<32x32xbf16>
    %cst_106 = arith.constant dense<0.000000e+00> : vector<32x32xf32>
    %394 = tpu.matmul %386, %390, %cst_106 {dimension_numbers = #tpu.dot_dimension_numbers<[1], [0], [0], [1], [0, 0, 1, 1], [], []>} : vector<32x32xbf16>, vector<32x32xbf16>, vector<32x32xf32> -> vector<32x32xf32>
    %cst_107 = arith.constant dense<0.000000e+00> : vector<32x32xf32>
    %395 = tpu.matmul %389, %390, %cst_107 {dimension_numbers = #tpu.dot_dimension_numbers<[1], [0], [0], [1], [0, 0, 1, 1], [], []>} : vector<32x32xbf16>, vector<32x32xbf16>, vector<32x32xf32> -> vector<32x32xf32>
    %396 = arith.addf %394, %395 : vector<32x32xf32>
    %cst_108 = arith.constant dense<0.000000e+00> : vector<32x32xf32>
    %397 = tpu.matmul %386, %393, %cst_108 {dimension_numbers = #tpu.dot_dimension_numbers<[1], [0], [0], [1], [0, 0, 1, 1], [], []>} : vector<32x32xbf16>, vector<32x32xbf16>, vector<32x32xf32> -> vector<32x32xf32>
    %398 = arith.addf %396, %397 : vector<32x32xf32>
    %c0_109 = arith.constant 0 : index
    %c0_110 = arith.constant 0 : index
    %399 = vector.load %arg14[%c0_109, %c0_110] : memref<1x32xf32, #tpu.memory_space<vmem>>, vector<1x32xf32>
    %400 = vector.broadcast %399 : vector<1x32xf32> to vector<32x32xf32>
    %401 = arith.addf %398, %400 : vector<32x32xf32>
    %c0_111 = arith.constant 0 : index
    %c0_112 = arith.constant 0 : index
    %c0_113 = arith.constant 0 : index
    %402 = vector.load %arg15[%c0_111, %c0_112, %c0_113] : memref<1x32x32xf32, #tpu.memory_space<vmem>>, vector<1x32x32xf32>
    %403 = vector.shape_cast %402 : vector<1x32x32xf32> to vector<32x32xf32>
    %404 = vector.shape_cast %401 : vector<32x32xf32> to vector<1x32x32xf32>
    tpu.vector_store %arg15[%c0_111, %c0_112, %c0_113], %404 {strides = array<i32>} : memref<1x32x32xf32, #tpu.memory_space<vmem>>, vector<1x32x32xf32>,
    return
  }
  func.func @transform_0(%arg0: i32, %arg1: i32) -> (i32, i32) {
    %c0_i32 = arith.constant 0 : i32
    %c0_i32_0 = arith.constant 0 : i32
    return %arg1, %c0_i32 : i32, i32
  }
  func.func @transform_1(%arg0: i32, %arg1: i32) -> i32 {
    %c0_i32 = arith.constant 0 : i32
    %c0_i32_0 = arith.constant 0 : i32
    return %c0_i32 : i32
  }
  func.func @transform_2(%arg0: i32, %arg1: i32) -> (i32, i32, i32) {
    %c0_i32 = arith.constant 0 : i32
    %c0_i32_0 = arith.constant 0 : i32
    return %arg0, %arg1, %c0_i32 : i32, i32, i32
  }
  func.func @transform_3(%arg0: i32, %arg1: i32) -> (i32, i32, i32) {
    %c0_i32 = arith.constant 0 : i32
    %c0_i32_0 = arith.constant 0 : i32
    %c0_i32_1 = arith.constant 0 : i32
    return %arg0, %c0_i32, %c0_i32_0 : i32, i32, i32
  }
  func.func @transform_4(%arg0: i32, %arg1: i32) -> (i32, i32, i32) {
    %c0_i32 = arith.constant 0 : i32
    %c0_i32_0 = arith.constant 0 : i32
    %c0_i32_1 = arith.constant 0 : i32
    return %arg0, %c0_i32, %c0_i32_0 : i32, i32, i32
  }
  func.func @transform_5(%arg0: i32, %arg1: i32) -> (i32, i32) {
    %c0_i32 = arith.constant 0 : i32
    %c0_i32_0 = arith.constant 0 : i32
    %c0_i32_1 = arith.constant 0 : i32
    return %c0_i32, %c0_i32_0 : i32, i32
  }
  func.func @transform_6(%arg0: i32, %arg1: i32) -> (i32, i32) {
    %c0_i32 = arith.constant 0 : i32
    %c0_i32_0 = arith.constant 0 : i32
    %c0_i32_1 = arith.constant 0 : i32
    return %c0_i32, %c0_i32_0 : i32, i32
  }
  func.func @transform_7(%arg0: i32, %arg1: i32) -> (i32, i32) {
    %c0_i32 = arith.constant 0 : i32
    %c0_i32_0 = arith.constant 0 : i32
    %c0_i32_1 = arith.constant 0 : i32
    return %c0_i32, %c0_i32_0 : i32, i32
  }
  func.func @transform_8(%arg0: i32, %arg1: i32) -> (i32, i32) {
    %c0_i32 = arith.constant 0 : i32
    %c0_i32_0 = arith.constant 0 : i32
    %c0_i32_1 = arith.constant 0 : i32
    return %c0_i32, %c0_i32_0 : i32, i32
  }
  func.func @transform_9(%arg0: i32, %arg1: i32) -> (i32, i32) {
    %c0_i32 = arith.constant 0 : i32
    %c0_i32_0 = arith.constant 0 : i32
    %c0_i32_1 = arith.constant 0 : i32
    return %c0_i32, %c0_i32_0 : i32, i32
  }
  func.func @transform_10(%arg0: i32, %arg1: i32) -> (i32, i32) {
    %c0_i32 = arith.constant 0 : i32
    %c0_i32_0 = arith.constant 0 : i32
    %c0_i32_1 = arith.constant 0 : i32
    return %c0_i32, %c0_i32_0 : i32, i32
  }
  func.func @transform_11(%arg0: i32, %arg1: i32) -> (i32, i32) {
    %c0_i32 = arith.constant 0 : i32
    %c0_i32_0 = arith.constant 0 : i32
    %c0_i32_1 = arith.constant 0 : i32
    return %c0_i32, %c0_i32_0 : i32, i32
  }
  func.func @transform_12(%arg0: i32, %arg1: i32) -> (i32, i32) {
    %c0_i32 = arith.constant 0 : i32
    %c0_i32_0 = arith.constant 0 : i32
    %c0_i32_1 = arith.constant 0 : i32
    return %c0_i32, %c0_i32_0 : i32, i32
  }
  func.func @transform_13(%arg0: i32, %arg1: i32) -> (i32, i32, i32) {
    %c0_i32 = arith.constant 0 : i32
    %c0_i32_0 = arith.constant 0 : i32
    return %arg0, %arg1, %c0_i32 : i32, i32, i32
  }
}

</mosaic_0001>

<bundles_post_ra>
// kernel: tpu_custom_call.1
= control target key start
LH: loop header
LB: loop body
LE: loop exit
PB: predicated region body
PF: predicated region fallthrough
CT: control target
= control target key end

     0   :  { %s5909_s0 = inlined_call_operand.hbm [shape: f32[32,32], index: 0, kind: input, shape index: {}]   ;;  %s5910_s1 = inlined_call_operand.hbm [shape: f32[4], index: 1, kind: input, shape index: {}]   ;;  %s5911_s2 = inlined_call_operand.hbm [shape: f32[2,32,32], index: 2, kind: input, shape index: {}]   ;;  %s5912_s3 = inlined_call_operand.hbm [shape: f32[2,32,32], index: 3, kind: input, shape index: {}]   ;;  %s5913_s4 = inlined_call_operand.hbm [shape: f32[2,32,32], index: 4, kind: input, shape index: {}]   ;;  %s5914_s5 = inlined_call_operand.hbm [shape: f32[32,32], index: 5, kind: input, shape index: {}]   ;;  %s5915_s6 = inlined_call_operand.vmem [shape: f32[1,32], index: 6, kind: input, shape index: {}]   ;;  %s5916_s7 = inlined_call_operand.hbm [shape: f32[32,32], index: 7, kind: input, shape index: {}]   ;;  %s5917_s8 = inlined_call_operand.vmem [shape: f32[1,32], index: 8, kind: input, shape index: {}]   ;;  %s5918_s9 = inlined_call_operand.hbm [shape: f32[32,32], index: 9, kind: input, shape index: {}]   ;;  %s5919_s10 = inlined_call_operand.vmem [shape: f32[1,32], index: 10, kind: input, shape index: {}]   ;;  %s5920_s11 = inlined_call_operand.hbm [shape: f32[32,32], index: 11, kind: input, shape index: {}]   ;;  %s5921_s12 = inlined_call_operand.vmem [shape: f32[1,32], index: 12, kind: input, shape index: {}]   ;;  %s5922_s13 = inlined_call_operand.hbm [shape: f32[2,32,32], index: 13, kind: output, shape index: {}]  }
   0x1   :  { %5937 = sst [smem:[#allocation42_spill]] %s5909_s0 }
   0x2   :  { %5938 = sst [smem:[#allocation43_spill]] %s5911_s2 }
   0x3   :  { %5939 = sst [smem:[#allocation44_spill]] %s5914_s5 }
   0x4   :  { %5940 = sst [smem:[#allocation45_spill]] %s5916_s7 }
   0x5   :  { %5941 = sst [smem:[#allocation46_spill]] %s5921_s12 }
   0x6   :  { %5942 = sst [smem:[#allocation47_spill]] %s5922_s13 }
   0x7   :  { %18 = vsyncpa [#allocation3], 0 }
   0x8   :  { %19 = vsyncpa [#allocation5], 0 }
   0x9   :  { %20 = vsyncpa [#allocation8], 0 }
   0xa   :  { %22 = vsyncpa [#allocation8 + $0x1], 0 }
   0xb   :  { %23 = vsyncpa [#allocation11], 0 }
   0xc   :  { %25 = vsyncpa [#allocation11 + $0x1], 0 }
   0xd   :  { %26 = vsyncpa [#allocation14], 0 }
   0xe   :  { %27 = vsyncpa [#allocation17], 0 }
   0xf   :  { %28 = vsyncpa [#allocation4], 0 }
  0x10   :  { %30 = vsyncpa [#allocation4 + $0x1], 0  ;;  %s4872_s25 = smov 0   ;;  %s4874_s26 = smov 0  }
  0x11   :  { %s4876_s27 = smov 0   ;;  %s4878_s28 = smov 0  }
  0x12   :  { %s4880_s29 = smov 0   ;;  %s4882_s30 = smov 0  }
  0x13 LB: > { %5943 = sst [smem:[#allocation27_spill]] %s4763_s25  ;;  %s4903_s14 = sadd.s32 4294967295, %s4783_s30   ;;  %s4783_s30 = sphi %s4882_s30, %s36_s30   ;;  %s4779_s29 = sphi %s4880_s29, %s5997_s29   ;;  %s4775_s28 = sphi %s4878_s28, %s5993_s28   ;;  %s4771_s27 = sphi %s4876_s27, %s5992_s27   ;;  %s4767_s26 = sphi %s4874_s26, %s5996_s26   ;;  %s4763_s25 = sphi %s4872_s25, %s5995_s25  }
  0x14   : > { %5944 = sst [smem:[#allocation28_spill]] %s4771_s27  ;;  %p3914_p0 = scmp.ge.s32.totalorder %s4783_s30, 1 }
  0x15   : > { %5945 = sst [smem:[#allocation29_spill]] %s4775_s28  ;;  %p118_p1 = scmp.eq.s32.totalorder %s4903_s14, 0 }
  0x16   : > { %5946 = sst [smem:[#allocation30_spill]] %s4779_s29  ;;  %p376_p2 = scmp.lt.s32.totalorder %s4783_s30, 3 }
  0x17   : > { %s5947_s5 = sld [smem:[#allocation44_spill]]  ;;  %p3921_p4 = scmp.ge.s32.totalorder %s4783_s30, 2 }
  0x18   : > { %p4911_p3 = pnand %p3914_p0, %p376_p2  ;;  %s4785_s19 = smov [#allocation12]  }
  0x19   : > { %s416_s20 = sshll.u32 %s4785_s19, 4  ;;  %s5949_s7 = sld [smem:[#allocation45_spill]]  ;;  %s417_s20 = int_to_ptr.vmem [resolvable:$true] %s416_s20 }
  0x1a   : > { %p4106_p5 = pneg %p4911_p3  ;;  %s4786_s15 = smov [#allocation13]  }
  0x1b   : > { %s433_s16 = sshll.u32 %s4786_s15, 4  ;;  %s5923_s19 = smov 128   ;;  %s434_s16 = int_to_ptr.vmem [resolvable:$true] %s433_s16 }
  0x1c   : > { %p4923_p6 = pnand %p4106_p5, %p118_p1  ;;  %s3913_s21 = sadd.s32 4294967294, %s4783_s30  }
  0x1d   : > { %s414_s17 = sshll.u32 %s5947_s5, 4  ;;  %s5925_s5 = smov 8   ;;  %s415_s17 = int_to_ptr.hbm [resolvable:$true] %s414_s17 }
  0x1e   : > { %4115 = dma.hbm_to_vmem [thread:$0]  (!%p4923_p6), %s415_s17, 512, %s417_s20, [#allocation11], %s5923_s19, %s5923_s19, %s5925_s5  }
  0x1f   : > { %s431_s23 = sshll.u32 %s5949_s7, 4  ;;  %s48_s22 = sadd.s32 1, %s4779_s29  ;;  %s432_s23 = int_to_ptr.hbm [resolvable:$true] %s431_s23 }
  0x20   : > { %4118 = dma.hbm_to_vmem [thread:$0]  (!%p4923_p6), %s432_s23, 512, %s434_s16, [#allocation14], %s5923_s19, %s5923_s19, %s5925_s5  }
  0x21   : > { %p50_p7 = scmp.ge.s32.totalorder %s48_s22, 2  ;;  %s104_s15 = sadd.s32 1, %s4771_s27 }
  0x22   : > { %p111_p8 = scmp.ne.s32.totalorder %s4771_s27, %s4767_s26  ;;  %p112_p9 = scmp.eq.s32.totalorder %s4783_s30, 0 }
  0x23   : > { %s5999_s22 = smov (%p50_p7, %s48_s22), 0  ;;  %p117_p11 = scmp.ne.s32.totalorder %s4767_s26, %s4763_s25 }
  0x24   : > { %5951 = sst [smem:[#allocation31_spill]] %s5999_s22  ;;  %p4945_p10 = por %p112_p9, %p111_p8 }
  0x25   : > { %s99_s20 = ssub.s32 %s4779_s29, %s5999_s22  ;;  %p363_p12 = scmp.eq.s32.totalorder %s4903_s14, 1 }
  0x26   : > { %p102_p13 = scmp.eq.s32.totalorder %s99_s20, 0  ;;  %p4956_p0 = por %p118_p1, %p117_p11 }
  0x27   : > { %p4960_p2 = por %p363_p12, %p111_p8  ;;  %p369_p5 = scmp.eq.s32.totalorder %s3913_s21, 1 }
  0x28   : > { %s4965_s19 = scalar_select %p102_p13, %s4771_s27, %s104_s15  }
  0x29   : > { %s5954_s16 = scalar_select %p4960_p2, 1, 0 }
  0x2a   : > { %5956 = sst [smem:[#allocation33_spill]] %s4965_s19  ;;  %p4967_p7 = por %p369_p5, %p117_p11 }
  0x2b   : > { %5955 = sst [smem:[#allocation32_spill]] %s5954_s16  ;;  %p4145_p9 = scmp.lt.s32.totalorder %s4783_s30, 2 }
  0x2c   : > { %s5957_s5 = scalar_select %p4967_p7, 1, 0 }
  0x2d   : > { %s486_s7 = sand.u32 1, %s4771_s27   ;;  %s4977_s25 = sshll.u32 %s4779_s29, 5 }
  0x2e   : > { %5958 = sst [smem:[#allocation34_spill]] %s5957_s5  ;;  %s4974_s22 = sshll.u32 %s486_s7, 5 }
  0x2f   : > { %s5959_s2 = sld [smem:[#allocation43_spill]]  ;;  %s488_s15 = scalar_lea.vmem [#allocation7], %s4974_s22 }
  0x30   : > { %s498_s19 = sshll.u32 %s488_s15, 4  ;;  %p4986_p8 = pnand %p4145_p9, %p4945_p10  ;;  %s499_s19 = int_to_ptr.vmem [resolvable:$true] %s498_s19 }
  0x31   : > { %s5961_s7 = sand.u32 1, %s4783_s30   ;;  %s5962_s27 = smov 8  }
  0x32   : > { %s4992_s29 = scalar_lea.sflag [#allocation8], %s5961_s7  ;;  %s5963_s13 = smov 128  }
  0x33   : > { %s5964_s0 = sld [smem:[#allocation42_spill]]  ;;  %s4789_s17 = smov [#allocation2]  }
  0x34   : > { %s405_s7 = sshll.u32 %s5910_s1, 4  ;;  %s448_s15 = sshll.u32 %s5918_s9, 4  ;;  %s406_s7 = int_to_ptr.hbm [resolvable:$true] %s405_s7  ;;  %s449_s15 = int_to_ptr.hbm [resolvable:$true] %s448_s15 }
  0x35   : > { %s495_s21 = scalar_lea.hbm %s5959_s2, %s4977_s25  ;;  %s392_s2 = sshll.u32 %s4789_s17, 4  ;;  %s393_s2 = int_to_ptr.vmem [resolvable:$true] %s392_s2 }
  0x36   : > { %s496_s16 = sshll.u32 %s495_s21, 4  ;;  %s4791_s17 = smov [#allocation15]   ;;  %s497_s16 = int_to_ptr.hbm [resolvable:$true] %s496_s16 }
  0x37   : > { %4128 = dma.hbm_to_vmem [thread:$0]  (!%p4986_p8), %s497_s16, 512, %s499_s19, %s4992_s29, %s5963_s13, %s5963_s13, %s5962_s27  }
  0x38   : > { %s4790_s19 = smov [#allocation6]   ;;  %s450_s5 = sshll.u32 %s4791_s17, 4  ;;  %s451_s5 = int_to_ptr.vmem [resolvable:$true] %s450_s5 }
  0x39   : > { %s390_s21 = sshll.u32 %s5964_s0, 4  ;;  %s517_s28 = scalar_lea.hbm %s5912_s3, %s4977_s25  ;;  %s391_s21 = int_to_ptr.hbm [resolvable:$true] %s390_s21 }
  0x3a   : > { %4109 = dma.hbm_to_vmem [thread:$0]  (!%p4923_p6), %s391_s21, 512, %s393_s2, [#allocation3], %s5963_s13, %s5963_s13, %s5962_s27  }
  0x3b   : > { %4112 = dma.hbm_to_smem (!%p4923_p6), %s406_s7, 16, %s4790_s19, [#allocation5]  }
  0x3c   : > { %s465_s2 = sshll.u32 %s5920_s11, 4  ;;  %s4792_s21 = smov [#allocation16]   ;;  %s466_s2 = int_to_ptr.hbm [resolvable:$true] %s465_s2 }
  0x3d   : > { %4121 = dma.hbm_to_vmem [thread:$0]  (!%p4923_p6), %s449_s15, 512, %s451_s5, [#allocation14], %s5963_s13, %s5963_s13, %s5962_s27  }
  0x3e   : > { %s467_s7 = sshll.u32 %s4792_s21, 4  ;;  %s518_s0 = sshll.u32 %s517_s28, 4  ;;  %s468_s7 = int_to_ptr.vmem [resolvable:$true] %s467_s7  ;;  %s519_s0 = int_to_ptr.hbm [resolvable:$true] %s518_s0 }
  0x3f   : > { %4124 = dma.hbm_to_vmem [thread:$0]  (!%p4923_p6), %s466_s2, 512, %s468_s7, [#allocation17], %s5963_s13, %s5963_s13, %s5962_s27  }
  0x40   : > { %s512_s17 = scalar_lea.vmem [#allocation9], %s4974_s22  ;;  %s539_s21 = scalar_lea.hbm %s5913_s4, %s4977_s25 }
  0x41   : > { %s520_s12 = sshll.u32 %s512_s17, 4  ;;  %s540_s19 = sshll.u32 %s539_s21, 4  ;;  %s521_s12 = int_to_ptr.vmem [resolvable:$true] %s520_s12  ;;  %s541_s19 = int_to_ptr.hbm [resolvable:$true] %s540_s19 }
  0x42   : > { %4131 = dma.hbm_to_vmem [thread:$0]  (!%p4986_p8), %s519_s0, 512, %s521_s12, %s4992_s29, %s5963_s13, %s5963_s13, %s5962_s27  }
  0x43   : > { %s534_s24 = scalar_lea.vmem [#allocation10], %s4974_s22  ;;  %s5965_s2 = sand.u32 1, %s4783_s30  }
  0x44   : > { %s542_s16 = sshll.u32 %s534_s24, 4  ;;  %s531_s7 = scalar_lea.sflag [#allocation11], %s5965_s2  ;;  %s543_s16 = int_to_ptr.vmem [resolvable:$true] %s542_s16 }
  0x45   : > { %4134 = dma.hbm_to_vmem [thread:$0]  (!%p4986_p8), %s541_s19, 512, %s543_s16, %s531_s7, %s5963_s13, %s5963_s13, %s5962_s27  }
  0x46   : > { %554 = sbr.rel (%p4911_p3) target bundleno = 4384 (0x1120), region = 72 }
  0x4b   : > { %4730 = dma.done.wait (%p118_p1), [#allocation3], 512  }
  0x4c   : > { %4732 = vsyncadd (%p118_p1), [#allocation3], 4294966784 }
  0x4d   : > { %4734 = dma.done.wait (%p118_p1), [#allocation5], 16  }
  0x4e   : > { %4736 = vsyncadd (%p118_p1), [#allocation5], 4294967280  ;;  %s566_s25 = sand.u32 1, %s4903_s14   ;;  %s568_s27 = sand.u32 1, %s4767_s26  }
  0x4f   : > { %s5066_s29 = sshll.u32 %s568_s27, 5  ;;  %s567_s18 = scalar_lea.sflag [#allocation8], %s566_s25 }
  0x50   : > { %s5069_s22 = scalar_lea.vmem [#allocation7], %s5066_s29 }
  0x51   : > { %4738 = dma.done.wait (%p4956_p0), %s567_s18, 1024  }
  0x52   : > { %4740 = vsyncadd (%p4956_p0), %s567_s18, 4294966272  ;;  %s5076_s20 = scalar_lea.vmem [#allocation9], %s5066_s29  ;;  %s587_s13 = scalar_lea.sflag [#allocation11], %s566_s25 }
  0x53   : > { %s5079_s28 = scalar_lea.vmem [#allocation10], %s5066_s29 }
  0x54   : > { %4742 = dma.done.wait (%p4956_p0), %s587_s13, 512  }
  0x55   : > { %4744 = vsyncadd (%p4956_p0), %s587_s13, 4294966784 }
  0x56   : > { %4746 = dma.done.wait (%p118_p1), [#allocation11], 512  }
  0x57   : > { %4748 = vsyncadd (%p118_p1), [#allocation11], 4294966784 }
  0x58   : > { %4750 = dma.done.wait (%p118_p1), [#allocation14], 1024  }
  0x59   : > { %4752 = vsyncadd (%p118_p1), [#allocation14], 4294966272 }
  0x5a   : > { %4754 = dma.done.wait (%p118_p1), [#allocation17], 512  }
  0x5b   : > { %4756 = vsyncadd (%p118_p1), [#allocation17], 4294966784 }
  0x5c   : > { %616 = sfence }
  0x5d   : > { %v675_v0 = vld [vmem:[#allocation12 + $0x10] sm:$0xff]  ;;  %v676_v1 = vld [vmem:[#allocation12 + $0x18] sm:$0xff]  ;;  %v673_v2 = vld [vmem:[#allocation12] sm:$0xff]  ;;  %vm717_vm0 = vcmask 261120   ;;  %vm1184_vm1 = vcmask 64512   ;;  %s1514_s5 = sld [smem:[#allocation6]] }
  0x5e   : > { %v693_v3 = vpack.c.bf16 %v675_v0, %v675_v0  ;;  %v694_v4 = vpack.c.bf16 %v676_v1, %v676_v1  ;;  %v674_v5 = vld [vmem:[#allocation12 + $0x8] sm:$0xff]  ;;  %v691_v6 = vpack.c.bf16 %v673_v2, %v673_v2  ;;  %v669_v7 = vld [vmem:[%s5069_s22] sm:$0xff]  ;;  %v819_v20 = vld [vmem:[#allocation13 + $0x10] sm:$0xff]  ;;  %s4795_s21 = smov 120   ;;  %s4002_s19 = sld [smem:[#allocation6 + $0x1]] }
  0x5f   : > { %v670_v8 = vld [vmem:[%s5069_s22 + $0x8] sm:$0xff]  ;;  %v692_v9 = vpack.c.bf16 %v674_v5, %v674_v5  ;;  %v677_v10 = vpack.c.bf16 %v669_v7, %v669_v7  ;;  %v820_v21 = vld [vmem:[#allocation13 + $0x18] sm:$0xff]  ;;  %v817_v30 = vld [vmem:[#allocation13] sm:$0xff]  ;;  %v837_v37 = vpack.c.bf16 %v819_v20, %v819_v20  ;;  %s4796_s24 = smov 112   ;;  %s4027_s16 = sld [smem:[#allocation6 + $0x2]] }
  0x60   : > { %v678_v11 = vpack.c.bf16 %v670_v8, %v670_v8  ;;  %v711_v12 = vunpack.c.l.b16 %v693_v3  ;;  %v712_v13 = vunpack.c.l.b16 %v694_v4  ;;  %v697_v14 = vunpack.c.l.bf16 %v693_v3  ;;  %v818_v31 = vld [vmem:[#allocation13 + $0x8] sm:$0xff]  ;;  %v813_v42 = vld [vmem:[%s5076_s20] sm:$0xff]  ;;  %v671_v47 = vld [vmem:[%s5069_s22 + $0x10] sm:$0xff]  ;;  %s4797_s2 = smov 104   ;;  %s4052_s7 = sld [smem:[#allocation6 + $0x3]] }
  0x61   : > { %v698_v15 = vunpack.c.l.bf16 %v694_v4  ;;  %v709_v16 = vunpack.c.l.b16 %v691_v6  ;;  %v710_v17 = vunpack.c.l.b16 %v692_v9  ;;  %v695_v18 = vunpack.c.l.bf16 %v691_v6  ;;  %v814_v48 = vld [vmem:[%s5076_s20 + $0x8] sm:$0xff]  ;;  %v672_v51 = vld [vmem:[%s5069_s22 + $0x18] sm:$0xff]  ;;  %s4798_s25 = smov 8   ;;  %s4799_s18 = smov 16  }
  0x62   : > { %v696_v19 = vunpack.c.l.bf16 %v692_v9  ;;  %v714_v22 = vpack.c.b16 %v712_v13, %v711_v12  ;;  %v701_v23 = vsub.f32 %v675_v0, %v697_v14  ;;  %v681_v25 = vunpack.c.l.bf16 %v677_v10  ;;  %s4800_s22 = smov 24   ;;  %s5986_s14 = sld [smem:[#allocation29_spill]] }
  0x63   : > { %v702_v24 = vsub.f32 %v676_v1, %v698_v15  ;;  %v713_v26 = vpack.c.b16 %v710_v17, %v709_v16  ;;  %v699_v27 = vsub.f32 %v673_v2, %v695_v18  ;;  %v682_v29 = vunpack.c.l.bf16 %v678_v11  ;;  %s664_s23 = scalar_lea.vmem [#allocation18], %s5066_s29  ;;  %s5987_s12 = sld [smem:[#allocation47_spill]] }
  0x64   : > { %v700_v28 = vsub.f32 %v674_v5, %v696_v19  ;;  %730 = vmatpush.bf16.msra.mxu0 %v714_v22  ;;  %765 = vmatpush.bf16.msra.mxu1 %v714_v22  ;;  %v685_v33 = vsub.f32 %v669_v7, %v681_v25  ;;  %v747_v34 = vunpack.c.l.b16 %v677_v10  ;;  %v748_v35 = vunpack.c.l.b16 %v678_v11  ;;  %v815_v10 = vld [vmem:[%s5076_s20 + $0x10] sm:$0xff]  ;;  %v816_v11 = vld [vmem:[%s5076_s20 + $0x18] sm:$0xff] }
  0x65   : > { %v704_v32 = vpack.c.bf16 %v702_v24, %v701_v23  ;;  %v686_v36 = vsub.f32 %v670_v8, %v682_v29  ;;  %v838_v38 = vpack.c.bf16 %v820_v21, %v820_v21  ;;  %v835_v40 = vpack.c.bf16 %v817_v30, %v817_v30 }
  0x66   : > { %v703_v39 = vpack.c.bf16 %v700_v28, %v699_v27  ;;  %v836_v41 = vpack.c.bf16 %v818_v31, %v818_v31  ;;  %v751_v44 = vpack.c.b16 %v748_v35, %v747_v34  ;;  %v855_v45 = vunpack.c.l.b16 %v837_v37 }
  0x67   : > { %784 = vmatpush.bf16.msra.mxu2 %v704_v32  ;;  %v689_v43 = vpack.c.bf16 %v686_v36, %v685_v33  ;;  %v856_v46 = vunpack.c.l.b16 %v838_v38  ;;  %v853_v49 = vunpack.c.l.b16 %v835_v40  ;;  %v821_v53 = vpack.c.bf16 %v813_v42, %v813_v42  ;;  %v958_v32 = vld [vmem:[#allocation15 + $0x10] sm:$0xff]  ;;  %v959_v33 = vld [vmem:[#allocation15 + $0x18] sm:$0xff] }
  0x68   : > { %731 = vmatpush.bf16.msra.mxu0 %v713_v26  ;;  %766 = vmatpush.bf16.msra.mxu1 %v713_v26  ;;  %v854_v50 = vunpack.c.l.b16 %v836_v41  ;;  %v679_v54 = vpack.c.bf16 %v671_v47, %v671_v47  ;;  %v822_v55 = vpack.c.bf16 %v814_v48, %v814_v48  ;;  %v841_v56 = vunpack.c.l.bf16 %v837_v37  ;;  %s4073_s0 = sshll.u32 %s5986_s14, 5 }
  0x69   : > { %v858_v52 = vpack.c.b16 %v856_v46, %v855_v45  ;;  %v680_v58 = vpack.c.bf16 %v672_v51, %v672_v51  ;;  %v825_v59 = vunpack.c.l.bf16 %v821_v53  ;;  %v842_v60 = vunpack.c.l.bf16 %v838_v38  ;;  %v956_v38 = vld [vmem:[#allocation15] sm:$0xff]  ;;  %s3714_s15 = scalar_lea.hbm %s5987_s12, %s4073_s0 }
  0x6a   : > { %v857_v57 = vpack.c.b16 %v854_v50, %v853_v49  ;;  %v826_v61 = vunpack.c.l.bf16 %v822_v55  ;;  %v845_v62 = vsub.f32 %v819_v20, %v841_v56  ;;  %v839_v63 = vunpack.c.l.bf16 %v835_v40 }
  0x6b   : > { %785 = vmatpush.bf16.msra.mxu2 %v703_v39  ;;  %3942 = vmatmul.msk.bf16.vlgmr.msra.gmra.mxu0 %vm717_vm0, %v689_v43  ;;  %v840_v0 = vunpack.c.l.bf16 %v836_v41  ;;  %v829_v1 = vsub.f32 %v813_v42, %v825_v59  ;;  %v846_v2 = vsub.f32 %v820_v21, %v842_v60  ;;  %v683_v6 = vunpack.c.l.bf16 %v679_v54  ;;  %v957_v39 = vld [vmem:[#allocation15 + $0x8] sm:$0xff]  ;;  %v952_v43 = vld [vmem:[%s5079_s28] sm:$0xff] }
  0x6c   : > { %3944 = vmatmul.msk.bf16.vlgmr.msra.gmra.mxu1 %vm717_vm0, %v751_v44  ;;  %873 = vmatpush.bf16.msra.mxu3 %v858_v52  ;;  %v830_v3 = vsub.f32 %v814_v48, %v826_v61  ;;  %v843_v4 = vsub.f32 %v817_v30, %v839_v63  ;;  %v684_v7 = vunpack.c.l.bf16 %v680_v58  ;;  %v749_v13 = vunpack.c.l.b16 %v679_v54 }
  0x6d   : > { %908 = vmatpush.bf16.msrb.mxu0 %v858_v52  ;;  %v844_v5 = vsub.f32 %v818_v31, %v840_v0  ;;  %v848_v8 = vpack.c.bf16 %v846_v2, %v845_v62  ;;  %v750_v14 = vunpack.c.l.b16 %v680_v58  ;;  %v687_v15 = vsub.f32 %v671_v47, %v683_v6 }
  0x6e   : > { %3946 = vmatmul.msk.bf16.vlgmr.msra.gmra.mxu2 %vm717_vm0, %v751_v44  ;;  %v833_v9 = vpack.c.bf16 %v830_v3, %v829_v1  ;;  %v688_v16 = vsub.f32 %v672_v51, %v684_v7  ;;  %v823_v17 = vpack.c.bf16 %v815_v10, %v815_v10  ;;  %v824_v18 = vpack.c.bf16 %v816_v11, %v816_v11  ;;  %v953_v44 = vld [vmem:[%s5079_s28 + $0x8] sm:$0xff] }
  0x6f   : > { %927 = vmatpush.bf16.msrb.mxu1 %v848_v8  ;;  %v847_v12 = vpack.c.bf16 %v844_v5, %v843_v4  ;;  %v752_v20 = vpack.c.b16 %v750_v14, %v749_v13  ;;  %v890_v26 = vunpack.c.l.b16 %v821_v53  ;;  %v891_v27 = vunpack.c.l.b16 %v822_v55  ;;  %v954_v4 = vld [vmem:[%s5079_s28 + $0x10] sm:$0xff]  ;;  %v955_v5 = vld [vmem:[%s5079_s28 + $0x18] sm:$0xff]  ;;  %s5985_s28 = sld [smem:[#allocation46_spill]] }
  0x70   : > { %874 = vmatpush.bf16.msra.mxu3 %v857_v57  ;;  %v690_v19 = vpack.c.bf16 %v688_v16, %v687_v15  ;;  %v827_v21 = vunpack.c.l.bf16 %v823_v17  ;;  %v828_v22 = vunpack.c.l.bf16 %v824_v18  ;;  %v892_v29 = vunpack.c.l.b16 %v823_v17 }
  0x71   : > { %909 = vmatpush.bf16.msrb.mxu0 %v857_v57  ;;  %v894_v28 = vpack.c.b16 %v891_v27, %v890_v26  ;;  %v893_v30 = vunpack.c.l.b16 %v824_v18  ;;  %v976_v34 = vpack.c.bf16 %v958_v32, %v958_v32  ;;  %v977_v35 = vpack.c.bf16 %v959_v33, %v959_v33 }
  0x72   : > { %v831_v23 = vsub.f32 %v815_v10, %v827_v21  ;;  %v832_v24 = vsub.f32 %v816_v11, %v828_v22  ;;  %v974_v41 = vpack.c.bf16 %v956_v38, %v956_v38  ;;  %v975_v42 = vpack.c.bf16 %v957_v39, %v957_v39 }
  0x73   : > { %3948 = vmatmul.msk.bf16.vlgmr.msra.gmra.mxu3 %vm717_vm0, %v833_v9  ;;  %928 = vmatpush.bf16.msrb.mxu1 %v847_v12  ;;  %v895_v31 = vpack.c.b16 %v893_v30, %v892_v29  ;;  %v994_v36 = vunpack.c.l.b16 %v976_v34  ;;  %v995_v37 = vunpack.c.l.b16 %v977_v35  ;;  %v960_v45 = vpack.c.bf16 %v952_v43, %v952_v43 }
  0x74   : > { %v834_v25 = vpack.c.bf16 %v832_v24, %v831_v23  ;;  %v961_v46 = vpack.c.bf16 %v953_v44, %v953_v44  ;;  %v992_v47 = vunpack.c.l.b16 %v974_v41  ;;  %v993_v48 = vunpack.c.l.b16 %v975_v42 }
  0x75   : > { %v997_v40 = vpack.c.b16 %v995_v37, %v994_v36  ;;  %v964_v49 = vunpack.c.l.bf16 %v960_v45  ;;  %v980_v51 = vunpack.c.l.bf16 %v976_v34  ;;  %v981_v52 = vunpack.c.l.bf16 %v977_v35 }
  0x76   : > { %v965_v50 = vunpack.c.l.bf16 %v961_v46  ;;  %v996_v53 = vpack.c.b16 %v993_v48, %v992_v47  ;;  %v1029_v56 = vunpack.c.l.b16 %v960_v45  ;;  %v1030_v57 = vunpack.c.l.b16 %v961_v46 }
  0x77   : > { %1012 = vmatpush.bf16.msrb.mxu2 %v997_v40  ;;  %1047 = vmatpush.bf16.msrb.mxu3 %v997_v40  ;;  %v968_v54 = vsub.f32 %v952_v43, %v964_v49  ;;  %v984_v58 = vsub.f32 %v958_v32, %v980_v51  ;;  %v985_v59 = vsub.f32 %v959_v33, %v981_v52  ;;  %v978_v62 = vunpack.c.l.bf16 %v974_v41  ;;  %v4219_v41 = vld [vmem:[%s5917_s8] ss:$0 sm:$0xff] }
  0x78   : > { %v969_v55 = vsub.f32 %v953_v44, %v965_v50  ;;  %v1033_v61 = vpack.c.b16 %v1030_v57, %v1029_v56  ;;  %v979_v63 = vunpack.c.l.bf16 %v975_v42  ;;  %v962_v6 = vpack.c.bf16 %v954_v4, %v954_v4 }
  0x79   : > { %v987_v0 = vpack.c.bf16 %v985_v59, %v984_v58  ;;  %v982_v1 = vsub.f32 %v956_v38, %v978_v62  ;;  %v963_v7 = vpack.c.bf16 %v955_v5, %v955_v5 }
  0x7a   : > { %v972_v60 = vpack.c.bf16 %v969_v55, %v968_v54  ;;  %v983_v2 = vsub.f32 %v957_v39, %v979_v63  ;;  %v966_v10 = vunpack.c.l.bf16 %v962_v6  ;;  %v1031_v15 = vunpack.c.l.b16 %v962_v6  ;;  %v4218_v55 = vld [vmem:[%s5915_s6] ss:$0 sm:$0xff] }
  0x7b   : > { %3943 = vmatmul.msk.bf16.gmra.mxu0 %vm717_vm0, %v690_v19  ;;  %1013 = vmatpush.bf16.msrb.mxu2 %v996_v53  ;;  %v967_v11 = vunpack.c.l.bf16 %v963_v7  ;;  %v1032_v16 = vunpack.c.l.b16 %v963_v7 }
  0x7c   : > { %3945 = vmatmul.msk.bf16.gmra.mxu1 %vm717_vm0, %v752_v20  ;;  %1048 = vmatpush.bf16.msrb.mxu3 %v996_v53  ;;  %v986_v3 = vpack.c.bf16 %v983_v2, %v982_v1  ;;  %v970_v13 = vsub.f32 %v954_v4, %v966_v10 }
  0x7d   : > { %1066 = vmatpush.bf16.msra.mxu0 %v987_v0  ;;  %v971_v14 = vsub.f32 %v955_v5, %v967_v11  ;;  %v1034_v18 = vpack.c.b16 %v1032_v16, %v1031_v15 }
  0x7e   : > { %3947 = vmatmul.msk.bf16.gmra.mxu2 %vm717_vm0, %v752_v20 }
  0x7f   : > { %v973_v17 = vpack.c.bf16 %v971_v14, %v970_v13 }
  0x81   : > { %1067 = vmatpush.bf16.msra.mxu0 %v986_v3 }
  0x83   : > { %3949 = vmatmul.msk.bf16.gmra.mxu3 %vm717_vm0, %v834_v25 }
  0x8b   : > { %3950 = vmatmul.msk.bf16.vlgmr.msrb.gmra.mxu0 %vm717_vm0, %v894_v28 }
  0x8c   : > { %3952 = vmatmul.msk.bf16.vlgmr.msrb.gmra.mxu1 %vm717_vm0, %v894_v28 }
  0x8e   : > { %3954 = vmatmul.msk.bf16.vlgmr.msrb.gmra.mxu2 %vm717_vm0, %v972_v60 }
  0x93   : > { %3956 = vmatmul.msk.bf16.vlgmr.msrb.gmra.mxu3 %vm717_vm0, %v1033_v61 }
  0x9b   : > { %3951 = vmatmul.msk.bf16.gmra.mxu0 %vm717_vm0, %v895_v31 }
  0x9c   : > { %3953 = vmatmul.msk.bf16.gmra.mxu1 %vm717_vm0, %v895_v31 }
  0x9e   : > { %3955 = vmatmul.msk.bf16.gmra.mxu2 %vm717_vm0, %v973_v17 }
  0xa3   : > { %3957 = vmatmul.msk.bf16.gmra.mxu3 %vm717_vm0, %v1034_v18 }
  0xab   : > { %3958 = vmatmul.msk.bf16.vlgmr.msra.gmra.mxu0 %vm717_vm0, %v1033_v61 }
  0xbb   : > { %3959 = vmatmul.msk.bf16.gmra.mxu0 %vm717_vm0, %v1034_v18 }
  0xe8   : > { %v733_v8 = vpop.f32.mrf.mxu0 }
  0xe9   : > { %v768_v9 = vpop.f32.mrf.mxu1 }
  0xea   : > { %v769_v12 = vadd.f32 %v768_v9, %v733_v8 }
  0xf0   : > { %v735_v19 = vpop.f32.mrf.mxu0 }
  0xf1   : > { %v770_v20 = vpop.f32.mrf.mxu1  ;;  %v787_v32 = vpop.f32.mrf.mxu2 }
  0xf2   : > { %v771_v44 = vadd.f32 %v770_v20, %v735_v19  ;;  %v797_v54 = vadd.f32 %v787_v32, %v769_v12 }
  0xf4   : > { %v805_v63 = vadd.f32 %v4218_v55, %v797_v54 }
  0xf6   : > { %v876_v26 = vpop.f32.mrf.mxu3  ;;  %v809_v9 = vmul.f32 0.35355338, %v805_v63  ;;  %v5935_v63 = vmov 1.0|1.0  }
  0xf8   : > { %v738_v21 = vpop.f32.mrf.mxu0  ;;  %v1146_v19 = vpack.c.bf16 %v809_v9, %v809_v9 }
  0xf9   : > { %v773_v22 = vpop.f32.mrf.mxu1  ;;  %v789_v39 = vpop.f32.mrf.mxu2 }
  0xfa   : > { %v5127_v23 = vadd.f32 %v773_v22, %v738_v21  ;;  %v798_v49 = vadd.f32 %v789_v39, %v771_v44 }
  0xfc   : > { %v806_v58 = vadd.f32 %v4218_v55, %v798_v49 }
  0xfe   : > { %v878_v29 = vpop.f32.mrf.mxu3  ;;  %v810_v4 = vmul.f32 0.35355338, %v806_v58 }
 0x100   : > { %v5129_v24 = vpop.f32.mrf.mxu0  ;;  %v1147_v14 = vpack.c.bf16 %v810_v4, %v810_v4 }
 0x101   : > { %v5131_v25 = vpop.f32.mrf.mxu1  ;;  %v792_v59 = vpop.f32.mrf.mxu2 }
 0x102   : > { %v776_v20 = vadd.f32 %v5131_v25, %v5129_v24 }
 0x106   : > { %v881_v33 = vpop.f32.mrf.mxu3 }
 0x108   : > { %v911_v27 = vpop.f32.mrf.mxu0 }
 0x109   : > { %v930_v28 = vpop.f32.mrf.mxu1  ;;  %v912_v40 = vadd.f32 %v911_v27, %v876_v26  ;;  %v794_v18 = vpop.f32.mrf.mxu2  ;;  %v1151_v26 = vunpack.c.l.bf16 %v1147_v14 }
 0x10a   : > { %v800_v27 = vadd.f32 %v794_v18, %v776_v20 }
 0x10b   : > { %v940_v47 = vadd.f32 %v930_v28, %v912_v40  ;;  %v1155_v32 = vsub.f32 %v810_v4, %v1151_v26 }
 0x10d   : > { %v948_v56 = vadd.f32 %v4219_v41, %v940_v47 }
 0x10e   : > { %v883_v45 = vpop.f32.mrf.mxu3 }
 0x10f   : > { %v1160_v0 = vpack.c.bf16 %v948_v56, %v948_v56 }
 0x110   : > { %v913_v30 = vpop.f32.mrf.mxu0 }
 0x111   : > { %v932_v31 = vpop.f32.mrf.mxu1  ;;  %v914_v37 = vadd.f32 %v913_v30, %v878_v29  ;;  %v1164_v10 = vunpack.c.l.bf16 %v1160_v0  ;;  %v1178_v15 = vunpack.c.l.b16 %v1160_v0  ;;  %v1150_v29 = vunpack.c.l.bf16 %v1146_v19 }
 0x112   : > { %v799_v30 = vadd.f32 %v792_v59, %v5127_v23 }
 0x113   : > { %v941_v42 = vadd.f32 %v932_v31, %v914_v37  ;;  %v1168_v21 = vsub.f32 %v948_v56, %v1164_v10  ;;  %v1154_v25 = vsub.f32 %v809_v9, %v1150_v29 }
 0x115   : > { %v949_v51 = vadd.f32 %v4219_v41, %v941_v42  ;;  %v5158_v37 = vpack.c.bf16 %v1155_v32, %v1154_v25 }
 0x117   : > { %v1161_v60 = vpack.c.bf16 %v949_v51, %v949_v51 }
 0x118   : > { %v916_v34 = vpop.f32.mrf.mxu0 }
 0x119   : > { %v935_v35 = vpop.f32.mrf.mxu1  ;;  %v917_v36 = vadd.f32 %v916_v34, %v881_v33  ;;  %v1165_v5 = vunpack.c.l.bf16 %v1161_v60  ;;  %v1179_v11 = vunpack.c.l.b16 %v1161_v60  ;;  %v1221_v33 = vunpack.c.l.b16 %v1147_v14 }
 0x11a   : > { %v808_v34 = vadd.f32 %v4218_v55, %v800_v27 }
 0x11b   : > { %v942_v38 = vadd.f32 %v935_v35, %v917_v36  ;;  %v1169_v16 = vsub.f32 %v949_v51, %v1165_v5  ;;  %v5149_v22 = vpack.c.b16 %v1179_v11, %v1178_v15  ;;  %v1220_v35 = vunpack.c.l.b16 %v1146_v19  ;;  %v1050_v51 = vpop.f32.mrf.mxu3  ;;  %v4220_v5 = vld [vmem:[%s5919_s10] ss:$0 sm:$0xff] }
 0x11c   : > { %v807_v36 = vadd.f32 %v4218_v55, %v799_v30  ;;  %v812_v23 = vmul.f32 0.35355338, %v808_v34 }
 0x11d   : > { %v950_v43 = vadd.f32 %v4219_v41, %v942_v38  ;;  %v5151_v28 = vpack.c.bf16 %v1169_v16, %v1168_v21  ;;  %v1192_v31 = vsel %vm1184_vm1, %v5149_v22, 0  ;;  %v5160_v38 = vpack.c.b16 %v1221_v33, %v1220_v35 }
 0x11e   : > { %v811_v39 = vmul.f32 0.35355338, %v807_v36  ;;  %v1149_v40 = vpack.c.bf16 %v812_v23, %v812_v23 }
 0x11f   : > { %v1162_v52 = vpack.c.bf16 %v950_v43, %v950_v43  ;;  %v1252_v24 = vsel %vm1184_vm1, %v5151_v28, 0 }
 0x120   : > { %v918_v46 = vpop.f32.mrf.mxu0  ;;  %v1153_v42 = vunpack.c.l.bf16 %v1149_v40 }
 0x121   : > { %v919_v48 = vadd.f32 %v918_v46, %v883_v45  ;;  %v937_v50 = vpop.f32.mrf.mxu1  ;;  %v1166_v61 = vunpack.c.l.bf16 %v1162_v52  ;;  %v1180_v1 = vunpack.c.l.b16 %v1162_v52  ;;  %v1223_v45 = vunpack.c.l.b16 %v1149_v40 }
 0x122   : > { %v1157_v44 = vsub.f32 %v812_v23, %v1153_v42 }
 0x123   : > { %v943_v53 = vadd.f32 %v937_v50, %v919_v48  ;;  %v1170_v6 = vsub.f32 %v950_v43, %v1166_v61  ;;  %v1015_v50 = vpop.f32.mrf.mxu2  ;;  %v1052_v60 = vpop.f32.mrf.mxu3 }
 0x125   : > { %v951_v57 = vadd.f32 %v4219_v41, %v943_v53  ;;  %v1148_v41 = vpack.c.bf16 %v811_v39, %v811_v39  ;;  %v1103_v53 = vlaneseq }
 0x127   : > { %v1163_v62 = vpack.c.bf16 %v951_v57, %v951_v57  ;;  %v1152_v43 = vunpack.c.l.bf16 %v1148_v41  ;;  %v1222_v47 = vunpack.c.l.b16 %v1148_v41  ;;  %v5178_v54 = vshrl.u32 %v1103_v53, 7 }
 0x128   : > { %v1069_v52 = vpop.f32.mrf.mxu0  ;;  %v5180_v55 = vand.u32 127, %v1103_v53  ;;  %v4794_v53 = vmov -1e+32  }
 0x129   : > { %v1167_v2 = vunpack.c.l.bf16 %v1163_v62  ;;  %v1181_v3 = vunpack.c.l.b16 %v1163_v62  ;;  %v1156_v46 = vsub.f32 %v811_v39, %v1152_v43  ;;  %v5168_v48 = vpack.c.b16 %v1223_v45, %v1222_v47  ;;  %v5236_v47 = vld [vmem:[#allocation2] sm:$0xff] }
 0x12a   : > { %v5183_v56 = vadd.s32 16, %v5178_v54  ;;  %v5189_v58 = vadd.s32 8, %v5178_v54  ;;  %vm1136_vm4 = vcmp.gt.s32.totalorder %v5178_v54, %v5180_v55  ;;  %vm1095_vm8 = vcmp.gt.f32.partialorder %v5236_v47, 0.0 }
 0x12b   : > { %v1171_v7 = vsub.f32 %v951_v57, %v1167_v2  ;;  %v5139_v8 = vpack.c.b16 %v1181_v3, %v1180_v1  ;;  %v5170_v49 = vpack.c.bf16 %v1157_v44, %v1156_v46  ;;  %v5186_v57 = vadd.s32 24, %v5178_v54  ;;  %v1017_v59 = vpop.f32.mrf.mxu2  ;;  %v1055_v4 = vpop.f32.mrf.mxu3 }
 0x12c   : > { %vm1138_vm2 = vcmp.gt.s32.totalorder %v5183_v56, %v5180_v55  ;;  %vm1137_vm5 = vcmp.gt.s32.totalorder %v5189_v58, %v5180_v55  ;;  %v1051_v1 = vadd.f32 %v1050_v51, %v1015_v50  ;;  %v1053_v2 = vadd.f32 %v1052_v60, %v1017_v59 }
 0x12d   : > { %v5141_v12 = vpack.c.bf16 %v1171_v7, %v1170_v6  ;;  %v1195_v13 = vsel %vm1184_vm1, %v5139_v8, 0  ;;  %vm1139_vm3 = vcmp.gt.s32.totalorder %v5186_v57, %v5180_v55  ;;  %vm5209_vm7 = vmpackc.low %vm1137_vm5, %vm1136_vm4  ;;  %v5239_v59 = vsel %vm1095_vm8, 0.0, %v4794_v53 }
 0x12e   : > { %1203 = vmatpush.bf16.xpose.msra.mxu1 %v1195_v13  ;;  %1238 = vmatpush.bf16.xpose.msra.mxu2 %v1195_v13  ;;  %vm5199_vm6 = vmpackc.low %vm1139_vm3, %vm1138_vm2  ;;  %v1079_v9 = vadd.f32 %v1069_v52, %v1051_v1  ;;  %v5243_v1 = vld [vmem:[#allocation2 + $0x8] sm:$0xff] }
 0x12f   : > { %v1255_v17 = vsel %vm1184_vm1, %v5141_v12, 0  ;;  %3967 = vmatpush.bf16.msk.msrb.mxu0 %vm5199_vm6, %v5935_v63  ;;  %vm1096_vm9 = vcmp.gt.f32.partialorder %v5243_v1, 0.0 }
 0x130   : > { %1263 = vmatpush.bf16.xpose.msra.mxu3 %v1255_v17  ;;  %v1071_v61 = vpop.f32.mrf.mxu0  ;;  %v1087_v14 = vadd.f32 %v4220_v5, %v1079_v9 }
 0x131   : > { %v1080_v10 = vadd.f32 %v1071_v61, %v1053_v2 }
 0x132   : > { %v1662_v21 = vpack.c.bf16 %v1087_v14, %v1087_v14 }
 0x133   : > { %v1020_v3 = vpop.f32.mrf.mxu2  ;;  %3969 = vmatpush.bf16.msk.msrb.mxu0 %vm5209_vm7, %v5935_v63  ;;  %v1088_v15 = vadd.f32 %v4220_v5, %v1080_v10  ;;  %v1057_v17 = vpop.f32.mrf.mxu3  ;;  %v5253_v10 = vld [vmem:[#allocation2 + $0x10] sm:$0xff] }
 0x134   : > { %v1056_v6 = vadd.f32 %v1055_v4, %v1020_v3  ;;  %vm1097_vm10 = vcmp.gt.f32.partialorder %v5253_v10, 0.0 }
 0x135   : > { %v1663_v26 = vpack.c.bf16 %v1088_v15, %v1088_v15 }
 0x136   : > { %1204 = vmatpush.bf16.xpose.msra.mxu1 %v1192_v31  ;;  %1239 = vmatpush.bf16.xpose.msra.mxu2 %v1192_v31  ;;  %v1666_v31 = vunpack.c.l.bf16 %v1662_v21 }
 0x137   : > { %v1667_v32 = vunpack.c.l.bf16 %v1663_v26  ;;  %v1681_v25 = vunpack.c.l.b16 %v1663_v26 }
 0x138   : > { %1264 = vmatpush.bf16.xpose.msra.mxu3 %v1252_v24  ;;  %v1074_v7 = vpop.f32.mrf.mxu0  ;;  %v1680_v24 = vunpack.c.l.b16 %v1662_v21  ;;  %v1670_v39 = vsub.f32 %v1087_v14, %v1666_v31 }
 0x139   : > { %v1081_v11 = vadd.f32 %v1074_v7, %v1056_v6  ;;  %v1671_v40 = vsub.f32 %v1088_v15, %v1667_v32  ;;  %v5249_v7 = vsel %vm1096_vm9, 0.0, %v4794_v53 }
 0x13a   : > { %v5224_v43 = vpack.c.b16 %v1681_v25, %v1680_v24 }
 0x13b   : > { %v1089_v13 = vadd.f32 %v4220_v5, %v1081_v11  ;;  %v1022_v16 = vpop.f32.mrf.mxu2  ;;  %v5231_v45 = vpack.c.bf16 %v1671_v40, %v1670_v39 }
 0x13c   : > { %v1058_v19 = vadd.f32 %v1057_v17, %v1022_v16 }
 0x13d   : > { %3960 = vmatmul.msk.bf16.vlgmr.msra.gmra.mxu1 %vm1184_vm1, %v5158_v37  ;;  %3962 = vmatmul.msk.bf16.vlgmr.msra.gmra.mxu2 %vm1184_vm1, %v5160_v38  ;;  %v1664_v18 = vpack.c.bf16 %v1089_v13, %v1089_v13 }
 0x13e   : > { %3973 = vmatpush.bf16.msk.msrb.mxu1 %vm5199_vm6, %v5935_v63 }
 0x13f   : > { %3964 = vmatmul.msk.bf16.vlgmr.msra.gmra.mxu3 %vm1184_vm1, %v5160_v38  ;;  %v1668_v29 = vunpack.c.l.bf16 %v1664_v18  ;;  %v1682_v33 = vunpack.c.l.b16 %v1664_v18  ;;  %v5259_v18 = vsel %vm1097_vm10, 0.0, %v4794_v53 }
 0x140   : > { %v1076_v20 = vpop.f32.mrf.mxu0 }
 0x141   : > { %v1082_v27 = vadd.f32 %v1076_v20, %v1058_v19  ;;  %v1672_v35 = vsub.f32 %v1089_v13, %v1668_v29  ;;  %v5263_v20 = vld [vmem:[#allocation2 + $0x18] sm:$0xff] }
 0x142   : > { %3975 = vmatpush.bf16.msk.msrb.mxu1 %vm5209_vm7, %v5935_v63  ;;  %vm1098_vm11 = vcmp.gt.f32.partialorder %v5263_v20, 0.0 }
 0x143   : > { %v1090_v30 = vadd.f32 %v4220_v5, %v1082_v27  ;;  %v5269_v32 = vsel %vm1098_vm11, 0.0, %v4794_v53 }
 0x145   : > { %v1665_v34 = vpack.c.bf16 %v1090_v30, %v1090_v30 }
 0x147   : > { %v1669_v36 = vunpack.c.l.bf16 %v1665_v34  ;;  %v1683_v23 = vunpack.c.l.b16 %v1665_v34 }
 0x149   : > { %v1673_v41 = vsub.f32 %v1090_v30, %v1669_v36  ;;  %v5222_v42 = vpack.c.b16 %v1683_v23, %v1682_v33 }
 0x14b   : > { %v5226_v44 = vpack.c.bf16 %v1673_v41, %v1672_v35  ;;  %1700 = vmatpush.bf16.msrb.mxu2 %v5222_v42  ;;  %1735 = vmatpush.bf16.msrb.mxu3 %v5222_v42 }
 0x14d   : > { %3961 = vmatmul.msk.bf16.gmra.mxu1 %vm1184_vm1, %v5170_v49  ;;  %3963 = vmatmul.msk.bf16.gmra.mxu2 %vm1184_vm1, %v5168_v48 }
 0x14e   : > { %1754 = vmatpush.bf16.msra.mxu0 %v5226_v44 }
 0x14f   : > { %3965 = vmatmul.msk.bf16.gmra.mxu3 %vm1184_vm1, %v5168_v48  ;;  %1701 = vmatpush.bf16.msrb.mxu2 %v5224_v43 }
 0x150   : > { %1736 = vmatpush.bf16.msrb.mxu3 %v5224_v43 }
 0x152   : > { %1755 = vmatpush.bf16.msra.mxu0 %v5231_v45 }
 0x1ba   : > { %v1206_v46 = vpop.f32.mrf.mxu1 }
 0x1c0   : > { %v1241_v50 = vpop.f32.mrf.mxu2 }
 0x1c1   : > { %v1242_v51 = vadd.f32 %v1241_v50, %v1206_v46 }
 0x1c2   : > { %v1266_v52 = vpop.f32.mrf.mxu3  ;;  %v1208_v61 = vpop.f32.mrf.mxu1 }
 0x1c3   : > { %v5241_v60 = vadd.f32 %v1266_v52, %v1242_v51 }
 0x1c5   : > { %v1280_v2 = vadd.f32 %v5241_v60, %v5239_v59 }
 0x1c7   : > { %v1284_v3 = vsel %vm717_vm0, %v1280_v2, -inf }
 0x1c8   : > { %v1243_v4 = vpop.f32.mrf.mxu2  ;;  %1285 = vmax.xlane.f32.xlu0 %v1284_v3 }
 0x1c9   : > { %v1244_v5 = vadd.f32 %v1243_v4, %v1208_v61 }
 0x1ca   : > { %v1268_v6 = vpop.f32.mrf.mxu3  ;;  %v1211_v13 = vpop.f32.mrf.mxu1 }
 0x1cb   : > { %v5251_v9 = vadd.f32 %v1268_v6, %v1244_v5 }
 0x1cd   : > { %v1281_v11 = vadd.f32 %v5251_v9, %v5249_v7 }
 0x1cf   : > { %v1287_v14 = vsel %vm717_vm0, %v1281_v11, -inf }
 0x1d0   : > { %1288 = vmax.xlane.f32.xlu0 %v1287_v14  ;;  %v1246_v15 = vpop.f32.mrf.mxu2 }
 0x1d1   : > { %v1247_v16 = vadd.f32 %v1246_v15, %v1211_v13 }
 0x1d2   : > { %v1271_v17 = vpop.f32.mrf.mxu3  ;;  %v1213_v27 = vpop.f32.mrf.mxu1 }
 0x1d3   : > { %v5261_v19 = vadd.f32 %v1271_v17, %v1247_v16 }
 0x1d5   : > { %v1282_v21 = vadd.f32 %v5261_v19, %v5259_v18 }
 0x1d7   : > { %v1290_v26 = vsel %vm717_vm0, %v1282_v21, -inf }
 0x1d8   : > { %v1248_v29 = vpop.f32.mrf.mxu2  ;;  %1291 = vmax.xlane.f32.xlu1 %v1290_v26 }
 0x1d9   : > { %v1249_v30 = vadd.f32 %v1248_v29, %v1213_v27 }
 0x1da   : > { %v1273_v31 = vpop.f32.mrf.mxu3 }
 0x1db   : > { %v5271_v33 = vadd.f32 %v1273_v31, %v1249_v30 }
 0x1dd   : > { %v1283_v34 = vadd.f32 %v5271_v33, %v5269_v32 }
 0x1df   : > { %v1293_v24 = vsel %vm717_vm0, %v1283_v34, -inf }
 0x1e0   : > { %1294 = vmax.xlane.f32.xlu1 %v1293_v24 }
 0x23b   : > { %v1286_v25 = vpop.xlane.xlu0 %1285 }
 0x23c   : > { %v1296_v35 = vsub.f32 %v1280_v2, %v1286_v25 }
 0x23e   : > { %v1300_v36 = vmul.f32 1.442695, %v1296_v35 }
 0x240   : > { %4222 = vpow2.f32 %v1300_v36 }
 0x243   : > { %v1289_v23 = vpop.xlane.xlu0 %1288 }
 0x244   : > { %v1297_v39 = vsub.f32 %v1281_v11, %v1289_v23 }
 0x246   : > { %v4223_v40 = vpop.eup %4222  ;;  %v1302_v41 = vmul.f32 1.442695, %v1297_v39 }
 0x247   : > { %v1308_v46 = vsel %vm717_vm0, %v4223_v40, 0.0 }
 0x248   : > { %4224 = vpow2.f32 %v1302_v41  ;;  %1309 = vadd.xlane.f32.xlu2 %v1308_v46 }
 0x24b   : > { %v1292_v50 = vpop.xlane.xlu1 %1291 }
 0x24c   : > { %v1298_v51 = vsub.f32 %v1282_v21, %v1292_v50 }
 0x24e   : > { %v4225_v52 = vpop.eup %4224  ;;  %v1304_v53 = vmul.f32 1.442695, %v1298_v51 }
 0x24f   : > { %v1311_v61 = vsel %vm717_vm0, %v4225_v52, 0.0 }
 0x250   : > { %4226 = vpow2.f32 %v1304_v53  ;;  %1312 = vadd.xlane.f32.xlu2 %v1311_v61 }
 0x253   : > { %v1295_v3 = vpop.xlane.xlu1 %1294 }
 0x254   : > { %v1299_v2 = vsub.f32 %v1283_v34, %v1295_v3 }
 0x256   : > { %v5278_v4 = vpop.eup %4226  ;;  %v1306_v5 = vmul.f32 1.442695, %v1299_v2 }
 0x257   : > { %v1314_v6 = vsel %vm717_vm0, %v5278_v4, 0.0 }
 0x258   : > { %4228 = vpow2.f32 %v1306_v5  ;;  %1315 = vadd.xlane.f32.xlu0 %v1314_v6 }
 0x25e   : > { %v5282_v11 = vpop.eup %4228 }
 0x25f   : > { %v1317_v13 = vsel %vm717_vm0, %v5282_v11, 0.0 }
 0x260   : > { %1318 = vadd.xlane.f32.xlu1 %v1317_v13 }
 0x2bb   : > { %v1310_v14 = vpop.xlane.xlu2 %1309 }
 0x2bc   : > { %4230 = vrcp.f32 %v1310_v14  ;;  %v1331_v26 = vand.u32 2147483648, %v1310_v14  ;;  %v1329_v29 = vand.u32 2147483647, %v1310_v14  ;;  %vm1325_vm13 = vweird.f32 %v1310_v14 }
 0x2be   : > { %v1332_v34 = vor.u32 1.1754944e-38, %v1331_v26  ;;  %vm1330_vm15 = vcmp.eq.f32.partialorder %v1329_v29, 8.507059e+37 }
 0x2c2   : > { %v4231_v15 = vpop.eup %4230 }
 0x2c3   : > { %v1321_v16 = vmul.f32 %v4231_v15, %v1310_v14  ;;  %v1313_v17 = vpop.xlane.xlu2 %1312  ;;  %vm1326_vm12 = vweird.f32 %v4231_v15 }
 0x2c4   : > { %4232 = vrcp.f32 %v1313_v17  ;;  %vm1327_vm14 = vmor %vm1325_vm13, %vm1326_vm12  ;;  %v1345_v41 = vand.u32 2147483648, %v1313_v17  ;;  %v1343_v50 = vand.u32 2147483647, %v1313_v17  ;;  %vm1339_vm3 = vweird.f32 %v1313_v17 }
 0x2c5   : > { %v1322_v21 = vsub.f32 1.0, %v1321_v16 }
 0x2c6   : > { %v1346_v3 = vor.u32 1.1754944e-38, %v1345_v41  ;;  %vm1344_vm5 = vcmp.eq.f32.partialorder %v1343_v50, 8.507059e+37 }
 0x2c7   : > { %v1323_v27 = vmul.f32 %v4231_v15, %v1322_v21 }
 0x2c9   : > { %v1324_v30 = vadd.f32 %v4231_v15, %v1323_v27 }
 0x2ca   : > { %v4233_v31 = vpop.eup %4232 }
 0x2cb   : > { %v1328_v24 = vsel %vm1327_vm14, %v4231_v15, %v1324_v30  ;;  %v1335_v25 = vmul.f32 %v4233_v31, %v1313_v17  ;;  %v1316_v35 = vpop.xlane.xlu0 %1315  ;;  %vm1340_vm2 = vweird.f32 %v4233_v31 }
 0x2cc   : > { %v1333_v36 = vsel %vm1330_vm15, %v1332_v34, %v1328_v24  ;;  %4234 = vrcp.f32 %v1316_v35  ;;  %vm1341_vm4 = vmor %vm1339_vm3, %vm1340_vm2  ;;  %v1359_v16 = vand.u32 2147483648, %v1316_v35  ;;  %vm1353_vm9 = vweird.f32 %v1316_v35 }
 0x2cd   : > { %v1336_v23 = vsub.f32 1.0, %v1335_v25  ;;  %v1376_v39 = vmul.f32 %v4223_v40, %v1333_v36  ;;  %v1357_v40 = vand.u32 2147483647, %v1316_v35 }
 0x2ce   : > { %v1360_v30 = vor.u32 1.1754944e-38, %v1359_v16 }
 0x2cf   : > { %v1337_v46 = vmul.f32 %v4233_v31, %v1336_v23  ;;  %v1380_v61 = vmul.f32 %v1376_v39, %v5236_v47  ;;  %vm1358_vm11 = vcmp.eq.f32.partialorder %v1357_v40, 8.507059e+37 }
 0x2d1   : > { %v1338_v51 = vadd.f32 %v4233_v31, %v1337_v46  ;;  %v1384_v21 = vpack.c.bf16 %v1380_v61, %v1380_v61 }
 0x2d2   : > { %v4235_v53 = vpop.eup %4234 }
 0x2d3   : > { %v1342_v2 = vsel %vm1341_vm4, %v4233_v31, %v1338_v51  ;;  %v1349_v5 = vmul.f32 %v4235_v53, %v1316_v35  ;;  %v1319_v6 = vpop.xlane.xlu1 %1318  ;;  %vm1354_vm8 = vweird.f32 %v4235_v53  ;;  %v1388_v31 = vunpack.c.l.bf16 %v1384_v21 }
 0x2d4   : > { %v1347_v13 = vsel %vm1344_vm5, %v1346_v3, %v1342_v2  ;;  %4236 = vrcp.f32 %v1319_v6  ;;  %vm1355_vm10 = vmor %vm1353_vm9, %vm1354_vm8  ;;  %v1427_v25 = vunpack.c.l.b16 %v1384_v21  ;;  %v1373_v46 = vand.u32 2147483648, %v1319_v6 }
 0x2d5   : > { %v1377_v14 = vmul.f32 %v4225_v52, %v1347_v13  ;;  %v1350_v15 = vsub.f32 1.0, %v1349_v5  ;;  %v1392_v50 = vsub.f32 %v1380_v61, %v1388_v31  ;;  %v1371_v3 = vand.u32 2147483647, %v1319_v6 }
 0x2d6   : > { %vm1367_vm13 = vweird.f32 %v1319_v6  ;;  %v1374_v13 = vor.u32 1.1754944e-38, %v1373_v46  ;;  %v1117_v31 = vsub.s32 %v5180_v55, %v5189_v58 }
 0x2d7   : > { %v1381_v26 = vmul.f32 %v1377_v14, %v5243_v1  ;;  %v1351_v27 = vmul.f32 %v4235_v53, %v1350_v15  ;;  %vm1372_vm15 = vcmp.eq.f32.partialorder %v1371_v3, 8.507059e+37 }
 0x2d8   : > { %vm1123_vm3 = vcmp.lt.s32.totalorder %v1117_v31, 0 }
 0x2d9   : > { %v1352_v17 = vadd.f32 %v4235_v53, %v1351_v27  ;;  %v1385_v47 = vpack.c.bf16 %v1381_v26, %v1381_v26 }
 0x2da   : > { %v4237_v29 = vpop.eup %4236 }
 0x2db   : > { %v1356_v34 = vsel %vm1355_vm10, %v4235_v53, %v1352_v17  ;;  %v1363_v24 = vmul.f32 %v4237_v29, %v1319_v6  ;;  %v1428_v52 = vunpack.c.l.b16 %v1385_v47  ;;  %v1389_v23 = vunpack.c.l.bf16 %v1385_v47 }
 0x2dc   : > { %v1361_v36 = vsel %vm1358_vm11, %v1360_v30, %v1356_v34  ;;  %vm1368_vm12 = vweird.f32 %v4237_v29 }
 0x2dd   : > { %v1364_v39 = vsub.f32 1.0, %v1363_v24  ;;  %v1431_v41 = vpack.c.b16 %v1428_v52, %v1427_v25  ;;  %v1378_v1 = vmul.f32 %v5278_v4, %v1361_v36  ;;  %v1393_v51 = vsub.f32 %v1381_v26, %v1389_v23  ;;  %vm1369_vm14 = vmor %vm1367_vm13, %vm1368_vm12 }
 0x2de   : > { %v1124_v52 = vsub.s32 0, %v1117_v31 }
 0x2df   : > { %v1365_v35 = vmul.f32 %v4237_v29, %v1364_v39  ;;  %3976 = vmatmul.msk.bf16.vlgmr.msrb.gmra.mxu1 %vm717_vm0, %v1431_v41  ;;  %v1396_v2 = vpack.c.bf16 %v1393_v51, %v1392_v50  ;;  %v1382_v53 = vmul.f32 %v1378_v1, %v5253_v10  ;;  %v1118_v41 = vsub.s32 %v5180_v55, %v5183_v56 }
 0x2e0   : > { %v1125_v39 = vsel %vm1123_vm3, %v1124_v52, %v1117_v31 }
 0x2e1   : > { %v1366_v5 = vadd.f32 %v4237_v29, %v1365_v35  ;;  %3970 = vmatmul.msk.bf16.vlgmr.msrb.gmra.mxu0 %vm717_vm0, %v1396_v2  ;;  %v1386_v15 = vpack.c.bf16 %v1382_v53, %v1382_v53  ;;  %v5311_v50 = vcvt.s32.f32 %v1125_v39  ;;  %v1127_v58 = vsub.s32 0, %v1118_v41 }
 0x2e2   : > { %3991 = vmatpush.bf16.msk.msrb.mxu0 %vm5199_vm6, %v5935_v63  ;;  %vm1126_vm4 = vcmp.lt.s32.totalorder %v1118_v41, 0 }
 0x2e3   : > { %v1370_v14 = vsel %vm1369_vm14, %v4237_v29, %v1366_v5  ;;  %v1390_v6 = vunpack.c.l.bf16 %v1386_v15  ;;  %v1429_v16 = vunpack.c.l.b16 %v1386_v15  ;;  %v1128_v2 = vsel %vm1126_vm4, %v1127_v58, %v1118_v41 }
 0x2e4   : > { %v1375_v4 = vsel %vm1372_vm15, %v1374_v13, %v1370_v14  ;;  %v1119_v5 = vsub.s32 %v5180_v55, %v5186_v57  ;;  %v5316_v56 = vcvt.s32.f32 %v1128_v2 }
 0x2e5   : > { %v1379_v61 = vmul.f32 %v5282_v11, %v1375_v4  ;;  %v1394_v17 = vsub.f32 %v1382_v53, %v1390_v6 }
 0x2e6   : > { %3993 = vmatpush.bf16.msk.msrb.mxu0 %vm5209_vm7, %v5935_v63  ;;  %v1130_v15 = vsub.s32 0, %v1119_v5  ;;  %vm1129_vm5 = vcmp.lt.s32.totalorder %v1119_v5, 0 }
 0x2e7   : > { %v1383_v40 = vmul.f32 %v1379_v61, %v5263_v20  ;;  %v1116_v20 = vsub.s32 %v5180_v55, %v5178_v54 }
 0x2e9   : > { %v1387_v10 = vpack.c.bf16 %v1383_v40, %v1383_v40  ;;  %v1121_v11 = vsub.s32 0, %v1116_v20  ;;  %vm1120_vm2 = vcmp.lt.s32.totalorder %v1116_v20, 0 }
 0x2eb   : > { %v1430_v21 = vunpack.c.l.b16 %v1387_v10  ;;  %v1391_v26 = vunpack.c.l.bf16 %v1387_v10  ;;  %v1122_v30 = vsel %vm1120_vm2, %v1121_v11, %v1116_v20 }
 0x2ec   : > { %v5306_v24 = vcvt.s32.f32 %v1122_v30 }
 0x2ed   : > { %v1432_v27 = vpack.c.b16 %v1430_v21, %v1429_v16  ;;  %v1395_v47 = vsub.f32 %v1383_v40, %v1391_v26  ;;  %v1131_v21 = vsel %vm1129_vm5, %v1130_v15, %v1119_v5 }
 0x2ef   : > { %3977 = vmatmul.msk.bf16.gmra.mxu1 %vm717_vm0, %v1432_v27  ;;  %v1397_v29 = vpack.c.bf16 %v1395_v47, %v1394_v17  ;;  %v5319_v47 = vcvt.s32.f32 %v1131_v21 }
 0x2f1   : > { %3971 = vmatmul.msk.bf16.gmra.mxu0 %vm717_vm0, %v1397_v29 }
 0x35c   : > { %v1448_v34 = vpop.f32.mrf.mxu1 }
 0x35e   : > { %v1413_v25 = vpop.f32.mrf.mxu0 }
 0x35f   : > { %v1449_v36 = vadd.f32 %v1448_v34, %v1413_v25  ;;  %v1515_v25 = vstv %s1514_s5 }
 0x361   : > { %v1458_v23 = vmul.f32 %v1449_v36, %v5306_v24 }
 0x363   : > { %v1462_v1 = vmax.f32 %v1458_v23, 0.0 }
 0x364   : > { %v1450_v46 = vpop.f32.mrf.mxu1 }
 0x365   : > { %4238 = vrsqrt.f32 %v1462_v1  ;;  %vm1473_vm8 = vcmp.eq.f32.partialorder %v1462_v1, inf  ;;  %v1476_v34 = vand.u32 2147483648, %v1462_v1  ;;  %vm1475_vm9 = vcmp.eq.f32.partialorder %v1462_v1, 0.0 }
 0x366   : > { %v1415_v51 = vpop.f32.mrf.mxu0 }
 0x367   : > { %v1451_v35 = vadd.f32 %v1450_v46, %v1415_v51 }
 0x369   : > { %v1459_v3 = vmul.f32 %v1451_v35, %v5311_v50 }
 0x36b   : > { %v4239_v53 = vpop.eup %4238  ;;  %v1463_v13 = vmax.f32 %v1459_v3, 0.0 }
 0x36c   : > { %v1453_v14 = vpop.f32.mrf.mxu1  ;;  %v1467_v4 = vmul.f32 %v4239_v53, %v1462_v1 }
 0x36d   : > { %4240 = vrsqrt.f32 %v1463_v13  ;;  %vm1485_vm10 = vcmp.eq.f32.partialorder %v1463_v13, inf  ;;  %vm1487_vm11 = vcmp.eq.f32.partialorder %v1463_v13, 0.0 }
 0x36e   : > { %v1418_v61 = vpop.f32.mrf.mxu0  ;;  %v1468_v40 = vmul.f32 %v4239_v53, %v1467_v4 }
 0x36f   : > { %v1454_v10 = vadd.f32 %v1453_v14, %v1418_v61  ;;  %v1488_v14 = vand.u32 2147483648, %v1463_v13 }
 0x370   : > { %v1469_v6 = vmul.f32 0.5, %v1468_v40 }
 0x371   : > { %v1460_v16 = vmul.f32 %v1454_v10, %v5316_v56 }
 0x372   : > { %v1470_v26 = vsub.f32 1.5, %v1469_v6 }
 0x373   : > { %v4241_v27 = vpop.eup %4240  ;;  %v1464_v55 = vmax.f32 %v1460_v16, 0.0 }
 0x374   : > { %v1471_v57 = vmul.f32 %v4239_v53, %v1470_v26  ;;  %v1479_v17 = vmul.f32 %v4241_v27, %v1463_v13  ;;  %v1455_v29 = vpop.f32.mrf.mxu1 }
 0x375   : > { %4242 = vrsqrt.f32 %v1464_v55  ;;  %vm1497_vm12 = vcmp.eq.f32.partialorder %v1464_v55, inf  ;;  %vm1499_vm13 = vcmp.eq.f32.partialorder %v1464_v55, 0.0 }
 0x376   : > { %v1420_v20 = vpop.f32.mrf.mxu0  ;;  %v1472_v11 = vmul.f32 %v1471_v57, %v1462_v1  ;;  %v1480_v30 = vmul.f32 %v4241_v27, %v1479_v17 }
 0x377   : > { %v1456_v31 = vadd.f32 %v1455_v29, %v1420_v20  ;;  %v1500_v20 = vand.u32 2147483648, %v1464_v55 }
 0x378   : > { %v1474_v52 = vsel %vm1473_vm8, %v1462_v1, %v1472_v11  ;;  %v1481_v36 = vmul.f32 0.5, %v1480_v30  ;;  %vm1640_vm8 = vcmp.eq.s32.totalorder %v5178_v54, 0 }
 0x379   : > { %v1461_v23 = vmul.f32 %v1456_v31, %v5319_v47  ;;  %v1477_v39 = vsel %vm1475_vm9, %v1476_v34, %v1474_v52 }
 0x37a   : > { %v1516_v41 = vmul.f32 %v1515_v25, %v1477_v39  ;;  %v1482_v46 = vsub.f32 1.5, %v1481_v36 }
 0x37b   : > { %v4243_v51 = vpop.eup %4242  ;;  %v1465_v58 = vmax.f32 %v1461_v23, 0.0 }
 0x37c   : > { %v1520_v35 = vmul.f32 1.442695, %v1516_v41  ;;  %v1483_v3 = vmul.f32 %v4241_v27, %v1482_v46  ;;  %v1491_v2 = vmul.f32 %v4243_v51, %v1464_v55 }
 0x37d   : > { %4244 = vrsqrt.f32 %v1465_v58  ;;  %vm1509_vm14 = vcmp.eq.f32.partialorder %v1465_v58, inf  ;;  %vm1511_vm15 = vcmp.eq.f32.partialorder %v1465_v58, 0.0 }
 0x37e   : > { %4246 = vpow2.f32 %v1520_v35  ;;  %v1484_v5 = vmul.f32 %v1483_v3, %v1463_v13  ;;  %v1492_v53 = vmul.f32 %v4243_v51, %v1491_v2 }
 0x380   : > { %v1486_v4 = vsel %vm1485_vm10, %v1463_v13, %v1484_v5  ;;  %v1493_v1 = vmul.f32 0.5, %v1492_v53 }
 0x381   : > { %v1489_v61 = vsel %vm1487_vm11, %v1488_v14, %v1486_v4 }
 0x382   : > { %v1517_v15 = vmul.f32 %v1515_v25, %v1489_v61  ;;  %v1494_v40 = vsub.f32 1.5, %v1493_v1 }
 0x383   : > { %v4245_v10 = vpop.eup %4244 }
 0x384   : > { %v4247_v6 = vpop.eup %4246  ;;  %v1522_v16 = vmul.f32 1.442695, %v1517_v15  ;;  %v1495_v21 = vmul.f32 %v4243_v51, %v1494_v40  ;;  %v1503_v26 = vmul.f32 %v4245_v10, %v1465_v58 }
 0x385   : > { %v1528_v57 = vmax.f32 %v4247_v6, 1e-05 }
 0x386   : > { %4248 = vpow2.f32 %v1522_v16  ;;  %v1496_v27 = vmul.f32 %v1495_v21, %v1464_v55  ;;  %v1504_v17 = vmul.f32 %v4245_v10, %v1503_v26 }
 0x387   : > { %v1532_v29 = vmin.f32 %v1528_v57, 100000.0 }
 0x388   : > { %v1498_v11 = vsel %vm1497_vm12, %v1464_v55, %v1496_v27  ;;  %v1505_v30 = vmul.f32 0.5, %v1504_v17  ;;  %v1512_v55 = vand.u32 2147483648, %v1465_v58 }
 0x389   : > { %v1536_v13 = vmul.f32 %v1532_v29, %v5241_v60  ;;  %v1501_v31 = vsel %vm1499_vm13, %v1500_v20, %v1498_v11 }
 0x38a   : > { %v1518_v34 = vmul.f32 %v1515_v25, %v1501_v31  ;;  %v1506_v52 = vsub.f32 1.5, %v1505_v30 }
 0x38b   : > { %v1540_v36 = vadd.f32 %v1536_v13, %v5239_v59 }
 0x38c   : > { %v4249_v23 = vpop.eup %4248  ;;  %v1524_v39 = vmul.f32 1.442695, %v1518_v34  ;;  %v1507_v41 = vmul.f32 %v4245_v10, %v1506_v52 }
 0x38d   : > { %v1544_v46 = vsel %vm717_vm0, %v1540_v36, -inf  ;;  %v1529_v51 = vmax.f32 %v4249_v23, 1e-05 }
 0x38e   : > { %1545 = vmax.xlane.f32.xlu2 %v1544_v46  ;;  %4250 = vpow2.f32 %v1524_v39  ;;  %v1508_v35 = vmul.f32 %v1507_v41, %v1465_v58 }
 0x38f   : > { %v1533_v3 = vmin.f32 %v1529_v51, 100000.0 }
 0x390   : > { %v1510_v2 = vsel %vm1509_vm14, %v1465_v58, %v1508_v35 }
 0x391   : > { %v1537_v60 = vmul.f32 %v1533_v3, %v5251_v9  ;;  %v1513_v5 = vsel %vm1511_vm15, %v1512_v55, %v1510_v2 }
 0x392   : > { %v1519_v53 = vmul.f32 %v1515_v25, %v1513_v5 }
 0x393   : > { %v1541_v14 = vadd.f32 %v1537_v60, %v5249_v7 }
 0x394   : > { %v4251_v4 = vpop.eup %4250  ;;  %v1526_v1 = vmul.f32 1.442695, %v1519_v53 }
 0x395   : > { %v1547_v61 = vsel %vm717_vm0, %v1541_v14, -inf  ;;  %v1530_v15 = vmax.f32 %v4251_v4, 1e-05 }
 0x396   : > { %1548 = vmax.xlane.f32.xlu0 %v1547_v61  ;;  %4252 = vpow2.f32 %v1526_v1 }
 0x397   : > { %v1534_v40 = vmin.f32 %v1530_v15, 100000.0 }
 0x399   : > { %v1538_v10 = vmul.f32 %v1534_v40, %v5261_v19 }
 0x39b   : > { %v1542_v6 = vadd.f32 %v1538_v10, %v5259_v18 }
 0x39c   : > { %v4253_v16 = vpop.eup %4252 }
 0x39d   : > { %v1550_v58 = vsel %vm717_vm0, %v1542_v6, -inf  ;;  %v1531_v9 = vmax.f32 %v4253_v16, 1e-05 }
 0x39e   : > { %1551 = vmax.xlane.f32.xlu1 %v1550_v58 }
 0x39f   : > { %v1535_v25 = vmin.f32 %v1531_v9, 100000.0 }
 0x3a1   : > { %v1539_v21 = vmul.f32 %v1535_v25, %v5271_v33 }
 0x3a3   : > { %v1543_v26 = vadd.f32 %v1539_v21, %v5269_v32 }
 0x3a5   : > { %v1553_v57 = vsel %vm717_vm0, %v1543_v26, -inf }
 0x3a6   : > { %1554 = vmax.xlane.f32.xlu2 %v1553_v57 }
 0x3be   : > { %1845 = vrot.lane.b32.xlu2 %v5141_v12, %s4795_s21 }
 0x401   : > { %v1546_v19 = vpop.xlane.xlu2 %1545 }
 0x402   : > { %v1556_v27 = vsub.f32 %v1540_v36, %v1546_v19 }
 0x404   : > { %v1560_v17 = vmul.f32 1.442695, %v1556_v27 }
 0x406   : > { %4254 = vpow2.f32 %v1560_v17 }
 0x409   : > { %v1549_v29 = vpop.xlane.xlu0 %1548 }
 0x40a   : > { %v1557_v20 = vsub.f32 %v1541_v14, %v1549_v29 }
 0x40c   : > { %v4255_v11 = vpop.eup %4254  ;;  %v1562_v30 = vmul.f32 1.442695, %v1557_v20 }
 0x40d   : > { %v1568_v13 = vsel %vm717_vm0, %v4255_v11, 0.0 }
 0x40e   : > { %4256 = vpow2.f32 %v1562_v30  ;;  %1569 = vadd.xlane.f32.xlu0 %v1568_v13 }
 0x411   : > { %v1552_v33 = vpop.xlane.xlu1 %1551 }
 0x412   : > { %v1558_v31 = vsub.f32 %v1542_v6, %v1552_v33 }
 0x414   : > { %v5337_v34 = vpop.eup %4256  ;;  %v1564_v52 = vmul.f32 1.442695, %v1558_v31 }
 0x415   : > { %v1571_v23 = vsel %vm717_vm0, %v5337_v34, 0.0 }
 0x416   : > { %4258 = vpow2.f32 %v1564_v52  ;;  %1572 = vadd.xlane.f32.xlu1 %v1571_v23 }
 0x419   : > { %v1555_v36 = vpop.xlane.xlu2 %1554 }
 0x41a   : > { %v1559_v39 = vsub.f32 %v1543_v26, %v1555_v36 }
 0x41c   : > { %v5341_v41 = vpop.eup %4258  ;;  %v1566_v46 = vmul.f32 1.442695, %v1559_v39 }
 0x41d   : > { %v1574_v51 = vsel %vm717_vm0, %v5341_v41, 0.0 }
 0x41e   : > { %4260 = vpow2.f32 %v1566_v46  ;;  %1575 = vadd.xlane.f32.xlu2 %v1574_v51 }
 0x421   : > { %v1846_v35 = vpop.permute.xlu2 %1845 }
 0x422   : > { %v1851_v3 = vsel %vm1184_vm1, %v1846_v35, 0 }
 0x423   : > { %1859 = vmatpush.bf16.xpose.msra.mxu3 %v1851_v3 }
 0x424   : > { %v5346_v55 = vpop.eup %4260 }
 0x425   : > { %v1577_v2 = vsel %vm717_vm0, %v5346_v55, 0.0 }
 0x426   : > { %1578 = vadd.xlane.f32.xlu0 %v1577_v2 }
 0x42f   : > { %1779 = vrot.lane.b32.xlu1 %v5139_v8, %s4795_s21 }
 0x436   : > { %1843 = vrot.lane.b32.xlu2 %v5151_v28, %s4795_s21 }
 0x437   : > { %1812 = vrot.lane.b32.xlu1 %v5160_v38, %s4795_s21 }
 0x43a   : > { %1777 = vrot.lane.b32.xlu0 %v5149_v22, %s4795_s21 }
 0x43e   : > { %1814 = vrot.lane.b32.xlu2 %v5168_v48, %s4795_s21 }
 0x43f   : > { %1775 = vrot.lane.b32.xlu1 %v5170_v49, %s4795_s21 }
 0x442   : > { %1773 = vrot.lane.b32.xlu0 %v5158_v37, %s4795_s21 }
 0x481   : > { %v1570_v60 = vpop.xlane.xlu0 %1569 }
 0x482   : > { %4262 = vrcp.f32 %v1570_v60  ;;  %v1591_v1 = vand.u32 2147483648, %v1570_v60  ;;  %v1589_v15 = vand.u32 2147483647, %v1570_v60  ;;  %vm1585_vm3 = vweird.f32 %v1570_v60 }
 0x484   : > { %v1592_v6 = vor.u32 1.1754944e-38, %v1591_v1  ;;  %vm1590_vm5 = vcmp.eq.f32.partialorder %v1589_v15, 8.507059e+37 }
 0x488   : > { %v4263_v5 = vpop.eup %4262 }
 0x489   : > { %v1581_v53 = vmul.f32 %v4263_v5, %v1570_v60  ;;  %v1573_v14 = vpop.xlane.xlu1 %1572  ;;  %vm1586_vm2 = vweird.f32 %v4263_v5 }
 0x48a   : > { %4264 = vrcp.f32 %v1573_v14  ;;  %vm1587_vm4 = vmor %vm1585_vm3, %vm1586_vm2  ;;  %v1605_v57 = vand.u32 2147483648, %v1573_v14  ;;  %v1603_v27 = vand.u32 2147483647, %v1573_v14  ;;  %vm1599_vm10 = vweird.f32 %v1573_v14 }
 0x48b   : > { %v1582_v4 = vsub.f32 1.0, %v1581_v53 }
 0x48c   : > { %v1606_v30 = vor.u32 1.1754944e-38, %v1605_v57  ;;  %vm1604_vm12 = vcmp.eq.f32.partialorder %v1603_v27, 8.507059e+37 }
 0x48d   : > { %v1583_v61 = vmul.f32 %v4263_v5, %v1582_v4 }
 0x48f   : > { %v1584_v40 = vadd.f32 %v4263_v5, %v1583_v61 }
 0x490   : > { %v4265_v10 = vpop.eup %4264 }
 0x491   : > { %v1588_v16 = vsel %vm1587_vm4, %v4263_v5, %v1584_v40  ;;  %v1595_v58 = vmul.f32 %v4265_v10, %v1573_v14  ;;  %v1576_v9 = vpop.xlane.xlu2 %1575  ;;  %vm1600_vm9 = vweird.f32 %v4265_v10 }
 0x492   : > { %v1593_v25 = vsel %vm1590_vm5, %v1592_v6, %v1588_v16  ;;  %4266 = vrcp.f32 %v1576_v9  ;;  %vm1601_vm11 = vmor %vm1599_vm10, %vm1600_vm9  ;;  %v1619_v51 = vand.u32 2147483648, %v1576_v9  ;;  %v1617_v2 = vand.u32 2147483647, %v1576_v9 }
 0x493   : > { %v1636_v21 = vmul.f32 %v4255_v11, %v1593_v25  ;;  %v1596_v26 = vsub.f32 1.0, %v1595_v58  ;;  %vm1613_vm14 = vweird.f32 %v1576_v9 }
 0x494   : > { %v1620_v61 = vor.u32 1.1754944e-38, %v1619_v51  ;;  %vm1618_vm2 = vcmp.eq.f32.partialorder %v1617_v2, 8.507059e+37 }
 0x495   : > { %v1597_v19 = vmul.f32 %v4265_v10, %v1596_v26  ;;  %v1644_v17 = vsel %vm1640_vm8, 0.0, %v1636_v21 }
 0x496   : > { %v1648_v52 = vpack.c.bf16 %v1644_v17, %v1644_v17 }
 0x497   : > { %v1598_v29 = vadd.f32 %v4265_v10, %v1597_v19 }
 0x498   : > { %v4267_v20 = vpop.eup %4266  ;;  %v1652_v60 = vunpack.c.l.bf16 %v1648_v52  ;;  %v1717_v53 = vunpack.c.l.b16 %v1648_v52 }
 0x499   : > { %v1602_v13 = vsel %vm1601_vm11, %v4265_v10, %v1598_v29  ;;  %v1609_v33 = vmul.f32 %v4267_v20, %v1576_v9  ;;  %v1579_v31 = vpop.xlane.xlu0 %1578  ;;  %v1844_v11 = vpop.permute.xlu2 %1843  ;;  %vm1614_vm13 = vweird.f32 %v4267_v20 }
 0x49a   : > { %v1607_v23 = vsel %vm1604_vm12, %v1606_v30, %v1602_v13  ;;  %4268 = vrcp.f32 %v1579_v31  ;;  %v1848_v46 = vsel %vm1184_vm1, %v1844_v11, 0  ;;  %vm1615_vm15 = vmor %vm1613_vm14, %vm1614_vm13  ;;  %v1656_v16 = vsub.f32 %v1644_v17, %v1652_v60 }
 0x49b   : > { %v1637_v36 = vmul.f32 %v5337_v34, %v1607_v23  ;;  %v1610_v39 = vsub.f32 1.0, %v1609_v33  ;;  %1860 = vmatpush.bf16.xpose.msra.mxu3 %v1848_v46  ;;  %v1633_v9 = vand.u32 2147483648, %v1579_v31  ;;  %v1631_v19 = vand.u32 2147483647, %v1579_v31 }
 0x49c   : > { %vm1627_vm4 = vweird.f32 %v1579_v31 }
 0x49d   : > { %v1649_v35 = vpack.c.bf16 %v1637_v36, %v1637_v36  ;;  %v1611_v3 = vmul.f32 %v4267_v20, %v1610_v39  ;;  %v1634_v17 = vor.u32 1.1754944e-38, %v1633_v9  ;;  %vm1632_vm9 = vcmp.eq.f32.partialorder %v1631_v19, 8.507059e+37 }
 0x49f   : > { %v1612_v5 = vadd.f32 %v4267_v20, %v1611_v3  ;;  %v1718_v14 = vunpack.c.l.b16 %v1649_v35  ;;  %v1653_v4 = vunpack.c.l.bf16 %v1649_v35 }
 0x4a0   : > { %v4269_v1 = vpop.eup %4268 }
 0x4a1   : > { %v1616_v15 = vsel %vm1615_vm15, %v4267_v20, %v1612_v5  ;;  %v1623_v34 = vmul.f32 %v4269_v1, %v1579_v31  ;;  %v1780_v40 = vpop.permute.xlu1 %1779  ;;  %v1721_v10 = vpack.c.b16 %v1718_v14, %v1717_v53  ;;  %v1657_v58 = vsub.f32 %v1637_v36, %v1653_v4  ;;  %v1815_v5 = vpop.permute.xlu2 %1814 }
 0x4a2   : > { %v1791_v6 = vsel %vm1184_vm1, %v1780_v40, 0  ;;  %v1621_v25 = vsel %vm1618_vm2, %v1620_v61, %v1616_v15  ;;  %vm1628_vm3 = vweird.f32 %v4269_v1 }
 0x4a3   : > { %v1624_v21 = vsub.f32 1.0, %v1623_v34  ;;  %3980 = vmatmul.msk.bf16.vlgmr.msrb.gmra.mxu3 %vm717_vm0, %v1721_v10  ;;  %3982 = vmatmul.msk.bf16.vlgmr.msra.gmra.mxu0 %vm717_vm0, %v1721_v10  ;;  %v1660_v26 = vpack.c.bf16 %v1657_v58, %v1656_v16  ;;  %v1638_v27 = vmul.f32 %v5341_v41, %v1621_v25  ;;  %vm1629_vm5 = vmor %vm1627_vm4, %vm1628_vm3 }
 0x4a4   : > { %1799 = vmatpush.bf16.xpose.msra.mxu1 %v1791_v6  ;;  %1828 = vmatpush.bf16.xpose.msra.mxu2 %v1791_v6 }
 0x4a5   : > { %v1625_v57 = vmul.f32 %v4269_v1, %v1624_v21  ;;  %3978 = vmatmul.msk.bf16.vlgmr.msrb.gmra.mxu2 %vm717_vm0, %v1660_v26  ;;  %v1650_v30 = vpack.c.bf16 %v1638_v27, %v1638_v27 }
 0x4a7   : > { %v1626_v29 = vadd.f32 %v4269_v1, %v1625_v57  ;;  %v1654_v36 = vunpack.c.l.bf16 %v1650_v30  ;;  %v1719_v41 = vunpack.c.l.b16 %v1650_v30 }
 0x4a9   : > { %v1630_v20 = vsel %vm1629_vm5, %v4269_v1, %v1626_v29  ;;  %v1658_v51 = vsub.f32 %v1638_v27, %v1654_v36  ;;  %v1813_v2 = vpop.permute.xlu1 %1812 }
 0x4aa   : > { %v1635_v13 = vsel %vm1632_vm9, %v1634_v17, %v1630_v20 }
 0x4ab   : > { %v1639_v33 = vmul.f32 %v5346_v55, %v1635_v13 }
 0x4ac   : > { %v1778_v11 = vpop.permute.xlu0 %1777 }
 0x4ad   : > { %v1788_v52 = vsel %vm1184_vm1, %v1778_v11, 0  ;;  %v1651_v23 = vpack.c.bf16 %v1639_v33, %v1639_v33 }
 0x4ae   : > { %1800 = vmatpush.bf16.xpose.msra.mxu1 %v1788_v52  ;;  %1829 = vmatpush.bf16.xpose.msra.mxu2 %v1788_v52 }
 0x4af   : > { %v1720_v39 = vunpack.c.l.b16 %v1651_v23  ;;  %v1655_v46 = vunpack.c.l.bf16 %v1651_v23 }
 0x4b1   : > { %v1722_v31 = vpack.c.b16 %v1720_v39, %v1719_v41  ;;  %v1659_v35 = vsub.f32 %v1639_v33, %v1655_v46  ;;  %v1776_v60 = vpop.permute.xlu1 %1775 }
 0x4b3   : > { %3981 = vmatmul.msk.bf16.gmra.mxu3 %vm717_vm0, %v1722_v31  ;;  %3983 = vmatmul.msk.bf16.gmra.mxu0 %vm717_vm0, %v1722_v31  ;;  %v1661_v55 = vpack.c.bf16 %v1659_v35, %v1658_v51 }
 0x4b4   : > { %v1774_v3 = vpop.permute.xlu0 %1773 }
 0x4b5   : > { %3984 = vmatmul.msk.bf16.vlgmr.msra.gmra.mxu1 %vm1184_vm1, %v1774_v3  ;;  %3979 = vmatmul.msk.bf16.gmra.mxu2 %vm717_vm0, %v1661_v55 }
 0x4b6   : > { %3997 = vmatpush.bf16.msk.msrb.mxu1 %vm5199_vm6, %v5935_v63 }
 0x4ba   : > { %3999 = vmatpush.bf16.msk.msrb.mxu1 %vm5209_vm7, %v5935_v63 }
 0x4c3   : > { %3988 = vmatmul.msk.bf16.vlgmr.msra.gmra.mxu3 %vm1184_vm1, %v1813_v2 }
 0x4c5   : > { %3985 = vmatmul.msk.bf16.gmra.mxu1 %vm1184_vm1, %v1776_v60  ;;  %3986 = vmatmul.msk.bf16.vlgmr.msra.gmra.mxu2 %vm1184_vm1, %v1813_v2 }
 0x4d3   : > { %3989 = vmatmul.msk.bf16.gmra.mxu3 %vm1184_vm1, %v1815_v5 }
 0x4d5   : > { %3987 = vmatmul.msk.bf16.gmra.mxu2 %vm1184_vm1, %v1815_v5 }
 0x520   : > { %v1757_v14 = vpop.f32.mrf.mxu0 }
 0x526   : > { %v1738_v53 = vpop.f32.mrf.mxu3 }
 0x528   : > { %v1703_v4 = vpop.f32.mrf.mxu2  ;;  %v5395_v34 = vpop.f32.mrf.mxu0 }
 0x529   : > { %v1739_v1 = vadd.f32 %v1738_v53, %v1703_v4  ;;  %5972 = vst [vmem:[#allocation37_spill] sm:$0xff] %v5395_v34 }
 0x52b   : > { %v5391_v61 = vadd.f32 %v1757_v14, %v1739_v1 }
 0x52d   : > { %5970 = vst [vmem:[#allocation35_spill] sm:$0xff] %v5391_v61 }
 0x52e   : > { %v5393_v15 = vpop.f32.mrf.mxu3 }
 0x52f   : > { %5971 = vst [vmem:[#allocation36_spill] sm:$0xff] %v5393_v15 }
 0x530   : > { %v5397_v40 = vpop.f32.mrf.mxu2  ;;  %v1762_v58 = vpop.f32.mrf.mxu0 }
 0x532   : > { %v1802_v26 = vpop.f32.mrf.mxu1 }
 0x536   : > { %v1743_v10 = vpop.f32.mrf.mxu3 }
 0x538   : > { %v1708_v6 = vpop.f32.mrf.mxu2 }
 0x539   : > { %v1744_v16 = vadd.f32 %v1743_v10, %v1708_v6 }
 0x53a   : > { %v1804_v17 = vpop.f32.mrf.mxu1 }
 0x53b   : > { %v5399_v25 = vadd.f32 %v1762_v58, %v1744_v16 }
 0x53d   : > { %5973 = vst [vmem:[#allocation38_spill] sm:$0xff] %v5399_v25 }
 0x53e   : > { %v5401_v21 = vpop.f32.mrf.mxu3 }
 0x53f   : > { %5974 = vst [vmem:[#allocation39_spill] sm:$0xff] %v5401_v21 }
 0x540   : > { %v5403_v9 = vpop.f32.mrf.mxu2 }
 0x541   : > { %5975 = vst [vmem:[#allocation40_spill] sm:$0xff] %v5403_v9 }
 0x542   : > { %v1807_v36 = vpop.f32.mrf.mxu1 }
 0x546   : > { %v1862_v57 = vpop.f32.mrf.mxu3 }
 0x548   : > { %v1831_v19 = vpop.f32.mrf.mxu2 }
 0x549   : > { %v1832_v27 = vadd.f32 %v1831_v19, %v1802_v26 }
 0x54a   : > { %v1809_v3 = vpop.f32.mrf.mxu1 }
 0x54b   : > { %v5405_v29 = vadd.f32 %v1862_v57, %v1832_v27 }
 0x54d   : > { %v1876_v20 = vadd.f32 %v5405_v29, %v5239_v59 }
 0x54e   : > { %v1864_v30 = vpop.f32.mrf.mxu3 }
 0x54f   : > { %v1880_v13 = vsel %vm717_vm0, %v1876_v20, -inf }
 0x550   : > { %v1833_v33 = vpop.f32.mrf.mxu2  ;;  %1881 = vmax.xlane.f32.xlu0 %v1880_v13 }
 0x551   : > { %v1834_v11 = vadd.f32 %v1833_v33, %v1804_v17 }
 0x553   : > { %v5410_v52 = vadd.f32 %v1864_v30, %v1834_v11 }
 0x555   : > { %v1877_v23 = vadd.f32 %v5410_v52, %v5249_v7 }
 0x556   : > { %v1867_v39 = vpop.f32.mrf.mxu3 }
 0x557   : > { %v1883_v41 = vsel %vm717_vm0, %v1877_v23, -inf }
 0x558   : > { %1884 = vmax.xlane.f32.xlu2 %v1883_v41  ;;  %v1836_v46 = vpop.f32.mrf.mxu2 }
 0x559   : > { %v1837_v31 = vadd.f32 %v1836_v46, %v1807_v36 }
 0x55b   : > { %v5415_v51 = vadd.f32 %v1867_v39, %v1837_v31 }
 0x55d   : > { %v1878_v35 = vadd.f32 %v5415_v51, %v5259_v18 }
 0x55e   : > { %v1869_v5 = vpop.f32.mrf.mxu3 }
 0x55f   : > { %v1886_v55 = vsel %vm717_vm0, %v1878_v35, -inf }
 0x560   : > { %v1838_v2 = vpop.f32.mrf.mxu2  ;;  %1887 = vmax.xlane.f32.xlu1 %v1886_v55 }
 0x561   : > { %v1839_v60 = vadd.f32 %v1838_v2, %v1809_v3 }
 0x563   : > { %v5420_v53 = vadd.f32 %v1869_v5, %v1839_v60 }
 0x565   : > { %v1879_v14 = vadd.f32 %v5420_v53, %v5269_v32 }
 0x567   : > { %v1889_v4 = vsel %vm717_vm0, %v1879_v14, -inf }
 0x568   : > { %1890 = vmax.xlane.f32.xlu0 %v1889_v4 }
 0x5c3   : > { %v1882_v1 = vpop.xlane.xlu0 %1881 }
 0x5c4   : > { %v1892_v10 = vsub.f32 %v1876_v20, %v1882_v1 }
 0x5c6   : > { %v1896_v6 = vmul.f32 1.442695, %v1892_v10 }
 0x5c8   : > { %4270 = vpow2.f32 %v1896_v6 }
 0x5cb   : > { %v1885_v16 = vpop.xlane.xlu2 %1884 }
 0x5cc   : > { %v1893_v58 = vsub.f32 %v1877_v23, %v1885_v16 }
 0x5ce   : > { %v4271_v26 = vpop.eup %4270  ;;  %v1898_v57 = vmul.f32 1.442695, %v1893_v58 }
 0x5cf   : > { %v1904_v19 = vsel %vm717_vm0, %v4271_v26, 0.0 }
 0x5d0   : > { %4272 = vpow2.f32 %v1898_v57  ;;  %1905 = vadd.xlane.f32.xlu2 %v1904_v19 }
 0x5d3   : > { %v1888_v27 = vpop.xlane.xlu1 %1887 }
 0x5d4   : > { %v1894_v17 = vsub.f32 %v1878_v35, %v1888_v27 }
 0x5d6   : > { %v4273_v30 = vpop.eup %4272  ;;  %v1900_v13 = vmul.f32 1.442695, %v1894_v17 }
 0x5d7   : > { %v1907_v33 = vsel %vm717_vm0, %v4273_v30, 0.0 }
 0x5d8   : > { %4274 = vpow2.f32 %v1900_v13  ;;  %1908 = vadd.xlane.f32.xlu1 %v1907_v33 }
 0x5db   : > { %v1891_v11 = vpop.xlane.xlu0 %1890 }
 0x5dc   : > { %v1895_v20 = vsub.f32 %v1879_v14, %v1891_v11 }
 0x5de   : > { %v5427_v36 = vpop.eup %4274  ;;  %v1902_v41 = vmul.f32 1.442695, %v1895_v20 }
 0x5df   : > { %v1910_v23 = vsel %vm717_vm0, %v5427_v36, 0.0 }
 0x5e0   : > { %4276 = vpow2.f32 %v1902_v41  ;;  %1911 = vadd.xlane.f32.xlu0 %v1910_v23  ;;  %v5435_v41 = vld [vmem:[#allocation2] sm:$0xff] }
 0x5e6   : > { %v5431_v39 = vpop.eup %4276 }
 0x5e7   : > { %v1913_v46 = vsel %vm717_vm0, %v5431_v39, 0.0 }
 0x5e8   : > { %1914 = vadd.xlane.f32.xlu2 %v1913_v46 }
 0x643   : > { %v1906_v31 = vpop.xlane.xlu2 %1905 }
 0x644   : > { %4278 = vrcp.f32 %v1906_v31  ;;  %v1927_v60 = vand.u32 2147483648, %v1906_v31  ;;  %v1925_v14 = vand.u32 2147483647, %v1906_v31  ;;  %vm1921_vm11 = vweird.f32 %v1906_v31 }
 0x646   : > { %v1928_v10 = vor.u32 1.1754944e-38, %v1927_v60  ;;  %vm1926_vm13 = vcmp.eq.f32.partialorder %v1925_v14, 8.507059e+37 }
 0x64a   : > { %v4279_v35 = vpop.eup %4278 }
 0x64b   : > { %v1917_v55 = vmul.f32 %v4279_v35, %v1906_v31  ;;  %v1909_v3 = vpop.xlane.xlu1 %1908  ;;  %vm1922_vm10 = vweird.f32 %v4279_v35 }
 0x64c   : > { %4280 = vrcp.f32 %v1909_v3  ;;  %vm1923_vm12 = vmor %vm1921_vm11, %vm1922_vm10  ;;  %v1941_v17 = vand.u32 2147483648, %v1909_v3  ;;  %v1939_v33 = vand.u32 2147483647, %v1909_v3  ;;  %vm1935_vm15 = vweird.f32 %v1909_v3 }
 0x64d   : > { %v1918_v2 = vsub.f32 1.0, %v1917_v55 }
 0x64e   : > { %v1942_v46 = vor.u32 1.1754944e-38, %v1941_v17  ;;  %vm1940_vm3 = vcmp.eq.f32.partialorder %v1939_v33, 8.507059e+37 }
 0x64f   : > { %v1919_v5 = vmul.f32 %v4279_v35, %v1918_v2 }
 0x651   : > { %v1920_v4 = vadd.f32 %v4279_v35, %v1919_v5 }
 0x652   : > { %v4281_v1 = vpop.eup %4280 }
 0x653   : > { %v1924_v6 = vsel %vm1923_vm12, %v4279_v35, %v1920_v4  ;;  %v1931_v16 = vmul.f32 %v4281_v1, %v1909_v3  ;;  %v1912_v58 = vpop.xlane.xlu0 %1911  ;;  %vm1936_vm14 = vweird.f32 %v4281_v1 }
 0x654   : > { %v1929_v57 = vsel %vm1926_vm13, %v1928_v10, %v1924_v6  ;;  %4282 = vrcp.f32 %v1912_v58  ;;  %vm1937_vm2 = vmor %vm1935_vm15, %vm1936_vm14  ;;  %v1953_v5 = vand.u32 2147483647, %v1912_v58  ;;  %v1955_v14 = vand.u32 2147483648, %v1912_v58  ;;  %v5438_v10 = vld [vmem:[#allocation2 + $0x8] sm:$0xff] }
 0x655   : > { %v1932_v19 = vsub.f32 1.0, %v1931_v16  ;;  %v1972_v27 = vmul.f32 %v4271_v26, %v1929_v57  ;;  %vm1949_vm5 = vweird.f32 %v1912_v58 }
 0x656   : > { %vm1954_vm10 = vcmp.eq.f32.partialorder %v1953_v5, 8.507059e+37 }
 0x657   : > { %v1933_v13 = vmul.f32 %v4281_v1, %v1932_v19  ;;  %v1976_v23 = vmul.f32 %v5435_v41, %v1972_v27  ;;  %v1956_v19 = vor.u32 1.1754944e-38, %v1955_v14 }
 0x659   : > { %v1934_v11 = vadd.f32 %v4281_v1, %v1933_v13  ;;  %v1980_v4 = vpack.c.bf16 %v1976_v23, %v1976_v23 }
 0x65a   : > { %v4283_v20 = vpop.eup %4282 }
 0x65b   : > { %v1938_v31 = vsel %vm1937_vm2, %v4281_v1, %v1934_v11  ;;  %v1945_v35 = vmul.f32 %v4283_v20, %v1912_v58  ;;  %v1915_v55 = vpop.xlane.xlu2 %1914  ;;  %vm1950_vm4 = vweird.f32 %v4283_v20  ;;  %v1984_v27 = vunpack.c.l.bf16 %v1980_v4 }
 0x65c   : > { %v1943_v2 = vsel %vm1940_vm3, %v1942_v46, %v1938_v31  ;;  %4284 = vrcp.f32 %v1915_v55  ;;  %vm1951_vm9 = vmor %vm1949_vm5, %vm1950_vm4  ;;  %v2023_v13 = vunpack.c.l.b16 %v1980_v4  ;;  %v1967_v63 = vand.u32 2147483647, %v1915_v55 }
 0x65d   : > { %v1973_v26 = vmul.f32 %v4273_v30, %v1943_v2  ;;  %v1946_v60 = vsub.f32 1.0, %v1945_v35  ;;  %vm1963_vm12 = vweird.f32 %v1915_v55 }
 0x65e   : > { %vm1968_vm14 = vcmp.eq.f32.partialorder %v1967_v63, 8.507059e+37  ;;  %v5453_v63 = vpop.f32.mrf.mxu0 }
 0x65f   : > { %v1977_v3 = vmul.f32 %v5438_v10, %v1973_v26  ;;  %v1947_v6 = vmul.f32 %v4283_v20, %v1946_v60  ;;  %v1969_v26 = vand.u32 2147483648, %v1915_v55  ;;  %v1988_v60 = vsub.f32 %v1976_v23, %v1984_v27  ;;  %5976 = vst [vmem:[#allocation41_spill] sm:$0xff] %v5453_v63 }
 0x661   : > { %v1948_v16 = vadd.f32 %v4283_v20, %v1947_v6  ;;  %v1981_v57 = vpack.c.bf16 %v1977_v3, %v1977_v3 }
 0x662   : > { %v4285_v1 = vpop.eup %4284 }
 0x663   : > { %v1952_v17 = vsel %vm1951_vm9, %v4283_v20, %v1948_v16  ;;  %v1959_v30 = vmul.f32 %v4285_v1, %v1915_v55  ;;  %v2024_v33 = vunpack.c.l.b16 %v1981_v57  ;;  %v1985_v46 = vunpack.c.l.bf16 %v1981_v57  ;;  %v5443_v20 = vld [vmem:[#allocation2 + $0x10] sm:$0xff] }
 0x664   : > { %v1957_v11 = vsel %vm1954_vm10, %v1956_v19, %v1952_v17  ;;  %vm1964_vm11 = vweird.f32 %v4285_v1  ;;  %v1970_v16 = vor.u32 1.1754944e-38, %v1969_v26  ;;  %v5448_v19 = vld [vmem:[#allocation2 + $0x18] sm:$0xff] }
 0x665   : > { %v1960_v31 = vsub.f32 1.0, %v1959_v30  ;;  %v2027_v35 = vpack.c.b16 %v2024_v33, %v2023_v13  ;;  %v1974_v2 = vmul.f32 %v5427_v36, %v1957_v11  ;;  %v1989_v6 = vsub.f32 %v1977_v3, %v1985_v46  ;;  %vm1965_vm13 = vmor %vm1963_vm12, %vm1964_vm11 }
 0x667   : > { %v1961_v58 = vmul.f32 %v4285_v1, %v1960_v31  ;;  %4000 = vmatmul.msk.bf16.vlgmr.msrb.gmra.mxu1 %vm717_vm0, %v2027_v35  ;;  %v1992_v5 = vpack.c.bf16 %v1989_v6, %v1988_v60  ;;  %v1978_v4 = vmul.f32 %v5443_v20, %v1974_v2 }
 0x669   : > { %v1962_v14 = vadd.f32 %v4285_v1, %v1961_v58  ;;  %3994 = vmatmul.msk.bf16.vlgmr.msrb.gmra.mxu0 %vm717_vm0, %v1992_v5  ;;  %v1982_v57 = vpack.c.bf16 %v1978_v4, %v1978_v4 }
 0x66b   : > { %v1966_v36 = vsel %vm1965_vm13, %v4285_v1, %v1962_v14  ;;  %v1986_v55 = vunpack.c.l.bf16 %v1982_v57  ;;  %v2025_v30 = vunpack.c.l.b16 %v1982_v57 }
 0x66c   : > { %v1971_v23 = vsel %vm1968_vm14, %v1970_v16, %v1966_v36 }
 0x66d   : > { %v1975_v3 = vmul.f32 %v5431_v39, %v1971_v23  ;;  %v1990_v46 = vsub.f32 %v1978_v4, %v1986_v55 }
 0x66f   : > { %v1979_v27 = vmul.f32 %v5448_v19, %v1975_v3 }
 0x671   : > { %v1983_v17 = vpack.c.bf16 %v1979_v27, %v1979_v27 }
 0x673   : > { %v2026_v13 = vunpack.c.l.b16 %v1983_v17  ;;  %v1987_v33 = vunpack.c.l.bf16 %v1983_v17 }
 0x675   : > { %v2028_v11 = vpack.c.b16 %v2026_v13, %v2025_v30  ;;  %v1991_v31 = vsub.f32 %v1979_v27, %v1987_v33 }
 0x677   : > { %4001 = vmatmul.msk.bf16.gmra.mxu1 %vm717_vm0, %v2028_v11  ;;  %v1993_v1 = vpack.c.bf16 %v1991_v31, %v1990_v46 }
 0x679   : > { %3995 = vmatmul.msk.bf16.gmra.mxu0 %vm717_vm0, %v1993_v1 }
 0x6e4   : > { %v2044_v39 = vpop.f32.mrf.mxu1 }
 0x6e6   : > { %v2009_v35 = vpop.f32.mrf.mxu0 }
 0x6e7   : > { %v2045_v2 = vadd.f32 %v2044_v39, %v2009_v35 }
 0x6e9   : > { %v2054_v26 = vmul.f32 %v2045_v2, %v5306_v24 }
 0x6eb   : > { %v2058_v60 = vmax.f32 %v2054_v26, 0.0 }
 0x6ec   : > { %v2046_v6 = vpop.f32.mrf.mxu1 }
 0x6ed   : > { %4286 = vrsqrt.f32 %v2058_v60  ;;  %vm2069_vm15 = vcmp.eq.f32.partialorder %v2058_v60, inf  ;;  %v2072_v26 = vand.u32 2147483648, %v2058_v60  ;;  %vm2071_vm2 = vcmp.eq.f32.partialorder %v2058_v60, 0.0 }
 0x6ee   : > { %v2011_v58 = vpop.f32.mrf.mxu0 }
 0x6ef   : > { %v2047_v5 = vadd.f32 %v2046_v6, %v2011_v58  ;;  %v2111_v6 = vstv %s4002_s19  ;;  %s3717_s19 = sshll.u32 %s3714_s15, 4  ;;  %s3718_s19 = int_to_ptr.hbm [resolvable:$true] %s3717_s19 }
 0x6f1   : > { %v2055_v14 = vmul.f32 %v2047_v5, %v5311_v50 }
 0x6f3   : > { %v4287_v4 = vpop.eup %4286  ;;  %v2059_v16 = vmax.f32 %v2055_v14, 0.0 }
 0x6f4   : > { %v2049_v36 = vpop.f32.mrf.mxu1  ;;  %v2063_v23 = vmul.f32 %v4287_v4, %v2058_v60 }
 0x6f5   : > { %4288 = vrsqrt.f32 %v2059_v16  ;;  %vm2081_vm3 = vcmp.eq.f32.partialorder %v2059_v16, inf  ;;  %vm2083_vm4 = vcmp.eq.f32.partialorder %v2059_v16, 0.0 }
 0x6f6   : > { %v2014_v3 = vpop.f32.mrf.mxu0  ;;  %v2064_v57 = vmul.f32 %v4287_v4, %v2063_v23 }
 0x6f7   : > { %v2050_v27 = vadd.f32 %v2049_v36, %v2014_v3 }
 0x6f8   : > { %v2065_v17 = vmul.f32 0.5, %v2064_v57 }
 0x6f9   : > { %v2056_v55 = vmul.f32 %v2050_v27, %v5316_v56 }
 0x6fa   : > { %v2066_v30 = vsub.f32 1.5, %v2065_v17 }
 0x6fb   : > { %v4289_v13 = vpop.eup %4288  ;;  %v2060_v33 = vmax.f32 %v2056_v55, 0.0 }
 0x6fc   : > { %v2067_v11 = vmul.f32 %v4287_v4, %v2066_v30  ;;  %v2075_v46 = vmul.f32 %v4289_v13, %v2059_v16  ;;  %v2051_v31 = vpop.f32.mrf.mxu1 }
 0x6fd   : > { %4290 = vrsqrt.f32 %v2060_v33  ;;  %vm2093_vm5 = vcmp.eq.f32.partialorder %v2060_v33, inf  ;;  %vm2095_vm9 = vcmp.eq.f32.partialorder %v2060_v33, 0.0 }
 0x6fe   : > { %v2016_v1 = vpop.f32.mrf.mxu0  ;;  %v2068_v39 = vmul.f32 %v2067_v11, %v2058_v60  ;;  %v2076_v35 = vmul.f32 %v4289_v13, %v2075_v46  ;;  %v2084_v46 = vand.u32 2147483648, %v2059_v16 }
 0x6ff   : > { %v2052_v2 = vadd.f32 %v2051_v31, %v2016_v1 }
 0x700   : > { %v2070_v58 = vsel %vm2069_vm15, %v2058_v60, %v2068_v39  ;;  %v2077_v5 = vmul.f32 0.5, %v2076_v35 }
 0x701   : > { %v2057_v14 = vmul.f32 %v2052_v2, %v5319_v47  ;;  %v2073_v36 = vsel %vm2071_vm2, %v2072_v26, %v2070_v58 }
 0x702   : > { %v2112_v23 = vmul.f32 %v2111_v6, %v2073_v36  ;;  %v2078_v3 = vsub.f32 1.5, %v2077_v5 }
 0x703   : > { %v4291_v57 = vpop.eup %4290  ;;  %v2061_v4 = vmax.f32 %v2057_v14, 0.0 }
 0x704   : > { %v2116_v27 = vmul.f32 1.442695, %v2112_v23  ;;  %v2079_v17 = vmul.f32 %v4289_v13, %v2078_v3  ;;  %v2087_v55 = vmul.f32 %v4291_v57, %v2060_v33 }
 0x705   : > { %4292 = vrsqrt.f32 %v2061_v4  ;;  %vm2105_vm10 = vcmp.eq.f32.partialorder %v2061_v4, inf  ;;  %vm2107_vm11 = vcmp.eq.f32.partialorder %v2061_v4, 0.0 }
 0x706   : > { %4294 = vpow2.f32 %v2116_v27  ;;  %v2080_v30 = vmul.f32 %v2079_v17, %v2059_v16  ;;  %v2088_v11 = vmul.f32 %v4291_v57, %v2087_v55  ;;  %v2096_v27 = vand.u32 2147483648, %v2060_v33 }
 0x708   : > { %v2082_v31 = vsel %vm2081_vm3, %v2059_v16, %v2080_v30  ;;  %v2089_v60 = vmul.f32 0.5, %v2088_v11 }
 0x709   : > { %v2085_v1 = vsel %vm2083_vm4, %v2084_v46, %v2082_v31 }
 0x70a   : > { %v2113_v39 = vmul.f32 %v2111_v6, %v2085_v1  ;;  %v2090_v35 = vsub.f32 1.5, %v2089_v60 }
 0x70b   : > { %v4293_v2 = vpop.eup %4292 }
 0x70c   : > { %v4295_v26 = vpop.eup %4294  ;;  %v2118_v58 = vmul.f32 1.442695, %v2113_v39  ;;  %v2091_v5 = vmul.f32 %v4291_v57, %v2090_v35  ;;  %v2099_v14 = vmul.f32 %v4293_v2, %v2061_v4 }
 0x70d   : > { %v2124_v36 = vmax.f32 %v4295_v26, 1e-05 }
 0x70e   : > { %4296 = vpow2.f32 %v2118_v58  ;;  %v2092_v13 = vmul.f32 %v2091_v5, %v2060_v33  ;;  %v2100_v23 = vmul.f32 %v4293_v2, %v2099_v14 }
 0x70f   : > { %v2128_v3 = vmin.f32 %v2124_v36, 100000.0 }
 0x710   : > { %v2094_v17 = vsel %vm2093_vm5, %v2060_v33, %v2092_v13  ;;  %v2101_v55 = vmul.f32 0.5, %v2100_v23  ;;  %v2108_v33 = vand.u32 2147483648, %v2061_v4 }
 0x711   : > { %v2132_v16 = vmul.f32 %v2128_v3, %v5405_v29  ;;  %v2097_v30 = vsel %vm2095_vm9, %v2096_v27, %v2094_v17 }
 0x712   : > { %v2114_v11 = vmul.f32 %v2111_v6, %v2097_v30  ;;  %v2102_v46 = vsub.f32 1.5, %v2101_v55 }
 0x713   : > { %v2136_v31 = vadd.f32 %v2132_v16, %v5239_v59 }
 0x714   : > { %v4297_v60 = vpop.eup %4296  ;;  %v2120_v57 = vmul.f32 1.442695, %v2114_v11  ;;  %v2103_v1 = vmul.f32 %v4293_v2, %v2102_v46 }
 0x715   : > { %v2140_v39 = vsel %vm717_vm0, %v2136_v31, -inf  ;;  %v2125_v35 = vmax.f32 %v4297_v60, 1e-05 }
 0x716   : > { %2141 = vmax.xlane.f32.xlu1 %v2140_v39  ;;  %4298 = vpow2.f32 %v2120_v57  ;;  %v2104_v26 = vmul.f32 %v2103_v1, %v2061_v4 }
 0x717   : > { %v2129_v58 = vmin.f32 %v2125_v35, 100000.0 }
 0x718   : > { %v2106_v5 = vsel %vm2105_vm10, %v2061_v4, %v2104_v26 }
 0x719   : > { %v2133_v29 = vmul.f32 %v2129_v58, %v5410_v52  ;;  %v2109_v14 = vsel %vm2107_vm11, %v2108_v33, %v2106_v5 }
 0x71a   : > { %v2115_v36 = vmul.f32 %v2111_v6, %v2109_v14 }
 0x71b   : > { %v2137_v13 = vadd.f32 %v2133_v29, %v5249_v7 }
 0x71c   : > { %v4299_v23 = vpop.eup %4298  ;;  %v2122_v3 = vmul.f32 1.442695, %v2115_v36 }
 0x71d   : > { %v2143_v2 = vsel %vm717_vm0, %v2137_v13, -inf  ;;  %v2126_v27 = vmax.f32 %v4299_v23, 1e-05 }
 0x71e   : > { %2144 = vmax.xlane.f32.xlu0 %v2143_v2  ;;  %4300 = vpow2.f32 %v2122_v3 }
 0x71f   : > { %v2130_v17 = vmin.f32 %v2126_v27, 100000.0 }
 0x721   : > { %v2134_v55 = vmul.f32 %v2130_v17, %v5415_v51 }
 0x723   : > { %v2138_v16 = vadd.f32 %v2134_v55, %v5259_v18 }
 0x724   : > { %v4301_v30 = vpop.eup %4300 }
 0x725   : > { %v2146_v4 = vsel %vm717_vm0, %v2138_v16, -inf  ;;  %v2127_v52 = vmax.f32 %v4301_v30, 1e-05 }
 0x726   : > { %2147 = vmax.xlane.f32.xlu2 %v2146_v4 }
 0x727   : > { %v2131_v6 = vmin.f32 %v2127_v52, 100000.0 }
 0x729   : > { %v2135_v11 = vmul.f32 %v2131_v6, %v5420_v53 }
 0x72b   : > { %v2139_v46 = vadd.f32 %v2135_v11, %v5269_v32 }
 0x72d   : > { %v2149_v60 = vsel %vm717_vm0, %v2139_v46, -inf }
 0x72e   : > { %2150 = vmax.xlane.f32.xlu1 %v2149_v60 }
 0x747   : > { %2254 = vrot.lane.b32.xlu1 %v5224_v43, %s4795_s21 }
 0x789   : > { %v2142_v57 = vpop.xlane.xlu1 %2141 }
 0x78a   : > { %v2152_v51 = vsub.f32 %v2136_v31, %v2142_v57 }
 0x78c   : > { %v2156_v1 = vmul.f32 1.442695, %v2152_v51 }
 0x78e   : > { %4302 = vpow2.f32 %v2156_v1 }
 0x791   : > { %v2145_v39 = vpop.xlane.xlu0 %2144 }
 0x792   : > { %v2153_v35 = vsub.f32 %v2137_v13, %v2145_v39 }
 0x794   : > { %v4303_v26 = vpop.eup %4302  ;;  %v2158_v58 = vmul.f32 1.442695, %v2153_v35 }
 0x795   : > { %v2164_v33 = vsel %vm717_vm0, %v4303_v26, 0.0 }
 0x796   : > { %4304 = vpow2.f32 %v2158_v58  ;;  %2165 = vadd.xlane.f32.xlu0 %v2164_v33 }
 0x799   : > { %v2148_v53 = vpop.xlane.xlu2 %2147 }
 0x79a   : > { %v2154_v5 = vsub.f32 %v2138_v16, %v2148_v53 }
 0x79c   : > { %v5474_v29 = vpop.eup %4304  ;;  %v2160_v14 = vmul.f32 1.442695, %v2154_v5 }
 0x79d   : > { %v2167_v36 = vsel %vm717_vm0, %v5474_v29, 0.0 }
 0x79e   : > { %4306 = vpow2.f32 %v2160_v14  ;;  %2168 = vadd.xlane.f32.xlu2 %v2167_v36 }
 0x7a1   : > { %v2151_v23 = vpop.xlane.xlu1 %2150 }
 0x7a2   : > { %v2155_v3 = vsub.f32 %v2139_v46, %v2151_v23 }
 0x7a4   : > { %v5478_v31 = vpop.eup %4306  ;;  %v2162_v2 = vmul.f32 1.442695, %v2155_v3 }
 0x7a5   : > { %v2170_v13 = vsel %vm717_vm0, %v5478_v31, 0.0 }
 0x7a6   : > { %2171 = vadd.xlane.f32.xlu1 %v2170_v13  ;;  %4308 = vpow2.f32 %v2162_v2 }
 0x7aa   : > { %2357 = vrot.lane.b32.xlu0 %v5139_v8, %s4796_s24 }
 0x7ac   : > { %v5496_v27 = vpop.eup %4308 }
 0x7ad   : > { %v2173_v17 = vsel %vm717_vm0, %v5496_v27, 0.0 }
 0x7b6   : > { %2256 = vrot.lane.b32.xlu2 %v5222_v42, %s4795_s21 }
 0x7b9   : > { %v2255_v36 = vpop.permute.xlu1 %2254 }
 0x7be   : > { %2421 = vrot.lane.b32.xlu2 %v5141_v12, %s4796_s24 }
 0x7bf   : > { %2419 = vrot.lane.b32.xlu1 %v5151_v28, %s4796_s24 }
 0x7c6   : > { %2390 = vrot.lane.b32.xlu2 %v5160_v38, %s4796_s24 }
 0x7c7   : > { %2392 = vrot.lane.b32.xlu1 %v5168_v48, %s4796_s24 }
 0x7ce   : > { %2353 = vrot.lane.b32.xlu2 %v5170_v49, %s4796_s24 }
 0x7d4   : > { %2174 = vadd.xlane.f32.xlu0 %v2173_v17 }
 0x7e8   : > { %2355 = vrot.lane.b32.xlu0 %v5149_v22, %s4796_s24 }
 0x7f0   : > { %2351 = vrot.lane.b32.xlu0 %v5158_v37, %s4796_s24 }
 0x809   : > { %v2166_v55 = vpop.xlane.xlu0 %2165 }
 0x80a   : > { %4310 = vrcp.f32 %v2166_v55  ;;  %v2187_v6 = vand.u32 2147483648, %v2166_v55  ;;  %v2185_v46 = vand.u32 2147483647, %v2166_v55  ;;  %vm2181_vm13 = vweird.f32 %v2166_v55 }
 0x80c   : > { %v2188_v51 = vor.u32 1.1754944e-38, %v2187_v6  ;;  %vm2186_vm15 = vcmp.eq.f32.partialorder %v2185_v46, 8.507059e+37 }
 0x810   : > { %v4311_v16 = vpop.eup %4310 }
 0x811   : > { %v2177_v30 = vmul.f32 %v4311_v16, %v2166_v55  ;;  %v2169_v4 = vpop.xlane.xlu2 %2168  ;;  %vm2182_vm12 = vweird.f32 %v4311_v16 }
 0x812   : > { %4312 = vrcp.f32 %v2169_v4  ;;  %vm2183_vm14 = vmor %vm2181_vm13, %vm2182_vm12  ;;  %v2201_v5 = vand.u32 2147483648, %v2169_v4  ;;  %v2199_v23 = vand.u32 2147483647, %v2169_v4  ;;  %vm2195_vm3 = vweird.f32 %v2169_v4 }
 0x813   : > { %v2178_v52 = vsub.f32 1.0, %v2177_v30 }
 0x814   : > { %vm2200_vm5 = vcmp.eq.f32.partialorder %v2199_v23, 8.507059e+37 }
 0x815   : > { %v2179_v11 = vmul.f32 %v4311_v16, %v2178_v52 }
 0x817   : > { %v2180_v60 = vadd.f32 %v4311_v16, %v2179_v11 }
 0x818   : > { %v4313_v57 = vpop.eup %4312 }
 0x819   : > { %v2184_v1 = vsel %vm2183_vm14, %v4311_v16, %v2180_v60  ;;  %v2191_v39 = vmul.f32 %v4313_v57, %v2169_v4  ;;  %v2257_v35 = vpop.permute.xlu2 %2256  ;;  %vm2196_vm2 = vweird.f32 %v4313_v57  ;;  %v2172_v4 = vpop.xlane.xlu1 %2171 }
 0x81a   : > { %v2189_v58 = vsel %vm2186_vm15, %v2188_v51, %v2184_v1  ;;  %2272 = vmatpush.bf16.msrb.mxu2 %v2257_v35  ;;  %2307 = vmatpush.bf16.msrb.mxu3 %v2257_v35  ;;  %vm2197_vm4 = vmor %vm2195_vm3, %vm2196_vm2  ;;  %4314 = vrcp.f32 %v2172_v4  ;;  %vm2209_vm10 = vweird.f32 %v2172_v4 }
 0x81b   : > { %v2232_v33 = vmul.f32 %v4303_v26, %v2189_v58  ;;  %v2192_v53 = vsub.f32 1.0, %v2191_v39  ;;  %v2202_v26 = vor.u32 1.1754944e-38, %v2201_v5 }
 0x81c   : > { %v2358_v14 = vpop.permute.xlu0 %2357 }
 0x81d   : > { %v2193_v13 = vmul.f32 %v4313_v57, %v2192_v53  ;;  %v2369_v3 = vsel %vm1184_vm1, %v2358_v14, 0  ;;  %v2236_v2 = vsel %vm1640_vm8, 0.0, %v2232_v33 }
 0x81e   : > { %2273 = vmatpush.bf16.msrb.mxu2 %v2255_v36  ;;  %2308 = vmatpush.bf16.msrb.mxu3 %v2255_v36  ;;  %v2240_v55 = vpack.c.bf16 %v2236_v2, %v2236_v2 }
 0x81f   : > { %v2194_v17 = vadd.f32 %v4313_v57, %v2193_v13  ;;  %2377 = vmatpush.bf16.xpose.msra.mxu1 %v2369_v3 }
 0x820   : > { %v2244_v60 = vunpack.c.l.bf16 %v2240_v55  ;;  %v2289_v51 = vunpack.c.l.b16 %v2240_v55  ;;  %v4315_v5 = vpop.eup %4314 }
 0x821   : > { %v2198_v16 = vsel %vm2197_vm4, %v4313_v57, %v2194_v17  ;;  %v2422_v30 = vpop.permute.xlu2 %2421  ;;  %v2205_v14 = vmul.f32 %v4315_v5, %v2172_v4  ;;  %vm2210_vm9 = vweird.f32 %v4315_v5  ;;  %v2213_v17 = vand.u32 2147483647, %v2172_v4 }
 0x822   : > { %2406 = vmatpush.bf16.xpose.msra.mxu2 %v2369_v3  ;;  %v2203_v52 = vsel %vm2200_vm5, %v2202_v26, %v2198_v16  ;;  %v2427_v6 = vsel %vm1184_vm1, %v2422_v30, 0  ;;  %v2248_v58 = vsub.f32 %v2236_v2, %v2244_v60  ;;  %v2215_v2 = vand.u32 2147483648, %v2172_v4  ;;  %vm2211_vm11 = vmor %vm2209_vm10, %vm2210_vm9 }
 0x823   : > { %v2233_v11 = vmul.f32 %v5474_v29, %v2203_v52  ;;  %2435 = vmatpush.bf16.xpose.msra.mxu3 %v2427_v6  ;;  %v2206_v36 = vsub.f32 1.0, %v2205_v14  ;;  %vm2214_vm12 = vcmp.eq.f32.partialorder %v2213_v17, 8.507059e+37 }
 0x824   : > { %v2216_v16 = vor.u32 1.1754944e-38, %v2215_v2 }
 0x825   : > { %v2241_v46 = vpack.c.bf16 %v2233_v11, %v2233_v11  ;;  %v2207_v13 = vmul.f32 %v4315_v5, %v2206_v36 }
 0x827   : > { %v2290_v1 = vunpack.c.l.b16 %v2241_v46  ;;  %v2245_v39 = vunpack.c.l.bf16 %v2241_v46  ;;  %v2208_v3 = vadd.f32 %v4315_v5, %v2207_v13 }
 0x829   : > { %v5509_v35 = vpack.c.b16 %v2290_v1, %v2289_v51  ;;  %v2249_v33 = vsub.f32 %v2233_v11, %v2245_v39  ;;  %v2212_v26 = vsel %vm2211_vm11, %v4315_v5, %v2208_v3  ;;  %v5977_v3 = vmov 1.0|1.0  }
 0x82a   : > { %v2217_v52 = vsel %vm2214_vm12, %v2216_v16, %v2212_v26 }
 0x82b   : > { %4005 = vmatmul.msk.bf16.vlgmr.msrb.gmra.mxu3 %vm717_vm0, %v5509_v35  ;;  %v2252_v57 = vpack.c.bf16 %v2249_v33, %v2248_v58  ;;  %v2234_v51 = vmul.f32 %v5478_v31, %v2217_v52 }
 0x82d   : > { %4003 = vmatmul.msk.bf16.vlgmr.msrb.gmra.mxu2 %vm717_vm0, %v2252_v57  ;;  %v2242_v4 = vpack.c.bf16 %v2234_v51, %v2234_v51 }
 0x82f   : > { %v2246_v14 = vunpack.c.l.bf16 %v2242_v4  ;;  %v2291_v36 = vunpack.c.l.b16 %v2242_v4 }
 0x831   : > { %v2420_v53 = vpop.permute.xlu1 %2419  ;;  %v2250_v2 = vsub.f32 %v2234_v51, %v2246_v14 }
 0x832   : > { %v2424_v29 = vsel %vm1184_vm1, %v2420_v53, 0 }
 0x833   : > { %2436 = vmatpush.bf16.xpose.msra.mxu3 %v2424_v29 }
 0x847   : > { %v2175_v23 = vpop.xlane.xlu0 %2174 }
 0x848   : > { %4316 = vrcp.f32 %v2175_v23  ;;  %v2229_v11 = vand.u32 2147483648, %v2175_v23  ;;  %v2227_v60 = vand.u32 2147483647, %v2175_v23  ;;  %vm2223_vm14 = vweird.f32 %v2175_v23 }
 0x84a   : > { %v2230_v39 = vor.u32 1.1754944e-38, %v2229_v11  ;;  %vm2228_vm2 = vcmp.eq.f32.partialorder %v2227_v60, 8.507059e+37 }
 0x84e   : > { %v4317_v55 = vpop.eup %4316 }
 0x84f   : > { %v2219_v30 = vmul.f32 %v4317_v55, %v2175_v23  ;;  %vm2224_vm13 = vweird.f32 %v4317_v55 }
 0x850   : > { %vm2225_vm15 = vmor %vm2223_vm14, %vm2224_vm13 }
 0x851   : > { %v2220_v6 = vsub.f32 1.0, %v2219_v30  ;;  %v2393_v30 = vpop.permute.xlu1 %2392 }
 0x853   : > { %v2221_v46 = vmul.f32 %v4317_v55, %v2220_v6 }
 0x855   : > { %v2222_v1 = vadd.f32 %v4317_v55, %v2221_v46 }
 0x857   : > { %v2226_v58 = vsel %vm2225_vm15, %v4317_v55, %v2222_v1  ;;  %v2391_v55 = vpop.permute.xlu2 %2390 }
 0x858   : > { %v2231_v33 = vsel %vm2228_vm2, %v2230_v39, %v2226_v58 }
 0x859   : > { %v2235_v57 = vmul.f32 %v5496_v27, %v2231_v33 }
 0x85a   : > { %v2356_v53 = vpop.permute.xlu0 %2355 }
 0x85b   : > { %v2366_v29 = vsel %vm1184_vm1, %v2356_v53, 0  ;;  %v2243_v5 = vpack.c.bf16 %v2235_v57, %v2235_v57 }
 0x85c   : > { %2378 = vmatpush.bf16.xpose.msra.mxu1 %v2366_v29  ;;  %2407 = vmatpush.bf16.xpose.msra.mxu2 %v2366_v29 }
 0x85d   : > { %v2292_v13 = vunpack.c.l.b16 %v2243_v5  ;;  %v2247_v31 = vunpack.c.l.bf16 %v2243_v5 }
 0x85f   : > { %v5521_v23 = vpack.c.b16 %v2292_v13, %v2291_v36  ;;  %v2251_v17 = vsub.f32 %v2235_v57, %v2247_v31  ;;  %v2354_v16 = vpop.permute.xlu2 %2353 }
 0x861   : > { %4006 = vmatmul.msk.bf16.gmra.mxu3 %vm717_vm0, %v5521_v23  ;;  %v2253_v27 = vpack.c.bf16 %v2251_v17, %v2250_v2 }
 0x862   : > { %v2352_v26 = vpop.permute.xlu0 %2351 }
 0x863   : > { %4004 = vmatmul.msk.bf16.gmra.mxu2 %vm717_vm0, %v2253_v27  ;;  %4009 = vmatmul.msk.bf16.vlgmr.msra.gmra.mxu1 %vm1184_vm1, %v2352_v26 }
 0x864   : > { %4022 = vmatpush.bf16.msk.msrb.mxu1 %vm5199_vm6, %v5977_v3 }
 0x868   : > { %4024 = vmatpush.bf16.msk.msrb.mxu1 %vm5209_vm7, %v5977_v3 }
 0x871   : > { %4013 = vmatmul.msk.bf16.vlgmr.msra.gmra.mxu3 %vm1184_vm1, %v2391_v55 }
 0x873   : > { %4010 = vmatmul.msk.bf16.gmra.mxu1 %vm1184_vm1, %v2354_v16  ;;  %4011 = vmatmul.msk.bf16.vlgmr.msra.gmra.mxu2 %vm1184_vm1, %v2391_v55 }
 0x881   : > { %4014 = vmatmul.msk.bf16.gmra.mxu3 %vm1184_vm1, %v2393_v30 }
 0x883   : > { %4012 = vmatmul.msk.bf16.gmra.mxu2 %vm1184_vm1, %v2393_v30 }
 0x8ae   : > { %v2310_v52 = vpop.f32.mrf.mxu3 }
 0x8b0   : > { %v2275_v6 = vpop.f32.mrf.mxu2 }
 0x8b1   : > { %v5535_v11 = vadd.f32 %v2310_v52, %v2275_v6 }
 0x8b6   : > { %v2312_v46 = vpop.f32.mrf.mxu3 }
 0x8b8   : > { %v2277_v60 = vpop.f32.mrf.mxu2 }
 0x8b9   : > { %v5537_v51 = vadd.f32 %v2312_v46, %v2277_v60 }
 0x8e0   : > { %v2380_v53 = vpop.f32.mrf.mxu1 }
 0x8e4   : > { %v2315_v1 = vpop.f32.mrf.mxu3 }
 0x8e6   : > { %v2280_v39 = vpop.f32.mrf.mxu2 }
 0x8e7   : > { %v5539_v58 = vadd.f32 %v2315_v1, %v2280_v39 }
 0x8e8   : > { %v2382_v13 = vpop.f32.mrf.mxu1 }
 0x8ec   : > { %v2317_v4 = vpop.f32.mrf.mxu3 }
 0x8ee   : > { %v2282_v33 = vpop.f32.mrf.mxu2 }
 0x8ef   : > { %v5541_v57 = vadd.f32 %v2317_v4, %v2282_v33 }
 0x8f0   : > { %v2385_v30 = vpop.f32.mrf.mxu1 }
 0x8f4   : > { %v2438_v29 = vpop.f32.mrf.mxu3 }
 0x8f6   : > { %v2409_v5 = vpop.f32.mrf.mxu2 }
 0x8f7   : > { %v2410_v14 = vadd.f32 %v2409_v5, %v2380_v53 }
 0x8f8   : > { %v2387_v33 = vpop.f32.mrf.mxu1 }
 0x8f9   : > { %v5543_v36 = vadd.f32 %v2438_v29, %v2410_v14 }
 0x8fb   : > { %v2452_v31 = vadd.f32 %v5543_v36, %v5239_v59 }
 0x8fc   : > { %v2440_v2 = vpop.f32.mrf.mxu3 }
 0x8fd   : > { %v2456_v17 = vsel %vm717_vm0, %v2452_v31, -inf }
 0x8fe   : > { %v2411_v27 = vpop.f32.mrf.mxu2  ;;  %2457 = vmax.xlane.f32.xlu0 %v2456_v17 }
 0x8ff   : > { %v2412_v26 = vadd.f32 %v2411_v27, %v2382_v13 }
 0x901   : > { %v5548_v55 = vadd.f32 %v2440_v2, %v2412_v26 }
 0x903   : > { %v2453_v16 = vadd.f32 %v5548_v55, %v5249_v7 }
 0x904   : > { %v2443_v6 = vpop.f32.mrf.mxu3 }
 0x905   : > { %v2459_v52 = vsel %vm717_vm0, %v2453_v16, -inf }
 0x906   : > { %2460 = vmax.xlane.f32.xlu1 %v2459_v52  ;;  %v2414_v46 = vpop.f32.mrf.mxu2 }
 0x907   : > { %v2415_v60 = vadd.f32 %v2414_v46, %v2385_v30 }
 0x909   : > { %v5553_v1 = vadd.f32 %v2443_v6, %v2415_v60 }
 0x90b   : > { %v2454_v39 = vadd.f32 %v5553_v1, %v5259_v18 }
 0x90c   : > { %v2445_v5 = vpop.f32.mrf.mxu3 }
 0x90d   : > { %v2462_v4 = vsel %vm717_vm0, %v2454_v39, -inf }
 0x90e   : > { %v2416_v53 = vpop.f32.mrf.mxu2  ;;  %2463 = vmax.xlane.f32.xlu2 %v2462_v4 }
 0x90f   : > { %v2417_v29 = vadd.f32 %v2416_v53, %v2387_v33 }
 0x911   : > { %v5558_v14 = vadd.f32 %v2445_v5, %v2417_v29 }
 0x913   : > { %v2455_v13 = vadd.f32 %v5558_v14, %v5269_v32 }
 0x915   : > { %v2465_v2 = vsel %vm717_vm0, %v2455_v13, -inf }
 0x916   : > { %2466 = vmax.xlane.f32.xlu0 %v2465_v2 }
 0x91f   : > { %2324 = vrot.lane.b32.xlu1 %v5226_v44, %s4795_s21 }
 0x926   : > { %2322 = vrot.lane.b32.xlu2 %v5231_v45, %s4795_s21  ;;  %s3715_s21 = sshll.u32 %s664_s23, 4  ;;  %s3716_s21 = int_to_ptr.vmem [resolvable:$true] %s3715_s21 }
 0x971   : > { %v2458_v17 = vpop.xlane.xlu0 %2457 }
 0x972   : > { %v2468_v27 = vsub.f32 %v2452_v31, %v2458_v17 }
 0x974   : > { %v2472_v26 = vmul.f32 1.442695, %v2468_v27 }
 0x976   : > { %4318 = vpow2.f32 %v2472_v26 }
 0x979   : > { %v2461_v30 = vpop.xlane.xlu1 %2460 }
 0x97a   : > { %v2469_v52 = vsub.f32 %v2453_v16, %v2461_v30 }
 0x97c   : > { %v4319_v6 = vpop.eup %4318  ;;  %v2474_v46 = vmul.f32 1.442695, %v2469_v52 }
 0x97d   : > { %v2480_v60 = vsel %vm717_vm0, %v4319_v6, 0.0 }
 0x97e   : > { %4320 = vpow2.f32 %v2474_v46  ;;  %2481 = vadd.xlane.f32.xlu0 %v2480_v60 }
 0x981   : > { %v2464_v4 = vpop.xlane.xlu2 %2463 }
 0x982   : > { %v2470_v33 = vsub.f32 %v2454_v39, %v2464_v4 }
 0x984   : > { %v5568_v53 = vpop.eup %4320  ;;  %v2476_v29 = vmul.f32 1.442695, %v2470_v33 }
 0x985   : > { %v2483_v5 = vsel %vm717_vm0, %v5568_v53, 0.0 }
 0x986   : > { %4322 = vpow2.f32 %v2476_v29  ;;  %2484 = vadd.xlane.f32.xlu0 %v2483_v5 }
 0x989   : > { %v2467_v31 = vpop.xlane.xlu0 %2466  ;;  %v2323_v30 = vpop.permute.xlu2 %2322 }
 0x98a   : > { %v2471_v2 = vsub.f32 %v2455_v13, %v2467_v31 }
 0x98c   : > { %v5572_v17 = vpop.eup %4322  ;;  %v2478_v16 = vmul.f32 1.442695, %v2471_v2 }
 0x98d   : > { %v2486_v27 = vsel %vm717_vm0, %v5572_v17, 0.0 }
 0x98e   : > { %4324 = vpow2.f32 %v2478_v16  ;;  %2487 = vadd.xlane.f32.xlu0 %v2486_v27 }
 0x991   : > { %v2325_v26 = vpop.permute.xlu1 %2324 }
 0x992   : > { %2334 = vmatpush.bf16.msra.mxu0 %v2325_v26 }
 0x994   : > { %v5576_v39 = vpop.eup %4324 }
 0x995   : > { %v2489_v52 = vsel %vm717_vm0, %v5576_v39, 0.0 }
 0x996   : > { %2490 = vadd.xlane.f32.xlu1 %v2489_v52  ;;  %2335 = vmatpush.bf16.msra.mxu0 %v2323_v30 }
 0x999   : > { %4007 = vmatmul.msk.bf16.vlgmr.msra.gmra.mxu0 %vm717_vm0, %v5509_v35 }
 0x99a   : > { %4016 = vmatpush.bf16.msk.msrb.mxu0 %vm5199_vm6, %v5977_v3 }
 0x99e   : > { %4018 = vmatpush.bf16.msk.msrb.mxu0 %vm5209_vm7, %v5977_v3 }
 0x9a9   : > { %4008 = vmatmul.msk.bf16.gmra.mxu0 %vm717_vm0, %v5521_v23 }
 0x9af   : > { %2830 = vrot.lane.b32.xlu1 %v5224_v43, %s4796_s24 }
 0x9f1   : > { %v2482_v13 = vpop.xlane.xlu0 %2481 }
 0x9f2   : > { %4326 = vrcp.f32 %v2482_v13  ;;  %v2503_v29 = vand.u32 2147483648, %v2482_v13  ;;  %v2501_v35 = vand.u32 2147483647, %v2482_v13  ;;  %vm2497_vm4 = vweird.f32 %v2482_v13 }
 0x9f4   : > { %v2504_v16 = vor.u32 1.1754944e-38, %v2503_v29  ;;  %vm2502_vm9 = vcmp.eq.f32.partialorder %v2501_v35, 8.507059e+37 }
 0x9f8   : > { %v4327_v46 = vpop.eup %4326 }
 0x9f9   : > { %v2493_v60 = vmul.f32 %v4327_v46, %v2482_v13  ;;  %v2485_v4 = vpop.xlane.xlu0 %2484  ;;  %vm2498_vm3 = vweird.f32 %v4327_v46 }
 0x9fa   : > { %4328 = vrcp.f32 %v2485_v4  ;;  %vm2499_vm5 = vmor %vm2497_vm4, %vm2498_vm3  ;;  %v2517_v25 = vand.u32 2147483648, %v2485_v4  ;;  %vm2511_vm11 = vweird.f32 %v2485_v4 }
 0x9fb   : > { %v2494_v33 = vsub.f32 1.0, %v2493_v60  ;;  %v2515_v60 = vand.u32 2147483647, %v2485_v4 }
 0x9fd   : > { %v2495_v5 = vmul.f32 %v4327_v46, %v2494_v33  ;;  %vm2516_vm13 = vcmp.eq.f32.partialorder %v2515_v60, 8.507059e+37 }
 0x9ff   : > { %v2496_v31 = vadd.f32 %v4327_v46, %v2495_v5  ;;  %v2518_v5 = vor.u32 1.1754944e-38, %v2517_v25 }
 0xa00   : > { %v4329_v2 = vpop.eup %4328 }
 0xa01   : > { %v2500_v23 = vsel %vm2499_vm5, %v4327_v46, %v2496_v31  ;;  %v2507_v27 = vmul.f32 %v4329_v2, %v2485_v4  ;;  %v2488_v26 = vpop.xlane.xlu0 %2487  ;;  %vm2512_vm10 = vweird.f32 %v4329_v2 }
 0xa02   : > { %v2505_v30 = vsel %vm2502_vm9, %v2504_v16, %v2500_v23  ;;  %4330 = vrcp.f32 %v2488_v26  ;;  %vm2513_vm12 = vmor %vm2511_vm11, %vm2512_vm10  ;;  %vm2525_vm15 = vweird.f32 %v2488_v26 }
 0xa03   : > { %v2548_v52 = vmul.f32 %v4319_v6, %v2505_v30  ;;  %v2508_v63 = vsub.f32 1.0, %v2507_v27  ;;  %v2531_v27 = vand.u32 2147483648, %v2488_v26 }
 0xa05   : > { %v2509_v21 = vmul.f32 %v4329_v2, %v2508_v63  ;;  %v2552_v33 = vmul.f32 %v5435_v41, %v2548_v52  ;;  %v2529_v63 = vand.u32 2147483647, %v2488_v26 }
 0xa07   : > { %v2510_v9 = vadd.f32 %v4329_v2, %v2509_v21  ;;  %v2556_v31 = vpack.c.bf16 %v2552_v33, %v2552_v33  ;;  %vm2530_vm3 = vcmp.eq.f32.partialorder %v2529_v63, 8.507059e+37 }
 0xa08   : > { %v4331_v13 = vpop.eup %4330 }
 0xa09   : > { %v2514_v29 = vsel %vm2513_vm12, %v4329_v2, %v2510_v9  ;;  %v2521_v46 = vmul.f32 %v4331_v13, %v2488_v26  ;;  %v2491_v35 = vpop.xlane.xlu1 %2490  ;;  %vm2526_vm14 = vweird.f32 %v4331_v13  ;;  %v2560_v21 = vunpack.c.l.bf16 %v2556_v31 }
 0xa0a   : > { %v2519_v16 = vsel %vm2516_vm13, %v2518_v5, %v2514_v29  ;;  %4332 = vrcp.f32 %v2491_v35  ;;  %v2599_v9 = vunpack.c.l.b16 %v2556_v31  ;;  %vm2527_vm2 = vmor %vm2525_vm15, %vm2526_vm14  ;;  %v2532_v2 = vor.u32 1.1754944e-38, %v2531_v27 }
 0xa0b   : > { %v2549_v6 = vmul.f32 %v5568_v53, %v2519_v16  ;;  %v2522_v23 = vsub.f32 1.0, %v2521_v46  ;;  %v2564_v46 = vsub.f32 %v2552_v33, %v2560_v21  ;;  %v2545_v61 = vand.u32 2147483648, %v2491_v35 }
 0xa0c   : > { %v2543_v26 = vand.u32 2147483647, %v2491_v35  ;;  %vm2539_vm5 = vweird.f32 %v2491_v35 }
 0xa0d   : > { %v2553_v30 = vmul.f32 %v5438_v10, %v2549_v6  ;;  %v2523_v41 = vmul.f32 %v4331_v13, %v2522_v23 }
 0xa0e   : > { %vm2544_vm10 = vcmp.eq.f32.partialorder %v2543_v26, 8.507059e+37 }
 0xa0f   : > { %v2557_v4 = vpack.c.bf16 %v2553_v30, %v2553_v30  ;;  %v2524_v52 = vadd.f32 %v4331_v13, %v2523_v41 }
 0xa10   : > { %v4333_v25 = vpop.eup %4332 }
 0xa11   : > { %v2561_v60 = vunpack.c.l.bf16 %v2557_v4  ;;  %v2600_v5 = vunpack.c.l.b16 %v2557_v4  ;;  %v2528_v29 = vsel %vm2527_vm2, %v4331_v13, %v2524_v52  ;;  %v2535_v53 = vmul.f32 %v4333_v25, %v2491_v35 }
 0xa12   : > { %v2533_v16 = vsel %vm2530_vm3, %v2532_v2, %v2528_v29  ;;  %vm2540_vm4 = vweird.f32 %v4333_v25 }
 0xa13   : > { %v2565_v34 = vsub.f32 %v2553_v30, %v2561_v60  ;;  %v2550_v10 = vmul.f32 %v5572_v17, %v2533_v16  ;;  %v2536_v6 = vsub.f32 1.0, %v2535_v53  ;;  %v2603_v23 = vpack.c.b16 %v2600_v5, %v2599_v9  ;;  %vm2541_vm9 = vmor %vm2539_vm5, %vm2540_vm4 }
 0xa14   : > { %v2546_v17 = vor.u32 1.1754944e-38, %v2545_v61 }
 0xa15   : > { %v2537_v15 = vmul.f32 %v4333_v25, %v2536_v6  ;;  %4025 = vmatmul.msk.bf16.vlgmr.msrb.gmra.mxu1 %vm717_vm0, %v2603_v23  ;;  %v2568_v31 = vpack.c.bf16 %v2565_v34, %v2564_v46  ;;  %v2554_v33 = vmul.f32 %v5443_v20, %v2550_v10 }
 0xa16   : > { %v2337_v63 = vpop.f32.mrf.mxu0 }
 0xa17   : > { %v2538_v27 = vadd.f32 %v4333_v25, %v2537_v15  ;;  %v5598_v13 = vadd.f32 %v2337_v63, %v5535_v11  ;;  %4019 = vmatmul.msk.bf16.vlgmr.msrb.gmra.mxu0 %vm717_vm0, %v2568_v31  ;;  %v2558_v4 = vpack.c.bf16 %v2554_v33, %v2554_v33 }
 0xa19   : > { %v2542_v30 = vsel %vm2541_vm9, %v4333_v25, %v2538_v27  ;;  %v2562_v35 = vunpack.c.l.bf16 %v2558_v4  ;;  %v2601_v9 = vunpack.c.l.b16 %v2558_v4 }
 0xa1a   : > { %v2547_v41 = vsel %vm2544_vm10, %v2546_v17, %v2542_v30 }
 0xa1b   : > { %v2551_v21 = vmul.f32 %v5576_v39, %v2547_v41  ;;  %v2566_v5 = vsub.f32 %v2554_v33, %v2562_v35 }
 0xa1d   : > { %v2555_v34 = vmul.f32 %v5448_v19, %v2551_v21 }
 0xa1e   : > { %v2339_v52 = vpop.f32.mrf.mxu0 }
 0xa1f   : > { %v5605_v15 = vadd.f32 %v2339_v52, %v5537_v51  ;;  %v2559_v11 = vpack.c.bf16 %v2555_v34, %v2555_v34 }
 0xa21   : > { %v2602_v2 = vunpack.c.l.b16 %v2559_v11  ;;  %v2563_v60 = vunpack.c.l.bf16 %v2559_v11 }
 0xa23   : > { %v2604_v20 = vpack.c.b16 %v2602_v2, %v2601_v9  ;;  %v2567_v61 = vsub.f32 %v2555_v34, %v2563_v60 }
 0xa25   : > { %4026 = vmatmul.msk.bf16.gmra.mxu1 %vm717_vm0, %v2604_v20  ;;  %v2569_v25 = vpack.c.bf16 %v2567_v61, %v2566_v5 }
 0xa26   : > { %v2342_v29 = vpop.f32.mrf.mxu0 }
 0xa27   : > { %v5609_v39 = vadd.f32 %v2342_v29, %v5539_v58  ;;  %4020 = vmatmul.msk.bf16.gmra.mxu0 %vm717_vm0, %v2569_v25  ;;  %v2687_v29 = vstv %s4027_s16  ;;  %s4691_s16 = sshra.s32 %s3718_s19, 4  ;;  %s4692_s16 = int_to_ptr.hbm [resolvable:$true] %s4691_s16 }
 0xa28   : > { %p4698_p10 = scmp.lt.s32.totalorder %s4692_s16, %s5987_s12 }
 0xa2e   : > { %v5612_v19 = vpop.f32.mrf.mxu0 }
 0xa92   : > { %v2620_v51 = vpop.f32.mrf.mxu1 }
 0xa94   : > { %v2585_v53 = vpop.f32.mrf.mxu0 }
 0xa95   : > { %v2621_v46 = vadd.f32 %v2620_v51, %v2585_v53 }
 0xa97   : > { %v2630_v16 = vmul.f32 %v2621_v46, %v5306_v24 }
 0xa99   : > { %v2634_v10 = vmax.f32 %v2630_v16, 0.0 }
 0xa9a   : > { %v2622_v6 = vpop.f32.mrf.mxu1 }
 0xa9b   : > { %4334 = vrsqrt.f32 %v2634_v10  ;;  %vm2645_vm11 = vcmp.eq.f32.partialorder %v2634_v10, inf  ;;  %v2648_v25 = vand.u32 2147483648, %v2634_v10  ;;  %vm2647_vm12 = vcmp.eq.f32.partialorder %v2634_v10, 0.0 }
 0xa9c   : > { %v2587_v23 = vpop.f32.mrf.mxu0 }
 0xa9d   : > { %v2623_v26 = vadd.f32 %v2622_v6, %v2587_v23 }
 0xa9f   : > { %v2631_v31 = vmul.f32 %v2623_v26, %v5311_v50 }
 0xaa1   : > { %v4335_v63 = vpop.eup %4334  ;;  %v2635_v27 = vmax.f32 %v2631_v31, 0.0 }
 0xaa2   : > { %v2625_v58 = vpop.f32.mrf.mxu1  ;;  %v2639_v33 = vmul.f32 %v4335_v63, %v2634_v10 }
 0xaa3   : > { %4336 = vrsqrt.f32 %v2635_v27  ;;  %vm2657_vm13 = vcmp.eq.f32.partialorder %v2635_v27, inf  ;;  %vm2659_vm14 = vcmp.eq.f32.partialorder %v2635_v27, 0.0 }
 0xaa4   : > { %v2590_v17 = vpop.f32.mrf.mxu0  ;;  %v2640_v30 = vmul.f32 %v4335_v63, %v2639_v33 }
 0xaa5   : > { %v2626_v41 = vadd.f32 %v2625_v58, %v2590_v17 }
 0xaa6   : > { %v2641_v21 = vmul.f32 0.5, %v2640_v30 }
 0xaa7   : > { %v2632_v4 = vmul.f32 %v2626_v41, %v5316_v56  ;;  %v2660_v41 = vand.u32 2147483648, %v2635_v27 }
 0xaa8   : > { %v2642_v34 = vsub.f32 1.5, %v2641_v21 }
 0xaa9   : > { %v4337_v52 = vpop.eup %4336  ;;  %v2636_v11 = vmax.f32 %v2632_v4, 0.0 }
 0xaaa   : > { %v2643_v35 = vmul.f32 %v4335_v63, %v2642_v34  ;;  %v2651_v9 = vmul.f32 %v4337_v52, %v2635_v27  ;;  %v2627_v2 = vpop.f32.mrf.mxu1 }
 0xaab   : > { %4338 = vrsqrt.f32 %v2636_v11  ;;  %vm2669_vm15 = vcmp.eq.f32.partialorder %v2636_v11, inf  ;;  %vm2671_vm2 = vcmp.eq.f32.partialorder %v2636_v11, 0.0 }
 0xaac   : > { %v2592_v60 = vpop.f32.mrf.mxu0  ;;  %v2644_v20 = vmul.f32 %v2643_v35, %v2634_v10  ;;  %v2652_v5 = vmul.f32 %v4337_v52, %v2651_v9 }
 0xaad   : > { %v2628_v61 = vadd.f32 %v2627_v2, %v2592_v60 }
 0xaae   : > { %v2646_v51 = vsel %vm2645_vm11, %v2634_v10, %v2644_v20  ;;  %v2653_v53 = vmul.f32 0.5, %v2652_v5 }
 0xaaf   : > { %v2633_v46 = vmul.f32 %v2628_v61, %v5319_v47  ;;  %v2649_v16 = vsel %vm2647_vm12, %v2648_v25, %v2646_v51 }
 0xab0   : > { %v2688_v6 = vmul.f32 %v2687_v29, %v2649_v16  ;;  %v2654_v23 = vsub.f32 1.5, %v2653_v53  ;;  %v2672_v53 = vand.u32 2147483648, %v2636_v11 }
 0xab1   : > { %v4339_v26 = vpop.eup %4338  ;;  %v2637_v31 = vmax.f32 %v2633_v46, 0.0 }
 0xab2   : > { %v2692_v63 = vmul.f32 1.442695, %v2688_v6  ;;  %v2655_v58 = vmul.f32 %v4337_v52, %v2654_v23  ;;  %v2663_v33 = vmul.f32 %v4339_v26, %v2636_v11 }
 0xab3   : > { %4340 = vrsqrt.f32 %v2637_v31  ;;  %vm2681_vm3 = vcmp.eq.f32.partialorder %v2637_v31, inf  ;;  %vm2683_vm4 = vcmp.eq.f32.partialorder %v2637_v31, 0.0 }
 0xab4   : > { %4342 = vpow2.f32 %v2692_v63  ;;  %v2656_v17 = vmul.f32 %v2655_v58, %v2635_v27  ;;  %v2664_v30 = vmul.f32 %v4339_v26, %v2663_v33 }
 0xab6   : > { %v2658_v21 = vsel %vm2657_vm13, %v2635_v27, %v2656_v17  ;;  %v2665_v10 = vmul.f32 0.5, %v2664_v30 }
 0xab7   : > { %v2661_v4 = vsel %vm2659_vm14, %v2660_v41, %v2658_v21 }
 0xab8   : > { %v2689_v34 = vmul.f32 %v2687_v29, %v2661_v4  ;;  %v2666_v35 = vsub.f32 1.5, %v2665_v10 }
 0xab9   : > { %v4341_v9 = vpop.eup %4340 }
 0xaba   : > { %v4343_v2 = vpop.eup %4342  ;;  %v2694_v60 = vmul.f32 1.442695, %v2689_v34  ;;  %v2667_v20 = vmul.f32 %v4339_v26, %v2666_v35  ;;  %v2675_v5 = vmul.f32 %v4341_v9, %v2637_v31 }
 0xabb   : > { %v2700_v61 = vmax.f32 %v4343_v2, 1e-05 }
 0xabc   : > { %4344 = vpow2.f32 %v2694_v60  ;;  %v2668_v52 = vmul.f32 %v2667_v20, %v2636_v11  ;;  %v2676_v25 = vmul.f32 %v4341_v9, %v2675_v5 }
 0xabd   : > { %v2704_v51 = vmin.f32 %v2700_v61, 100000.0 }
 0xabe   : > { %v2670_v46 = vsel %vm2669_vm15, %v2636_v11, %v2668_v52  ;;  %v2677_v16 = vmul.f32 0.5, %v2676_v25  ;;  %v2684_v11 = vand.u32 2147483648, %v2637_v31 }
 0xabf   : > { %v2708_v27 = vmul.f32 %v2704_v51, %v5543_v36  ;;  %v2673_v6 = vsel %vm2671_vm2, %v2672_v53, %v2670_v46 }
 0xac0   : > { %v2690_v23 = vmul.f32 %v2687_v29, %v2673_v6  ;;  %v2678_v63 = vsub.f32 1.5, %v2677_v16 }
 0xac1   : > { %v2712_v58 = vadd.f32 %v2708_v27, %v5239_v59 }
 0xac2   : > { %v4345_v33 = vpop.eup %4344  ;;  %v2696_v26 = vmul.f32 1.442695, %v2690_v23  ;;  %v2679_v17 = vmul.f32 %v4341_v9, %v2678_v63 }
 0xac3   : > { %v2716_v30 = vsel %vm717_vm0, %v2712_v58, -inf  ;;  %v2701_v41 = vmax.f32 %v4345_v33, 1e-05 }
 0xac4   : > { %2717 = vmax.xlane.f32.xlu2 %v2716_v30  ;;  %4346 = vpow2.f32 %v2696_v26  ;;  %v2680_v21 = vmul.f32 %v2679_v17, %v2637_v31 }
 0xac5   : > { %v2705_v10 = vmin.f32 %v2701_v41, 100000.0 }
 0xac6   : > { %v2682_v4 = vsel %vm2681_vm3, %v2637_v31, %v2680_v21 }
 0xac7   : > { %v2709_v36 = vmul.f32 %v2705_v10, %v5548_v55  ;;  %v2685_v34 = vsel %vm2683_vm4, %v2684_v11, %v2682_v4 }
 0xac8   : > { %v2691_v35 = vmul.f32 %v2687_v29, %v2685_v34 }
 0xac9   : > { %v2713_v2 = vadd.f32 %v2709_v36, %v5249_v7 }
 0xaca   : > { %v4347_v60 = vpop.eup %4346  ;;  %v2698_v20 = vmul.f32 1.442695, %v2691_v35 }
 0xacb   : > { %v2719_v9 = vsel %vm717_vm0, %v2713_v2, -inf  ;;  %v2702_v5 = vmax.f32 %v4347_v60, 1e-05  ;;  %v5661_v60 = vpop.permute.xlu1 %2830 }
 0xacc   : > { %2720 = vmax.xlane.f32.xlu0 %v2719_v9  ;;  %4348 = vpow2.f32 %v2698_v20 }
 0xacd   : > { %v2706_v61 = vmin.f32 %v2702_v5, 100000.0 }
 0xacf   : > { %v2710_v52 = vmul.f32 %v2706_v61, %v5553_v1 }
 0xad1   : > { %v2714_v25 = vadd.f32 %v2710_v52, %v5259_v18 }
 0xad2   : > { %v4349_v51 = vpop.eup %4348 }
 0xad3   : > { %v2722_v31 = vsel %vm717_vm0, %v2714_v25, -inf  ;;  %v2703_v55 = vmax.f32 %v4349_v51, 1e-05 }
 0xad4   : > { %2723 = vmax.xlane.f32.xlu0 %v2722_v31 }
 0xad5   : > { %v2707_v29 = vmin.f32 %v2703_v55, 100000.0 }
 0xad7   : > { %v2711_v53 = vmul.f32 %v2707_v29, %v5558_v14 }
 0xad9   : > { %v2715_v46 = vadd.f32 %v2711_v53, %v5269_v32 }
 0xadb   : > { %v2725_v16 = vsel %vm717_vm0, %v2715_v46, -inf }
 0xadc   : > { %2726 = vmax.xlane.f32.xlu0 %v2725_v16 }
 0xb37   : > { %v2718_v27 = vpop.xlane.xlu2 %2717 }
 0xb38   : > { %v2728_v6 = vsub.f32 %v2712_v58, %v2718_v27 }
 0xb3a   : > { %v2732_v23 = vmul.f32 1.442695, %v2728_v6 }
 0xb3c   : > { %4350 = vpow2.f32 %v2732_v23 }
 0xb3f   : > { %v2721_v1 = vpop.xlane.xlu0 %2720 }
 0xb40   : > { %v2729_v63 = vsub.f32 %v2713_v2, %v2721_v1 }
 0xb42   : > { %v4351_v33 = vpop.eup %4350  ;;  %v2734_v26 = vmul.f32 1.442695, %v2729_v63 }
 0xb43   : > { %v2740_v17 = vsel %vm717_vm0, %v4351_v33, 0.0 }
 0xb44   : > { %4352 = vpow2.f32 %v2734_v26  ;;  %2741 = vadd.xlane.f32.xlu0 %v2740_v17 }
 0xb47   : > { %v2724_v30 = vpop.xlane.xlu0 %2723 }
 0xb48   : > { %v2730_v41 = vsub.f32 %v2714_v25, %v2724_v30 }
 0xb4a   : > { %v5631_v14 = vpop.eup %4352  ;;  %v2736_v21 = vmul.f32 1.442695, %v2730_v41 }
 0xb4b   : > { %v2743_v10 = vsel %vm717_vm0, %v5631_v14, 0.0 }
 0xb4c   : > { %4354 = vpow2.f32 %v2736_v21  ;;  %2744 = vadd.xlane.f32.xlu0 %v2743_v10 }
 0xb4f   : > { %v2727_v58 = vpop.xlane.xlu0 %2726 }
 0xb50   : > { %v2731_v11 = vsub.f32 %v2715_v46, %v2727_v58 }
 0xb52   : > { %v5635_v4 = vpop.eup %4354  ;;  %v2738_v36 = vmul.f32 1.442695, %v2731_v11 }
 0xb53   : > { %v2746_v34 = vsel %vm717_vm0, %v5635_v4, 0.0 }
 0xb54   : > { %4356 = vpow2.f32 %v2738_v36  ;;  %2747 = vadd.xlane.f32.xlu1 %v2746_v34 }
 0xb5a   : > { %v5639_v35 = vpop.eup %4356 }
 0xb5b   : > { %v2749_v2 = vsel %vm717_vm0, %v5639_v35, 0.0 }
 0xb5c   : > { %2750 = vadd.xlane.f32.xlu2 %v2749_v2 }
 0xb60   : > { %2832 = vrot.lane.b32.xlu0 %v5222_v42, %s4796_s24 }
 0xb68   : > { %2995 = vrot.lane.b32.xlu0 %v5141_v12, %s4797_s2 }
 0xb6d   : > { %2993 = vrot.lane.b32.xlu1 %v5151_v28, %s4797_s2 }
 0xb70   : > { %2929 = vrot.lane.b32.xlu0 %v5149_v22, %s4797_s2 }
 0xb74   : > { %2931 = vrot.lane.b32.xlu2 %v5139_v8, %s4797_s2 }
 0xb75   : > { %2966 = vrot.lane.b32.xlu1 %v5168_v48, %s4797_s2 }
 0xb78   : > { %2925 = vrot.lane.b32.xlu0 %v5158_v37, %s4797_s2 }
 0xb7c   : > { %2964 = vrot.lane.b32.xlu2 %v5160_v38, %s4797_s2 }
 0xb84   : > { %2927 = vrot.lane.b32.xlu2 %v5170_v49, %s4797_s2 }
 0xbb7   : > { %v2742_v12 = vpop.xlane.xlu0 %2741 }
 0xbb8   : > { %4358 = vrcp.f32 %v2742_v12  ;;  %v2763_v9 = vand.u32 2147483648, %v2742_v12  ;;  %v2761_v5 = vand.u32 2147483647, %v2742_v12  ;;  %vm2757_vm9 = vweird.f32 %v2742_v12 }
 0xbba   : > { %v2764_v38 = vor.u32 1.1754944e-38, %v2763_v9  ;;  %vm2762_vm11 = vcmp.eq.f32.partialorder %v2761_v5, 8.507059e+37 }
 0xbbe   : > { %v4359_v28 = vpop.eup %4358 }
 0xbbf   : > { %v2753_v22 = vmul.f32 %v4359_v28, %v2742_v12  ;;  %v2745_v20 = vpop.xlane.xlu0 %2744  ;;  %vm2758_vm5 = vweird.f32 %v4359_v28 }
 0xbc0   : > { %4360 = vrcp.f32 %v2745_v20  ;;  %vm2759_vm10 = vmor %vm2757_vm9, %vm2758_vm5  ;;  %v2777_v29 = vand.u32 2147483648, %v2745_v20  ;;  %v2775_v16 = vand.u32 2147483647, %v2745_v20  ;;  %vm2771_vm13 = vweird.f32 %v2745_v20 }
 0xbc1   : > { %v2754_v8 = vsub.f32 1.0, %v2753_v22 }
 0xbc2   : > { %v2778_v1 = vor.u32 1.1754944e-38, %v2777_v29  ;;  %vm2776_vm15 = vcmp.eq.f32.partialorder %v2775_v16, 8.507059e+37 }
 0xbc3   : > { %v2755_v48 = vmul.f32 %v4359_v28, %v2754_v8 }
 0xbc5   : > { %v2756_v37 = vadd.f32 %v4359_v28, %v2755_v48 }
 0xbc6   : > { %v4361_v61 = vpop.eup %4360 }
 0xbc7   : > { %v2760_v52 = vsel %vm2759_vm10, %v4359_v28, %v2756_v37  ;;  %v2767_v49 = vmul.f32 %v4361_v61, %v2745_v20  ;;  %v2748_v25 = vpop.xlane.xlu1 %2747  ;;  %vm2772_vm12 = vweird.f32 %v4361_v61 }
 0xbc8   : > { %v2765_v51 = vsel %vm2762_vm11, %v2764_v38, %v2760_v52  ;;  %4362 = vrcp.f32 %v2748_v25  ;;  %vm2773_vm14 = vmor %vm2771_vm13, %vm2772_vm12  ;;  %v2791_v10 = vand.u32 2147483648, %v2748_v25  ;;  %v2789_v34 = vand.u32 2147483647, %v2748_v25 }
 0xbc9   : > { %v2808_v31 = vmul.f32 %v4351_v33, %v2765_v51  ;;  %v2768_v55 = vsub.f32 1.0, %v2767_v49  ;;  %vm2785_vm3 = vweird.f32 %v2748_v25 }
 0xbca   : > { %v2792_v9 = vor.u32 1.1754944e-38, %v2791_v10  ;;  %vm2790_vm5 = vcmp.eq.f32.partialorder %v2789_v34, 8.507059e+37 }
 0xbcb   : > { %v2812_v53 = vsel %vm1640_vm8, 0.0, %v2808_v31  ;;  %v2769_v46 = vmul.f32 %v4361_v61, %v2768_v55 }
 0xbcc   : > { %v2816_v23 = vpack.c.bf16 %v2812_v53, %v2812_v53 }
 0xbcd   : > { %v2770_v27 = vadd.f32 %v4361_v61, %v2769_v46 }
 0xbce   : > { %v4363_v6 = vpop.eup %4362  ;;  %v2820_v21 = vunpack.c.l.bf16 %v2816_v23  ;;  %v2865_v8 = vunpack.c.l.b16 %v2816_v23 }
 0xbcf   : > { %v2774_v63 = vsel %vm2773_vm14, %v4361_v61, %v2770_v27  ;;  %v2781_v26 = vmul.f32 %v4363_v6, %v2748_v25  ;;  %v2751_v17 = vpop.xlane.xlu2 %2750  ;;  %vm2786_vm2 = vweird.f32 %v4363_v6 }
 0xbd0   : > { %v2779_v30 = vsel %vm2776_vm15, %v2778_v1, %v2774_v63  ;;  %4364 = vrcp.f32 %v2751_v17  ;;  %v2824_v20 = vsub.f32 %v2812_v53, %v2820_v21  ;;  %vm2787_vm4 = vmor %vm2785_vm3, %vm2786_vm2  ;;  %v2803_v51 = vand.u32 2147483647, %v2751_v17 }
 0xbd1   : > { %v2809_v33 = vmul.f32 %v5631_v14, %v2779_v30  ;;  %v2782_v41 = vsub.f32 1.0, %v2781_v26  ;;  %v2805_v31 = vand.u32 2147483648, %v2751_v17  ;;  %vm2799_vm10 = vweird.f32 %v2751_v17 }
 0xbd2   : > { %v2833_v58 = vpop.permute.xlu0 %2832  ;;  %vm2804_vm12 = vcmp.eq.f32.partialorder %v2803_v51, 8.507059e+37 }
 0xbd3   : > { %v2817_v11 = vpack.c.bf16 %v2809_v33, %v2809_v33  ;;  %v2783_v36 = vmul.f32 %v4363_v6, %v2782_v41  ;;  %2848 = vmatpush.bf16.msrb.mxu2 %v2833_v58  ;;  %2883 = vmatpush.bf16.msrb.mxu3 %v2833_v58  ;;  %v2806_v16 = vor.u32 1.1754944e-38, %v2805_v31 }
 0xbd5   : > { %v2821_v2 = vunpack.c.l.bf16 %v2817_v11  ;;  %v2866_v12 = vunpack.c.l.b16 %v2817_v11  ;;  %v2784_v28 = vadd.f32 %v4363_v6, %v2783_v36 }
 0xbd6   : > { %v4365_v22 = vpop.eup %4364 }
 0xbd7   : > { %v2825_v14 = vsub.f32 %v2809_v33, %v2821_v2  ;;  %v2788_v48 = vsel %vm2787_vm4, %v4363_v6, %v2784_v28  ;;  %v2795_v5 = vmul.f32 %v4365_v22, %v2751_v17  ;;  %v2932_v37 = vpop.permute.xlu2 %2931  ;;  %2849 = vmatpush.bf16.msrb.mxu2 %v5661_v60  ;;  %2884 = vmatpush.bf16.msrb.mxu3 %v5661_v60  ;;  %vm2800_vm9 = vweird.f32 %v4365_v22 }
 0xbd8   : > { %v2793_v61 = vsel %vm2790_vm5, %v2792_v9, %v2788_v48  ;;  %v2943_v38 = vsel %vm1184_vm1, %v2932_v37, 0  ;;  %v5669_v52 = vpack.c.b16 %v2866_v12, %v2865_v8  ;;  %vm2801_vm11 = vmor %vm2799_vm10, %vm2800_vm9 }
 0xbd9   : > { %v2828_v49 = vpack.c.bf16 %v2825_v14, %v2824_v20  ;;  %v2796_v25 = vsub.f32 1.0, %v2795_v5  ;;  %2951 = vmatpush.bf16.xpose.msra.mxu1 %v2943_v38  ;;  %v2810_v29 = vmul.f32 %v5635_v4, %v2793_v61 }
 0xbda   : > { %v2996_v55 = vpop.permute.xlu0 %2995  ;;  %4030 = vmatmul.msk.bf16.vlgmr.msrb.gmra.mxu3 %vm717_vm0, %v5669_v52 }
 0xbdb   : > { %2980 = vmatpush.bf16.xpose.msra.mxu2 %v2943_v38  ;;  %v2797_v53 = vmul.f32 %v4365_v22, %v2796_v25  ;;  %v3001_v60 = vsel %vm1184_vm1, %v2996_v55, 0  ;;  %v2818_v6 = vpack.c.bf16 %v2810_v29, %v2810_v29 }
 0xbdc   : > { %4028 = vmatmul.msk.bf16.vlgmr.msrb.gmra.mxu2 %vm717_vm0, %v2828_v49  ;;  %3009 = vmatpush.bf16.xpose.msra.mxu3 %v3001_v60 }
 0xbdd   : > { %v2798_v46 = vadd.f32 %v4365_v22, %v2797_v53  ;;  %v2822_v33 = vunpack.c.l.bf16 %v2818_v6  ;;  %v2867_v17 = vunpack.c.l.b16 %v2818_v6 }
 0xbdf   : > { %v2802_v27 = vsel %vm2801_vm11, %v4365_v22, %v2798_v46  ;;  %v2994_v63 = vpop.permute.xlu1 %2993  ;;  %v2965_v2 = vpop.permute.xlu2 %2964 }
 0xbe0   : > { %v2807_v23 = vsel %vm2804_vm12, %v2806_v16, %v2802_v27  ;;  %v2998_v41 = vsel %vm1184_vm1, %v2994_v63, 0 }
 0xbe1   : > { %v2811_v1 = vmul.f32 %v5639_v35, %v2807_v23  ;;  %v2826_v35 = vsub.f32 %v2810_v29, %v2822_v33 }
 0xbe2   : > { %v2930_v26 = vpop.permute.xlu0 %2929 }
 0xbe3   : > { %v2940_v4 = vsel %vm1184_vm1, %v2930_v26, 0  ;;  %v2819_v30 = vpack.c.bf16 %v2811_v1, %v2811_v1 }
 0xbe4   : > { %2952 = vmatpush.bf16.xpose.msra.mxu1 %v2940_v4  ;;  %2981 = vmatpush.bf16.xpose.msra.mxu2 %v2940_v4 }
 0xbe5   : > { %3010 = vmatpush.bf16.xpose.msra.mxu3 %v2998_v41  ;;  %v2868_v21 = vunpack.c.l.b16 %v2819_v30  ;;  %v2823_v10 = vunpack.c.l.bf16 %v2819_v30 }
 0xbe7   : > { %v5682_v58 = vpack.c.b16 %v2868_v21, %v2867_v17  ;;  %v2827_v11 = vsub.f32 %v2811_v1, %v2823_v10  ;;  %v2928_v12 = vpop.permute.xlu2 %2927  ;;  %v2967_v28 = vpop.permute.xlu1 %2966 }
 0xbe9   : > { %v2829_v36 = vpack.c.bf16 %v2827_v11, %v2826_v35 }
 0xbea   : > { %v2926_v34 = vpop.permute.xlu0 %2925  ;;  %4031 = vmatmul.msk.bf16.gmra.mxu3 %vm717_vm0, %v5682_v58 }
 0xbeb   : > { %4034 = vmatmul.msk.bf16.vlgmr.msra.gmra.mxu1 %vm1184_vm1, %v2926_v34 }
 0xbec   : > { %4047 = vmatpush.bf16.msk.msrb.mxu1 %vm5199_vm6, %v5977_v3  ;;  %4029 = vmatmul.msk.bf16.gmra.mxu2 %vm717_vm0, %v2829_v36 }
 0xbf0   : > { %4049 = vmatpush.bf16.msk.msrb.mxu1 %vm5209_vm7, %v5977_v3 }
 0xbfa   : > { %4038 = vmatmul.msk.bf16.vlgmr.msra.gmra.mxu3 %vm1184_vm1, %v2965_v2 }
 0xbfb   : > { %4035 = vmatmul.msk.bf16.gmra.mxu1 %vm1184_vm1, %v2928_v12 }
 0xbfc   : > { %4036 = vmatmul.msk.bf16.vlgmr.msra.gmra.mxu2 %vm1184_vm1, %v2965_v2 }
 0xc0a   : > { %4039 = vmatmul.msk.bf16.gmra.mxu3 %vm1184_vm1, %v2967_v28 }
 0xc0c   : > { %4037 = vmatmul.msk.bf16.gmra.mxu2 %vm1184_vm1, %v2967_v28 }
 0xc5d   : > { %v2886_v22 = vpop.f32.mrf.mxu3 }
 0xc5f   : > { %v2851_v20 = vpop.f32.mrf.mxu2 }
 0xc60   : > { %v5696_v8 = vadd.f32 %v2886_v22, %v2851_v20 }
 0xc65   : > { %v2888_v9 = vpop.f32.mrf.mxu3 }
 0xc67   : > { %v2853_v14 = vpop.f32.mrf.mxu2 }
 0xc68   : > { %v5698_v48 = vadd.f32 %v2888_v9, %v2853_v14  ;;  %v2954_v51 = vpop.f32.mrf.mxu1 }
 0xc6d   : > { %v2891_v5 = vpop.f32.mrf.mxu3 }
 0xc6f   : > { %v2856_v37 = vpop.f32.mrf.mxu2 }
 0xc70   : > { %v5700_v61 = vadd.f32 %v2891_v5, %v2856_v37  ;;  %v2956_v60 = vpop.f32.mrf.mxu1 }
 0xc75   : > { %v2893_v38 = vpop.f32.mrf.mxu3 }
 0xc77   : > { %v2858_v49 = vpop.f32.mrf.mxu2 }
 0xc78   : > { %v5702_v25 = vadd.f32 %v2893_v38, %v2858_v49  ;;  %v2959_v26 = vpop.f32.mrf.mxu1 }
 0xc7d   : > { %v3012_v31 = vpop.f32.mrf.mxu3 }
 0xc7f   : > { %v2983_v55 = vpop.f32.mrf.mxu2 }
 0xc80   : > { %v2984_v29 = vadd.f32 %v2983_v55, %v2954_v51  ;;  %v2961_v35 = vpop.f32.mrf.mxu1 }
 0xc82   : > { %v5704_v53 = vadd.f32 %v3012_v31, %v2984_v29 }
 0xc84   : > { %v3026_v46 = vadd.f32 %v5704_v53, %v5239_v59 }
 0xc85   : > { %v3014_v16 = vpop.f32.mrf.mxu3 }
 0xc86   : > { %v3030_v27 = vsel %vm717_vm0, %v3026_v46, -inf }
 0xc87   : > { %v2985_v6 = vpop.f32.mrf.mxu2  ;;  %3031 = vmax.xlane.f32.xlu0 %v3030_v27 }
 0xc88   : > { %v2986_v23 = vadd.f32 %v2985_v6, %v2956_v60 }
 0xc8a   : > { %v5709_v1 = vadd.f32 %v3014_v16, %v2986_v23 }
 0xc8c   : > { %v3027_v63 = vadd.f32 %v5709_v1, %v5249_v7 }
 0xc8d   : > { %v3017_v30 = vpop.f32.mrf.mxu3 }
 0xc8e   : > { %v3033_v4 = vsel %vm717_vm0, %v3027_v63, -inf }
 0xc8f   : > { %3034 = vmax.xlane.f32.xlu1 %v3033_v4  ;;  %v2988_v33 = vpop.f32.mrf.mxu2 }
 0xc90   : > { %v2989_v41 = vadd.f32 %v2988_v33, %v2959_v26 }
 0xc92   : > { %v5714_v17 = vadd.f32 %v3017_v30, %v2989_v41 }
 0xc94   : > { %v3028_v21 = vadd.f32 %v5714_v17, %v5259_v18 }
 0xc95   : > { %v3019_v34 = vpop.f32.mrf.mxu3 }
 0xc96   : > { %v3036_v10 = vsel %vm717_vm0, %v3028_v21, -inf }
 0xc97   : > { %v2990_v11 = vpop.f32.mrf.mxu2  ;;  %3037 = vmax.xlane.f32.xlu2 %v3036_v10 }
 0xc98   : > { %v2991_v36 = vadd.f32 %v2990_v11, %v2961_v35 }
 0xc9a   : > { %v5719_v2 = vadd.f32 %v3019_v34, %v2991_v36 }
 0xc9c   : > { %v3029_v12 = vadd.f32 %v5719_v2, %v5269_v32 }
 0xc9e   : > { %v3039_v28 = vsel %vm717_vm0, %v3029_v12, -inf }
 0xc9f   : > { %3040 = vmax.xlane.f32.xlu0 %v3039_v28 }
 0xca8   : > { %2898 = vrot.lane.b32.xlu1 %v5226_v44, %s4796_s24 }
 0xcaf   : > { %2896 = vrot.lane.b32.xlu2 %v5231_v45, %s4796_s24  ;;  %s3701_s24 = scalar_lea.sflag [#allocation4], %s568_s27 }
 0xcfa   : > { %v3032_v22 = vpop.xlane.xlu0 %3031 }
 0xcfb   : > { %v3042_v20 = vsub.f32 %v3026_v46, %v3032_v22 }
 0xcfd   : > { %v3046_v9 = vmul.f32 1.442695, %v3042_v20 }
 0xcff   : > { %4366 = vpow2.f32 %v3046_v9 }
 0xd02   : > { %v3035_v14 = vpop.xlane.xlu1 %3034 }
 0xd03   : > { %v3043_v5 = vsub.f32 %v3027_v63, %v3035_v14 }
 0xd05   : > { %v4367_v37 = vpop.eup %4366  ;;  %v3048_v38 = vmul.f32 1.442695, %v3043_v5 }
 0xd06   : > { %v3054_v49 = vsel %vm717_vm0, %v4367_v37, 0.0 }
 0xd07   : > { %4368 = vpow2.f32 %v3048_v38  ;;  %3055 = vadd.xlane.f32.xlu0 %v3054_v49  ;;  %v4418_v38 = vld [vmem:[#allocation2] sm:$0xff] }
 0xd0a   : > { %v3038_v51 = vpop.xlane.xlu2 %3037 }
 0xd0b   : > { %v3044_v31 = vsub.f32 %v3028_v21, %v3038_v51 }
 0xd0d   : > { %v5729_v55 = vpop.eup %4368  ;;  %v3050_v29 = vmul.f32 1.442695, %v3044_v31 }
 0xd0e   : > { %v3057_v60 = vsel %vm717_vm0, %v5729_v55, 0.0 }
 0xd0f   : > { %4370 = vpow2.f32 %v3050_v29  ;;  %3058 = vadd.xlane.f32.xlu0 %v3057_v60 }
 0xd12   : > { %v3041_v46 = vpop.xlane.xlu0 %3040  ;;  %v2897_v4 = vpop.permute.xlu2 %2896 }
 0xd13   : > { %v3045_v16 = vsub.f32 %v3029_v12, %v3041_v46 }
 0xd15   : > { %v5733_v27 = vpop.eup %4370  ;;  %v3052_v6 = vmul.f32 1.442695, %v3045_v16 }
 0xd16   : > { %v3060_v23 = vsel %vm717_vm0, %v5733_v27, 0.0 }
 0xd17   : > { %4372 = vpow2.f32 %v3052_v6  ;;  %3061 = vadd.xlane.f32.xlu0 %v3060_v23 }
 0xd1a   : > { %v2899_v63 = vpop.permute.xlu1 %2898 }
 0xd1b   : > { %2908 = vmatpush.bf16.msra.mxu0 %v2899_v63 }
 0xd1d   : > { %v5737_v26 = vpop.eup %4372 }
 0xd1e   : > { %v3063_v30 = vsel %vm717_vm0, %v5737_v26, 0.0 }
 0xd1f   : > { %3064 = vadd.xlane.f32.xlu2 %v3063_v30  ;;  %2909 = vmatpush.bf16.msra.mxu0 %v2897_v4 }
 0xd22   : > { %4032 = vmatmul.msk.bf16.vlgmr.msra.gmra.mxu0 %vm717_vm0, %v5669_v52 }
 0xd23   : > { %4041 = vmatpush.bf16.msk.msrb.mxu0 %vm5199_vm6, %v5977_v3 }
 0xd27   : > { %4043 = vmatpush.bf16.msk.msrb.mxu0 %vm5209_vm7, %v5977_v3 }
 0xd32   : > { %4033 = vmatmul.msk.bf16.gmra.mxu0 %vm717_vm0, %v5682_v58 }
 0xd7a   : > { %v3056_v33 = vpop.xlane.xlu0 %3055 }
 0xd7b   : > { %4374 = vrcp.f32 %v3056_v33  ;;  %v3077_v11 = vand.u32 2147483648, %v3056_v33  ;;  %v3075_v36 = vand.u32 2147483647, %v3056_v33  ;;  %vm3071_vm13 = vweird.f32 %v3056_v33 }
 0xd7d   : > { %v3078_v0 = vor.u32 1.1754944e-38, %v3077_v11  ;;  %vm3076_vm7 = vcmp.eq.f32.partialorder %v3075_v36, 8.507059e+37 }
 0xd81   : > { %v4375_v41 = vpop.eup %4374 }
 0xd82   : > { %v3067_v21 = vmul.f32 %v4375_v41, %v3056_v33  ;;  %v3059_v10 = vpop.xlane.xlu0 %3058  ;;  %vm3072_vm6 = vweird.f32 %v4375_v41  ;;  %v4419_v33 = vld [vmem:[#allocation2 + $0x8] sm:$0xff] }
 0xd83   : > { %4376 = vrcp.f32 %v3059_v10  ;;  %vm3073_vm14 = vmor %vm3071_vm13, %vm3072_vm6  ;;  %v3091_v9 = vand.u32 2147483648, %v3059_v10  ;;  %v3089_v5 = vand.u32 2147483647, %v3059_v10  ;;  %vm3085_vm2 = vweird.f32 %v3059_v10 }
 0xd84   : > { %v3068_v35 = vsub.f32 1.0, %v3067_v21 }
 0xd85   : > { %v3092_v29 = vor.u32 1.1754944e-38, %v3091_v9  ;;  %vm3090_vm4 = vcmp.eq.f32.partialorder %v3089_v5, 8.507059e+37 }
 0xd86   : > { %v3069_v62 = vmul.f32 %v4375_v41, %v3068_v35 }
 0xd88   : > { %v3070_v34 = vadd.f32 %v4375_v41, %v3069_v62 }
 0xd89   : > { %v4377_v52 = vpop.eup %4376 }
 0xd8a   : > { %v3074_v3 = vsel %vm3073_vm14, %v4375_v41, %v3070_v34  ;;  %v3081_v12 = vmul.f32 %v4377_v52, %v3059_v10  ;;  %v3062_v58 = vpop.xlane.xlu0 %3061  ;;  %vm3086_vm15 = vweird.f32 %v4377_v52 }
 0xd8b   : > { %v3079_v28 = vsel %vm3076_vm7, %v3078_v0, %v3074_v3  ;;  %4378 = vrcp.f32 %v3062_v58  ;;  %vm3087_vm3 = vmor %vm3085_vm2, %vm3086_vm15  ;;  %v3103_v4 = vand.u32 2147483647, %v3062_v58  ;;  %v3105_v30 = vand.u32 2147483648, %v3062_v58 }
 0xd8c   : > { %v3122_v22 = vmul.f32 %v4367_v37, %v3079_v28  ;;  %v3082_v20 = vsub.f32 1.0, %v3081_v12  ;;  %vm3099_vm9 = vweird.f32 %v3062_v58 }
 0xd8d   : > { %vm3104_vm11 = vcmp.eq.f32.partialorder %v3103_v4, 8.507059e+37  ;;  %v3106_v34 = vor.u32 1.1754944e-38, %v3105_v30  ;;  %v4421_v4 = vld [vmem:[#allocation2 + $0x18] sm:$0xff] }
 0xd8e   : > { %v3083_v14 = vmul.f32 %v4377_v52, %v3082_v20  ;;  %v3126_v49 = vmul.f32 %v4418_v38, %v3122_v22 }
 0xd90   : > { %v3084_v51 = vadd.f32 %v4377_v52, %v3083_v14  ;;  %v3130_v6 = vpack.c.bf16 %v3126_v49, %v3126_v49 }
 0xd91   : > { %v4379_v31 = vpop.eup %4378 }
 0xd92   : > { %v3088_v60 = vsel %vm3087_vm3, %v4377_v52, %v3084_v51  ;;  %v3095_v46 = vmul.f32 %v4379_v31, %v3062_v58  ;;  %v3065_v16 = vpop.xlane.xlu2 %3064  ;;  %vm3100_vm5 = vweird.f32 %v4379_v31  ;;  %v3134_v10 = vunpack.c.l.bf16 %v3130_v6 }
 0xd93   : > { %v3093_v23 = vsel %vm3090_vm4, %v3092_v29, %v3088_v60  ;;  %4380 = vrcp.f32 %v3065_v16  ;;  %v3173_v36 = vunpack.c.l.b16 %v3130_v6  ;;  %vm3101_vm10 = vmor %vm3099_vm9, %vm3100_vm5  ;;  %v3119_v5 = vand.u32 2147483648, %v3065_v16 }
 0xd94   : > { %v3123_v37 = vmul.f32 %v5729_v55, %v3093_v23  ;;  %v3096_v63 = vsub.f32 1.0, %v3095_v46  ;;  %v3138_v12 = vsub.f32 %v3126_v49, %v3134_v10  ;;  %v3117_v58 = vand.u32 2147483647, %v3065_v16  ;;  %v4420_v49 = vld [vmem:[#allocation2 + $0x10] sm:$0xff] }
 0xd95   : > { %vm3113_vm6 = vweird.f32 %v3065_v16 }
 0xd96   : > { %v3127_v41 = vmul.f32 %v4419_v33, %v3123_v37  ;;  %v3097_v21 = vmul.f32 %v4379_v31, %v3096_v63  ;;  %vm3118_vm14 = vcmp.eq.f32.partialorder %v3117_v58, 8.507059e+37 }
 0xd98   : > { %v3131_v35 = vpack.c.bf16 %v3127_v41, %v3127_v41  ;;  %v3098_v11 = vadd.f32 %v4379_v31, %v3097_v21 }
 0xd99   : > { %v4381_v62 = vpop.eup %4380 }
 0xd9a   : > { %v3135_v52 = vunpack.c.l.bf16 %v3131_v35  ;;  %v3174_v0 = vunpack.c.l.b16 %v3131_v35  ;;  %v3102_v3 = vsel %vm3101_vm10, %v4379_v31, %v3098_v11  ;;  %v3109_v55 = vmul.f32 %v4381_v62, %v3065_v16 }
 0xd9b   : > { %v3107_v28 = vsel %vm3104_vm11, %v3106_v34, %v3102_v3  ;;  %vm3114_vm12 = vweird.f32 %v4381_v62 }
 0xd9c   : > { %v3139_v22 = vsub.f32 %v3127_v41, %v3135_v52  ;;  %v3124_v20 = vmul.f32 %v5733_v27, %v3107_v28  ;;  %v3110_v9 = vsub.f32 1.0, %v3109_v55  ;;  %v3177_v14 = vpack.c.b16 %v3174_v0, %v3173_v36  ;;  %vm3115_vm13 = vmor %vm3113_vm6, %vm3114_vm12 }
 0xd9d   : > { %v3120_v27 = vor.u32 1.1754944e-38, %v3119_v5 }
 0xd9e   : > { %v3111_v38 = vmul.f32 %v4381_v62, %v3110_v9  ;;  %4050 = vmatmul.msk.bf16.vlgmr.msrb.gmra.mxu1 %vm717_vm0, %v3177_v14  ;;  %v3142_v51 = vpack.c.bf16 %v3139_v22, %v3138_v12  ;;  %v3128_v46 = vmul.f32 %v4420_v49, %v3124_v20 }
 0xd9f   : > { %v2911_v29 = vpop.f32.mrf.mxu0 }
 0xda0   : > { %v3112_v60 = vadd.f32 %v4381_v62, %v3111_v38  ;;  %v5755_v31 = vadd.f32 %v2911_v29, %v5696_v8  ;;  %4044 = vmatmul.msk.bf16.vlgmr.msrb.gmra.mxu0 %vm717_vm0, %v3142_v51  ;;  %v3132_v63 = vpack.c.bf16 %v3128_v46, %v3128_v46 }
 0xda2   : > { %v3116_v6 = vsel %vm3115_vm13, %v4381_v62, %v3112_v60  ;;  %v3136_v41 = vunpack.c.l.bf16 %v3132_v63  ;;  %v3175_v21 = vunpack.c.l.b16 %v3132_v63 }
 0xda3   : > { %v3121_v23 = vsel %vm3118_vm14, %v3120_v27, %v3116_v6 }
 0xda4   : > { %v3125_v37 = vmul.f32 %v5737_v26, %v3121_v23  ;;  %v3140_v36 = vsub.f32 %v3128_v46, %v3136_v41  ;;  %v3261_v41 = vstv %s4052_s7 }
 0xda6   : > { %v3129_v30 = vmul.f32 %v4421_v4, %v3125_v37 }
 0xda7   : > { %v2913_v33 = vpop.f32.mrf.mxu0 }
 0xda8   : > { %v5760_v16 = vadd.f32 %v2913_v33, %v5698_v48  ;;  %v3133_v8 = vpack.c.bf16 %v3129_v30, %v3129_v30 }
 0xdaa   : > { %v3176_v10 = vunpack.c.l.b16 %v3133_v8  ;;  %v3137_v35 = vunpack.c.l.bf16 %v3133_v8 }
 0xdac   : > { %v3178_v11 = vpack.c.b16 %v3176_v10, %v3175_v21  ;;  %v3141_v34 = vsub.f32 %v3129_v30, %v3137_v35 }
 0xdae   : > { %4051 = vmatmul.msk.bf16.gmra.mxu1 %vm717_vm0, %v3178_v11  ;;  %v3143_v62 = vpack.c.bf16 %v3141_v34, %v3140_v36 }
 0xdaf   : > { %v2916_v52 = vpop.f32.mrf.mxu0 }
 0xdb0   : > { %v5764_v26 = vadd.f32 %v2916_v52, %v5700_v61  ;;  %4045 = vmatmul.msk.bf16.gmra.mxu0 %vm717_vm0, %v3143_v62 }
 0xdb7   : > { %v5767_v0 = vpop.f32.mrf.mxu0 }
 0xe1b   : > { %v3194_v48 = vpop.f32.mrf.mxu1 }
 0xe1d   : > { %v3159_v3 = vpop.f32.mrf.mxu0 }
 0xe1e   : > { %v3195_v55 = vadd.f32 %v3194_v48, %v3159_v3 }
 0xe20   : > { %v3204_v12 = vmul.f32 %v3195_v55, %v5306_v24 }
 0xe22   : > { %v3208_v28 = vmax.f32 %v3204_v12, 0.0 }
 0xe23   : > { %v3196_v22 = vpop.f32.mrf.mxu1 }
 0xe24   : > { %4382 = vrsqrt.f32 %v3208_v28  ;;  %vm3219_vm7 = vcmp.eq.f32.partialorder %v3208_v28, inf  ;;  %v3222_v8 = vand.u32 2147483648, %v3208_v28  ;;  %vm3221_vm15 = vcmp.eq.f32.partialorder %v3208_v28, 0.0 }
 0xe25   : > { %v3161_v20 = vpop.f32.mrf.mxu0 }
 0xe26   : > { %v3197_v9 = vadd.f32 %v3196_v22, %v3161_v20 }
 0xe28   : > { %v3205_v14 = vmul.f32 %v3197_v9, %v5311_v50 }
 0xe2a   : > { %v4383_v5 = vpop.eup %4382  ;;  %v3209_v38 = vmax.f32 %v3205_v14, 0.0 }
 0xe2b   : > { %v3199_v61 = vpop.f32.mrf.mxu1  ;;  %v3213_v58 = vmul.f32 %v4383_v5, %v3208_v28 }
 0xe2c   : > { %4384 = vrsqrt.f32 %v3209_v38  ;;  %vm3231_vm2 = vcmp.eq.f32.partialorder %v3209_v38, inf  ;;  %v3234_v22 = vand.u32 2147483648, %v3209_v38  ;;  %vm3233_vm3 = vcmp.eq.f32.partialorder %v3209_v38, 0.0 }
 0xe2d   : > { %v3164_v51 = vpop.f32.mrf.mxu0  ;;  %v3214_v29 = vmul.f32 %v4383_v5, %v3213_v58 }
 0xe2e   : > { %v3200_v60 = vadd.f32 %v3199_v61, %v3164_v51 }
 0xe2f   : > { %v3215_v49 = vmul.f32 0.5, %v3214_v29 }
 0xe30   : > { %v3206_v46 = vmul.f32 %v3200_v60, %v5316_v56 }
 0xe31   : > { %v3216_v24 = vsub.f32 1.5, %v3215_v49 }
 0xe32   : > { %v4385_v27 = vpop.eup %4384  ;;  %v3210_v6 = vmax.f32 %v3206_v46, 0.0 }
 0xe33   : > { %v3217_v23 = vmul.f32 %v4383_v5, %v3216_v24  ;;  %v3225_v37 = vmul.f32 %v4385_v27, %v3209_v38  ;;  %v3201_v63 = vpop.f32.mrf.mxu1 }
 0xe34   : > { %4386 = vrsqrt.f32 %v3210_v6  ;;  %vm3243_vm4 = vcmp.eq.f32.partialorder %v3210_v6, inf  ;;  %vm3245_vm5 = vcmp.eq.f32.partialorder %v3210_v6, 0.0 }
 0xe35   : > { %v3166_v50 = vpop.f32.mrf.mxu0  ;;  %v3218_v4 = vmul.f32 %v3217_v23, %v3208_v28  ;;  %v3226_v30 = vmul.f32 %v4385_v27, %v3225_v37 }
 0xe36   : > { %v3202_v33 = vadd.f32 %v3201_v63, %v3166_v50 }
 0xe37   : > { %v3220_v21 = vsel %vm3219_vm7, %v3208_v28, %v3218_v4  ;;  %v3227_v10 = vmul.f32 0.5, %v3226_v30 }
 0xe38   : > { %v3207_v35 = vmul.f32 %v3202_v33, %v5319_v47  ;;  %v3223_v56 = vsel %vm3221_vm15, %v3222_v8, %v3220_v21 }
 0xe39   : > { %v3262_v11 = vmul.f32 %v3261_v41, %v3223_v56  ;;  %v3228_v36 = vsub.f32 1.5, %v3227_v10 }
 0xe3a   : > { %v4387_v34 = vpop.eup %4386  ;;  %v3211_v62 = vmax.f32 %v3207_v35, 0.0 }
 0xe3b   : > { %v3266_v52 = vmul.f32 1.442695, %v3262_v11  ;;  %v3229_v48 = vmul.f32 %v4385_v27, %v3228_v36  ;;  %v3237_v3 = vmul.f32 %v4387_v34, %v3210_v6  ;;  %v3246_v27 = vand.u32 2147483648, %v3210_v6 }
 0xe3c   : > { %4388 = vrsqrt.f32 %v3211_v62  ;;  %vm3255_vm9 = vcmp.eq.f32.partialorder %v3211_v62, inf  ;;  %vm3257_vm10 = vcmp.eq.f32.partialorder %v3211_v62, 0.0 }
 0xe3d   : > { %4390 = vpow2.f32 %v3266_v52  ;;  %v3230_v55 = vmul.f32 %v3229_v48, %v3209_v38  ;;  %v3238_v12 = vmul.f32 %v4387_v34, %v3237_v3 }
 0xe3f   : > { %v3232_v20 = vsel %vm3231_vm2, %v3209_v38, %v3230_v55  ;;  %v3239_v28 = vmul.f32 0.5, %v3238_v12 }
 0xe40   : > { %v3235_v9 = vsel %vm3233_vm3, %v3234_v22, %v3232_v20 }
 0xe41   : > { %v3263_v14 = vmul.f32 %v3261_v41, %v3235_v9  ;;  %v3240_v47 = vsub.f32 1.5, %v3239_v28 }
 0xe42   : > { %v4389_v5 = vpop.eup %4388 }
 0xe43   : > { %v4391_v61 = vpop.eup %4390  ;;  %v3268_v58 = vmul.f32 1.442695, %v3263_v14  ;;  %v3241_v51 = vmul.f32 %v4387_v34, %v3240_v47  ;;  %v3249_v29 = vmul.f32 %v4389_v5, %v3211_v62 }
 0xe44   : > { %v3274_v60 = vmax.f32 %v4391_v61, 1e-05 }
 0xe45   : > { %4392 = vpow2.f32 %v3268_v58  ;;  %v3242_v49 = vmul.f32 %v3241_v51, %v3210_v6  ;;  %v3250_v46 = vmul.f32 %v4389_v5, %v3249_v29 }
 0xe46   : > { %v3278_v24 = vmin.f32 %v3274_v60, 100000.0 }
 0xe47   : > { %v3244_v23 = vsel %vm3243_vm4, %v3210_v6, %v3242_v49  ;;  %v3251_v37 = vmul.f32 0.5, %v3250_v46  ;;  %v3258_v6 = vand.u32 2147483648, %v3211_v62 }
 0xe48   : > { %v3282_v38 = vmul.f32 %v3278_v24, %v5704_v53  ;;  %v3247_v63 = vsel %vm3245_vm5, %v3246_v27, %v3244_v23 }
 0xe49   : > { %v3264_v50 = vmul.f32 %v3261_v41, %v3247_v63  ;;  %v3252_v4 = vsub.f32 1.5, %v3251_v37 }
 0xe4a   : > { %v3286_v30 = vadd.f32 %v3282_v38, %v5239_v59 }
 0xe4b   : > { %v4393_v33 = vpop.eup %4392  ;;  %v3270_v8 = vmul.f32 1.442695, %v3264_v50  ;;  %v3253_v21 = vmul.f32 %v4389_v5, %v3252_v4 }
 0xe4c   : > { %v3290_v10 = vsel %vm717_vm0, %v3286_v30, -inf  ;;  %v3275_v35 = vmax.f32 %v4393_v33, 1e-05 }
 0xe4d   : > { %3291 = vmax.xlane.f32.xlu1 %v3290_v10  ;;  %4394 = vpow2.f32 %v3270_v8  ;;  %v3254_v56 = vmul.f32 %v3253_v21, %v3211_v62 }
 0xe4e   : > { %v3279_v11 = vmin.f32 %v3275_v35, 100000.0 }
 0xe4f   : > { %v3256_v36 = vsel %vm3255_vm9, %v3211_v62, %v3254_v56 }
 0xe50   : > { %v3283_v53 = vmul.f32 %v3279_v11, %v5709_v1  ;;  %v3259_v34 = vsel %vm3257_vm10, %v3258_v6, %v3256_v36 }
 0xe51   : > { %v3265_v52 = vmul.f32 %v3261_v41, %v3259_v34 }
 0xe52   : > { %v3287_v59 = vadd.f32 %v3283_v53, %v5249_v7 }
 0xe53   : > { %v4395_v48 = vpop.eup %4394  ;;  %v3272_v3 = vmul.f32 1.442695, %v3265_v52 }
 0xe54   : > { %v3293_v55 = vsel %vm717_vm0, %v3287_v59, -inf  ;;  %v3276_v12 = vmax.f32 %v4395_v48, 1e-05 }
 0xe55   : > { %3294 = vmax.xlane.f32.xlu0 %v3293_v55  ;;  %4396 = vpow2.f32 %v3272_v3 }
 0xe56   : > { %v3280_v22 = vmin.f32 %v3276_v12, 100000.0 }
 0xe58   : > { %v3284_v20 = vmul.f32 %v3280_v22, %v5714_v17 }
 0xe5a   : > { %v3288_v28 = vadd.f32 %v3284_v20, %v5259_v18 }
 0xe5b   : > { %v4397_v9 = vpop.eup %4396 }
 0xe5c   : > { %v3296_v62 = vsel %vm717_vm0, %v3288_v28, -inf  ;;  %v3277_v1 = vmax.f32 %v4397_v9, 1e-05 }
 0xe5d   : > { %3297 = vmax.xlane.f32.xlu0 %v3296_v62 }
 0xe5e   : > { %v3281_v41 = vmin.f32 %v3277_v1, 100000.0 }
 0xe60   : > { %v3285_v7 = vmul.f32 %v3281_v41, %v5719_v2 }
 0xe62   : > { %v3289_v14 = vadd.f32 %v3285_v7, %v5269_v32 }
 0xe64   : > { %v3299_v47 = vsel %vm717_vm0, %v3289_v14, -inf }
 0xe65   : > { %3300 = vmax.xlane.f32.xlu0 %v3299_v47 }
 0xe79   : > { %3406 = vrot.lane.b32.xlu0 %v5222_v42, %s4797_s2 }
 0xec0   : > { %v3292_v5 = vpop.xlane.xlu1 %3291 }
 0xec1   : > { %v3302_v17 = vsub.f32 %v3286_v30, %v3292_v5 }
 0xec3   : > { %v3306_v61 = vmul.f32 1.442695, %v3302_v17 }
 0xec5   : > { %4398 = vpow2.f32 %v3306_v61 }
 0xec8   : > { %v3295_v18 = vpop.xlane.xlu0 %3294 }
 0xec9   : > { %v3303_v58 = vsub.f32 %v3287_v59, %v3295_v18 }
 0xecb   : > { %v4399_v51 = vpop.eup %4398  ;;  %v3308_v29 = vmul.f32 1.442695, %v3303_v58 }
 0xecc   : > { %v3314_v60 = vsel %vm717_vm0, %v4399_v51, 0.0 }
 0xecd   : > { %4400 = vpow2.f32 %v3308_v29  ;;  %3315 = vadd.xlane.f32.xlu0 %v3314_v60 }
 0xed0   : > { %v3298_v2 = vpop.xlane.xlu0 %3297 }
 0xed1   : > { %v3304_v32 = vsub.f32 %v3288_v28, %v3298_v2 }
 0xed3   : > { %v5788_v49 = vpop.eup %4400  ;;  %v3310_v46 = vmul.f32 1.442695, %v3304_v32 }
 0xed4   : > { %v3317_v42 = vsel %vm717_vm0, %v5788_v49, 0.0 }
 0xed5   : > { %4402 = vpow2.f32 %v3310_v46  ;;  %3318 = vadd.xlane.f32.xlu0 %v3317_v42 }
 0xed8   : > { %v3301_v24 = vpop.xlane.xlu0 %3300 }
 0xed9   : > { %v3305_v27 = vsub.f32 %v3289_v14, %v3301_v24 }
 0xedb   : > { %v5792_v23 = vpop.eup %4402  ;;  %v3312_v37 = vmul.f32 1.442695, %v3305_v27 }
 0xedc   : > { %v3320_v38 = vsel %vm717_vm0, %v5792_v23, 0.0 }
 0xedd   : > { %4404 = vpow2.f32 %v3312_v37  ;;  %3321 = vadd.xlane.f32.xlu2 %v3320_v38 }
 0xee3   : > { %v5796_v63 = vpop.eup %4404 }
 0xee4   : > { %v3323_v50 = vsel %vm717_vm0, %v5796_v63, 0.0 }
 0xee5   : > { %3324 = vadd.xlane.f32.xlu1 %v3323_v50 }
 0xee9   : > { %3470 = vrot.lane.b32.xlu0 %v5231_v45, %s4797_s2  ;;  %v2924_v45 = vadd.f32 %v5767_v0, %v5702_v25 }
 0xeeb   : > { %v3407_v4 = vpop.permute.xlu0 %3406 }
 0xeec   : > { %3422 = vmatpush.bf16.msrb.mxu2 %v3407_v4  ;;  %3457 = vmatpush.bf16.msrb.mxu3 %v3407_v4 }
 0xef1   : > { %3505 = vrot.lane.b32.xlu0 %v5605_v15, %s4798_s25 }
 0xef5   : > { %3404 = vrot.lane.b32.xlu2 %v5224_v43, %s4797_s2 }
 0xefd   : > { %3503 = vrot.lane.b32.xlu2 %v5598_v13, %s4798_s25 }
 0xefe   : > { %3472 = vrot.lane.b32.xlu1 %v5226_v44, %s4797_s2  ;;  %s4693_s2 = scalar_lea.hbm %s4692_s16, 32 }
 0xeff   : > { %p4694_p1 = scmp.ne.s32.totalorder %s4692_s16, %s4693_s2 }
 0xf01   : > { %p4695_p3 = pnand %p4694_p1, %p4960_p2 }
 0xf03   : > { %p4696_p6 = pneg %p4695_p3 }
 0xf05   : > { %3521 = vrot.lane.b32.xlu2 %v5760_v16, %s4799_s18 }
 0xf06   : > { %3519 = vrot.lane.b32.xlu1 %v5755_v31, %s4799_s18 }
 0xf0d   : > { %3507 = vrot.lane.b32.xlu2 %v5609_v39, %s4798_s25 }
 0xf15   : > { %3525 = vrot.lane.b32.xlu2 %v2924_v45, %s4799_s18 }
 0xf40   : > { %v3316_v43 = vpop.xlane.xlu0 %3315 }
 0xf41   : > { %4406 = vrcp.f32 %v3316_v43  ;;  %v3337_v33 = vand.u32 2147483648, %v3316_v43  ;;  %v3335_v8 = vand.u32 2147483647, %v3316_v43  ;;  %vm3331_vm12 = vweird.f32 %v3316_v43 }
 0xf43   : > { %v3338_v39 = vor.u32 1.1754944e-38, %v3337_v33  ;;  %vm3336_vm13 = vcmp.eq.f32.partialorder %v3335_v8, 8.507059e+37 }
 0xf47   : > { %v4407_v13 = vpop.eup %4406 }
 0xf48   : > { %v3327_v15 = vmul.f32 %v4407_v13, %v3316_v43  ;;  %v3319_v44 = vpop.xlane.xlu0 %3318  ;;  %vm3332_vm11 = vweird.f32 %v4407_v13 }
 0xf49   : > { %4408 = vrcp.f32 %v3319_v44  ;;  %vm3333_vm6 = vmor %vm3331_vm12, %vm3332_vm11  ;;  %v3351_v6 = vand.u32 2147483648, %v3319_v44  ;;  %v3349_v53 = vand.u32 2147483647, %v3319_v44  ;;  %vm3345_vm7 = vweird.f32 %v3319_v44 }
 0xf4a   : > { %v3328_v30 = vsub.f32 1.0, %v3327_v15 }
 0xf4b   : > { %v3352_v48 = vor.u32 1.1754944e-38, %v3351_v6  ;;  %vm3350_vm2 = vcmp.eq.f32.partialorder %v3349_v53, 8.507059e+37 }
 0xf4c   : > { %v3329_v16 = vmul.f32 %v4407_v13, %v3328_v30 }
 0xf4e   : > { %v3330_v31 = vadd.f32 %v4407_v13, %v3329_v16 }
 0xf4f   : > { %v4409_v21 = vpop.eup %4408 }
 0xf50   : > { %v3334_v10 = vsel %vm3333_vm6, %v4407_v13, %v3330_v31  ;;  %v3341_v25 = vmul.f32 %v4409_v21, %v3319_v44  ;;  %v3322_v0 = vpop.xlane.xlu2 %3321  ;;  %vm3346_vm14 = vweird.f32 %v4409_v21  ;;  %vm3556_vm6 = vcmask 195584  }
 0xf51   : > { %v3339_v35 = vsel %vm3336_vm13, %v3338_v39, %v3334_v10  ;;  %4410 = vrcp.f32 %v3322_v0  ;;  %vm3347_vm15 = vmor %vm3345_vm7, %vm3346_vm14  ;;  %v3363_v54 = vand.u32 2147483647, %v3322_v0  ;;  %v3365_v1 = vand.u32 2147483648, %v3322_v0 }
 0xf52   : > { %v3382_v56 = vmul.f32 %v4399_v51, %v3339_v35  ;;  %v3342_v11 = vsub.f32 1.0, %v3341_v25  ;;  %vm3359_vm3 = vweird.f32 %v3322_v0  ;;  %vm3551_vm13 = vcmask 130048  }
 0xf53   : > { %vm3364_vm5 = vcmp.eq.f32.partialorder %v3363_v54, 8.507059e+37  ;;  %v3366_v58 = vor.u32 1.1754944e-38, %v3365_v1 }
 0xf54   : > { %v3343_v36 = vmul.f32 %v4409_v21, %v3342_v11  ;;  %v3386_v34 = vsel %vm1640_vm8, 0.0, %v3382_v56 }
 0xf55   : > { %v3390_v3 = vpack.c.bf16 %v3386_v34, %v3386_v34 }
 0xf56   : > { %v3344_v52 = vadd.f32 %v4409_v21, %v3343_v36 }
 0xf57   : > { %v4411_v59 = vpop.eup %4410  ;;  %v3394_v41 = vunpack.c.l.bf16 %v3390_v3  ;;  %v3439_v18 = vunpack.c.l.b16 %v3390_v3 }
 0xf58   : > { %v3348_v55 = vsel %vm3347_vm15, %v4409_v21, %v3344_v52  ;;  %v3355_v12 = vmul.f32 %v4411_v59, %v3322_v0  ;;  %v3405_v22 = vpop.permute.xlu2 %3404  ;;  %v3325_v20 = vpop.xlane.xlu1 %3324  ;;  %vm3360_vm8 = vweird.f32 %v4411_v59  ;;  %v2350_v52 = vadd.f32 %v5612_v19, %v5541_v57  ;;  %v3563_v57 = vld [vmem:[#allocation16 + $0x10] sm:$0xff]  ;;  %v3564_v19 = vld [vmem:[#allocation16 + $0x18] sm:$0xff] }
 0xf59   : > { %v3353_v28 = vsel %vm3350_vm2, %v3352_v48, %v3348_v55  ;;  %4412 = vrcp.f32 %v3325_v20  ;;  %3423 = vmatpush.bf16.msrb.mxu2 %v3405_v22  ;;  %3458 = vmatpush.bf16.msrb.mxu3 %v3405_v22  ;;  %vm3361_vm4 = vmor %vm3359_vm3, %vm3360_vm8  ;;  %v3398_v51 = vsub.f32 %v3386_v34, %v3394_v41  ;;  %v3379_v24 = vand.u32 2147483648, %v3325_v20 }
 0xf5a   : > { %v3383_v9 = vmul.f32 %v5788_v49, %v3353_v28  ;;  %v3356_v62 = vsub.f32 1.0, %v3355_v12  ;;  %v3377_v38 = vand.u32 2147483647, %v3325_v20  ;;  %vm3373_vm10 = vweird.f32 %v3325_v20 }
 0xf5b   : > { %v3380_v4 = vor.u32 1.1754944e-38, %v3379_v24  ;;  %v3471_v25 = vpop.permute.xlu0 %3470  ;;  %v3581_v1 = vpack.c.bf16 %v3563_v57, %v3563_v57  ;;  %v3582_v41 = vpack.c.bf16 %v3564_v19, %v3564_v19 }
 0xf5c   : > { %v3391_v7 = vpack.c.bf16 %v3383_v9, %v3383_v9  ;;  %v3357_v14 = vmul.f32 %v4411_v59, %v3356_v62  ;;  %vm3378_vm12 = vcmp.eq.f32.partialorder %v3377_v38, 8.507059e+37 }
 0xf5e   : > { %v3395_v47 = vunpack.c.l.bf16 %v3391_v7  ;;  %v3440_v5 = vunpack.c.l.b16 %v3391_v7  ;;  %v3358_v17 = vadd.f32 %v4411_v59, %v3357_v14  ;;  %v3585_v7 = vunpack.c.l.bf16 %v3581_v1 }
 0xf5f   : > { %v4413_v61 = vpop.eup %4412  ;;  %v3586_v14 = vunpack.c.l.bf16 %v3582_v41 }
 0xf60   : > { %v3399_v29 = vsub.f32 %v3383_v9, %v3395_v47  ;;  %v3362_v60 = vsel %vm3361_vm4, %v4411_v59, %v3358_v17  ;;  %v3369_v2 = vmul.f32 %v4413_v61, %v3325_v20  ;;  %v3443_v49 = vpack.c.b16 %v3440_v5, %v3439_v18  ;;  %v3561_v47 = vld [vmem:[#allocation16] sm:$0xff]  ;;  %v3562_v5 = vld [vmem:[#allocation16 + $0x8] sm:$0xff] }
 0xf61   : > { %v3367_v32 = vsel %vm3364_vm5, %v3366_v58, %v3362_v60  ;;  %vm3374_vm9 = vweird.f32 %v4413_v61  ;;  %v3599_v17 = vunpack.c.l.b16 %v3581_v1  ;;  %v3589_v18 = vsub.f32 %v3563_v57, %v3585_v7 }
 0xf62   : > { %v3402_v46 = vpack.c.bf16 %v3399_v29, %v3398_v51  ;;  %v3370_v42 = vsub.f32 1.0, %v3369_v2  ;;  %4055 = vmatmul.msk.bf16.vlgmr.msrb.gmra.mxu3 %vm717_vm0, %v3443_v49  ;;  %v3384_v27 = vmul.f32 %v5792_v23, %v3367_v32  ;;  %vm3375_vm11 = vmor %vm3373_vm10, %vm3374_vm9  ;;  %v3590_v58 = vsub.f32 %v3564_v19, %v3586_v14 }
 0xf63   : > { %v3580_v51 = vpack.c.bf16 %v3562_v5, %v3562_v5  ;;  %v3506_v38 = vpop.permute.xlu0 %3505 }
 0xf64   : > { %v3371_v37 = vmul.f32 %v4413_v61, %v3370_v42  ;;  %4053 = vmatmul.msk.bf16.vlgmr.msrb.gmra.mxu2 %vm717_vm0, %v3402_v46  ;;  %v3392_v43 = vpack.c.bf16 %v3384_v27, %v3384_v27  ;;  %v3592_v60 = vpack.c.bf16 %v3590_v58, %v3589_v18 }
 0xf65   : > { %v3584_v32 = vunpack.c.l.bf16 %v3580_v51  ;;  %v3598_v46 = vunpack.c.l.b16 %v3580_v51 }
 0xf66   : > { %v3372_v50 = vadd.f32 %v4413_v61, %v3371_v37  ;;  %v3396_v30 = vunpack.c.l.bf16 %v3392_v43  ;;  %v3441_v33 = vunpack.c.l.b16 %v3392_v43  ;;  %3671 = vmatpush.bf16.msra.mxu3 %v3592_v60  ;;  %v5978_v43 = vld [vmem:[#allocation36_spill] sm:$0xff] }
 0xf67   : > { %v3588_v24 = vsub.f32 %v3562_v5, %v3584_v32 }
 0xf68   : > { %v3376_v45 = vsel %vm3375_vm11, %v4413_v61, %v3372_v50  ;;  %v3400_v21 = vsub.f32 %v3384_v27, %v3396_v30  ;;  %v3600_v61 = vunpack.c.l.b16 %v3582_v41  ;;  %v3504_v50 = vpop.permute.xlu2 %3503 }
 0xf69   : > { %v3381_v13 = vsel %vm3378_vm12, %v3380_v4, %v3376_v45 }
 0xf6a   : > { %v3385_v15 = vmul.f32 %v5796_v63, %v3381_v13  ;;  %v3602_v29 = vpack.c.b16 %v3600_v61, %v3599_v17  ;;  %v1741_v13 = vadd.f32 %v5978_v43, %v5397_v40 }
 0xf6c   : > { %v3393_v44 = vpack.c.bf16 %v3385_v15, %v3385_v15  ;;  %3652 = vmatpush.bf16.msra.mxu2 %v3602_v29  ;;  %3617 = vmatpush.bf16.msra.mxu1 %v3602_v29 }
 0xf6e   : > { %v3442_v16 = vunpack.c.l.b16 %v3393_v44  ;;  %v3397_v23 = vunpack.c.l.bf16 %v3393_v44 }
 0xf70   : > { %v3473_v8 = vpop.permute.xlu1 %3472  ;;  %v3444_v31 = vpack.c.b16 %v3442_v16, %v3441_v33  ;;  %v3401_v39 = vsub.f32 %v3385_v15, %v3397_v23  ;;  %v5979_v15 = vld [vmem:[#allocation35_spill] sm:$0xff]  ;;  %v3522_v33 = vpop.permute.xlu2 %3521  ;;  %v5980_v23 = vld [vmem:[#allocation37_spill] sm:$0xff] }
 0xf71   : > { %3482 = vmatpush.bf16.msra.mxu0 %v3473_v8  ;;  %v3547_v44 = vsel %vm1184_vm1, %v5979_v15, %v3504_v50  ;;  %v1768_v8 = vadd.f32 %v5980_v23, %v1741_v13 }
 0xf72   : > { %v3403_v10 = vpack.c.bf16 %v3401_v39, %v3400_v21  ;;  %4056 = vmatmul.msk.bf16.gmra.mxu3 %vm717_vm0, %v3444_v31 }
 0xf73   : > { %v3548_v21 = vsel %vm1184_vm1, %v1768_v8, %v3506_v38 }
 0xf74   : > { %4054 = vmatmul.msk.bf16.gmra.mxu2 %vm717_vm0, %v3403_v10  ;;  %v3553_v39 = vsel %vm3551_vm13, %v3548_v21, %v3522_v33 }
 0xf75   : > { %3483 = vmatpush.bf16.msra.mxu0 %v3471_v25 }
 0xf78   : > { %4057 = vmatmul.msk.bf16.vlgmr.msra.gmra.mxu0 %vm717_vm0, %v3443_v49  ;;  %v3520_v4 = vpop.permute.xlu1 %3519 }
 0xf79   : > { %v3552_v30 = vsel %vm3551_vm13, %v3547_v44, %v3520_v4 }
 0xf88   : > { %4058 = vmatmul.msk.bf16.gmra.mxu0 %vm717_vm0, %v3444_v31 }
 0xfe5   : > { %v3460_v0 = vpop.f32.mrf.mxu3 }
 0xfe7   : > { %v3425_v63 = vpop.f32.mrf.mxu2 }
 0xfe8   : > { %v3461_v35 = vadd.f32 %v3460_v0, %v3425_v63 }
 0xfed   : > { %v3462_v36 = vpop.f32.mrf.mxu3 }
 0xfef   : > { %v3427_v56 = vpop.f32.mrf.mxu2 }
 0xff0   : > { %v3463_v53 = vadd.f32 %v3462_v36, %v3427_v56 }
 0xff5   : > { %v3485_v11 = vpop.f32.mrf.mxu0  ;;  %v3465_v3 = vpop.f32.mrf.mxu3 }
 0xff6   : > { %v3495_v6 = vadd.f32 %v3485_v11, %v3461_v35 }
 0xff7   : > { %v3430_v48 = vpop.f32.mrf.mxu2 }
 0xff8   : > { %3535 = vrot.lane.b32.xlu0 %v3495_v6, %s4800_s22  ;;  %v3466_v55 = vadd.f32 %v3465_v3, %v3430_v48  ;;  %v3508_v6 = vpop.permute.xlu2 %3507  ;;  %v5983_v3 = vld [vmem:[#allocation38_spill] sm:$0xff] }
 0xffd   : > { %v3487_v34 = vpop.f32.mrf.mxu0  ;;  %v3467_v28 = vpop.f32.mrf.mxu3 }
 0xffe   : > { %v3496_v59 = vadd.f32 %v3487_v34, %v3463_v53 }
 0xfff   : > { %v3432_v20 = vpop.f32.mrf.mxu2 }
0x1000   : > { %3509 = vrot.lane.b32.xlu0 %v2350_v52, %s4798_s25  ;;  %3537 = vrot.lane.b32.xlu1 %v3496_v59, %s4800_s22  ;;  %v3468_v9 = vadd.f32 %v3467_v28, %v3432_v20  ;;  %v5981_v52 = vld [vmem:[#allocation40_spill] sm:$0xff]  ;;  %v5982_v59 = vld [vmem:[#allocation39_spill] sm:$0xff]  ;;  %v3526_v1 = vpop.permute.xlu2 %3525 }
0x1001   : > { %v1746_v48 = vadd.f32 %v5982_v59, %v5981_v52 }
0x1005   : > { %v3490_v12 = vpop.f32.mrf.mxu0 }
0x1006   : > { %v3497_v22 = vadd.f32 %v3490_v12, %v3466_v55  ;;  %v3549_v55 = vsel %vm1184_vm1, %v5983_v3, %v3508_v6 }
0x1008   : > { %3523 = vrot.lane.b32.xlu1 %v5764_v26, %s4799_s18  ;;  %3539 = vrot.lane.b32.xlu0 %v3497_v22, %s4800_s22  ;;  %v3579_v26 = vpack.c.bf16 %v3561_v47, %v3561_v47 }
0x100a   : > { %v3583_v2 = vunpack.c.l.bf16 %v3579_v26  ;;  %v3597_v49 = vunpack.c.l.b16 %v3579_v26 }
0x100c   : > { %v3587_v42 = vsub.f32 %v3561_v47, %v3583_v2  ;;  %v3601_v27 = vpack.c.b16 %v3598_v46, %v3597_v49  ;;  %v4221_v46 = vld [vmem:[%s5985_s28] ss:$0 sm:$0xff] }
0x100d   : > { %v3492_v62 = vpop.f32.mrf.mxu0 }
0x100e   : > { %v3498_v54 = vadd.f32 %v3492_v62, %v3468_v9  ;;  %v3591_v37 = vpack.c.bf16 %v3588_v24, %v3587_v42  ;;  %3653 = vmatpush.bf16.msra.mxu2 %v3601_v27  ;;  %3618 = vmatpush.bf16.msra.mxu1 %v3601_v27  ;;  %v5984_v9 = vld [vmem:[#allocation41_spill] sm:$0xff] }
0x100f   : > { %v1770_v62 = vadd.f32 %v5984_v9, %v1746_v48 }
0x1010   : > { %3541 = vrot.lane.b32.xlu1 %v3498_v54, %s4800_s22  ;;  %3672 = vmatpush.bf16.msra.mxu3 %v3591_v37  ;;  %s4697_s22 = scalar_lea.hbm %s5987_s12, 64 }
0x1011   : > { %p4699_p11 = scmp.lt.s32.totalorder %s4697_s22, %s4693_s2 }
0x1013   : > { %p4700_p12 = por %p4699_p11, %p4698_p10 }
0x1015   : > { %p4701_p13 = pnand %p4700_p12, %p4696_p6 }
0x106a   : > { %v3536_v45 = vpop.permute.xlu0 %3535 }
0x106b   : > { %v3557_v16 = vsel %vm3556_vm6, %v3552_v30, %v3536_v45 }
0x106c   : > { %v3565_v31 = vpack.c.bf16 %v3557_v16, %v3557_v16 }
0x106e   : > { %v3569_v63 = vunpack.c.l.bf16 %v3565_v31  ;;  %v3634_v35 = vunpack.c.l.b16 %v3565_v31 }
0x1070   : > { %v3573_v36 = vsub.f32 %v3557_v16, %v3569_v63 }
0x1072   : > { %v3538_v10 = vpop.permute.xlu1 %3537  ;;  %v3510_v25 = vpop.permute.xlu0 %3509 }
0x1073   : > { %v3558_v40 = vsel %vm3556_vm6, %v3553_v39, %v3538_v10  ;;  %v3550_v57 = vsel %vm1184_vm1, %v1770_v62, %v3510_v25 }
0x1074   : > { %v3566_v0 = vpack.c.bf16 %v3558_v40, %v3558_v40  ;;  %v3555_v7 = vsel %vm3551_vm13, %v3550_v57, %v3526_v1 }
0x1076   : > { %v3570_v56 = vunpack.c.l.bf16 %v3566_v0  ;;  %v3635_v11 = vunpack.c.l.b16 %v3566_v0 }
0x1078   : > { %v3574_v53 = vsub.f32 %v3558_v40, %v3570_v56  ;;  %v3638_v34 = vpack.c.b16 %v3635_v11, %v3634_v35 }
0x107a   : > { %v3577_v12 = vpack.c.bf16 %v3574_v53, %v3573_v36  ;;  %v3524_v22 = vpop.permute.xlu1 %3523  ;;  %4061 = vmatmul.msk.bf16.vlgmr.msra.gmra.mxu2 %vm717_vm0, %v3638_v34  ;;  %4063 = vmatmul.msk.bf16.vlgmr.msra.gmra.mxu3 %vm717_vm0, %v3638_v34  ;;  %v3540_v20 = vpop.permute.xlu0 %3539 }
0x107b   : > { %v3554_v28 = vsel %vm3551_vm13, %v3549_v55, %v3524_v22 }
0x107c   : > { %4059 = vmatmul.msk.bf16.vlgmr.msra.gmra.mxu1 %vm717_vm0, %v3577_v12  ;;  %v3559_v54 = vsel %vm3556_vm6, %v3554_v28, %v3540_v20 }
0x107d   : > { %v3567_v19 = vpack.c.bf16 %v3559_v54, %v3559_v54 }
0x107f   : > { %v3571_v47 = vunpack.c.l.bf16 %v3567_v19  ;;  %v3636_v17 = vunpack.c.l.b16 %v3567_v19 }
0x1081   : > { %v3575_v58 = vsub.f32 %v3559_v54, %v3571_v47 }
0x1082   : > { %v3542_v41 = vpop.permute.xlu1 %3541 }
0x1083   : > { %v3560_v14 = vsel %vm3556_vm6, %v3555_v7, %v3542_v41 }
0x1084   : > { %v3568_v5 = vpack.c.bf16 %v3560_v14, %v3560_v14 }
0x1086   : > { %v3572_v61 = vunpack.c.l.bf16 %v3568_v5  ;;  %v3637_v18 = vunpack.c.l.b16 %v3568_v5 }
0x1088   : > { %v3576_v26 = vsub.f32 %v3560_v14, %v3572_v61  ;;  %v3639_v51 = vpack.c.b16 %v3637_v18, %v3636_v17 }
0x108a   : > { %v3578_v29 = vpack.c.bf16 %v3576_v26, %v3575_v58  ;;  %4062 = vmatmul.msk.bf16.gmra.mxu2 %vm717_vm0, %v3639_v51  ;;  %4064 = vmatmul.msk.bf16.gmra.mxu3 %vm717_vm0, %v3639_v51 }
0x108c   : > { %4060 = vmatmul.msk.bf16.gmra.mxu1 %vm717_vm0, %v3578_v29 }
0x10f9   : > { %v3620_v60 = vpop.f32.mrf.mxu1 }
0x10fd   : > { %v3655_v2 = vpop.f32.mrf.mxu2  ;;  %v3674_v32 = vpop.f32.mrf.mxu3 }
0x10fe   : > { %v3656_v49 = vadd.f32 %v3655_v2, %v3620_v60 }
0x1100   : > { %v3684_v42 = vadd.f32 %v3674_v32, %v3656_v49 }
0x1101   : > { %v3622_v24 = vpop.f32.mrf.mxu1 }
0x1102   : > { %v3692_v27 = vadd.f32 %v4221_v46, %v3684_v42 }
0x1104   : > { %3696 = vst.msk [vmem:[%s664_s23] sm:$0xff] %vm717_vm0, %v3692_v27 }
0x1105   : > { %v3657_v37 = vpop.f32.mrf.mxu2  ;;  %v3676_v38 = vpop.f32.mrf.mxu3 }
0x1106   : > { %v3658_v50 = vadd.f32 %v3657_v37, %v3622_v24 }
0x1108   : > { %v3685_v4 = vadd.f32 %v3676_v38, %v3658_v50 }
0x1109   : > { %v3625_v43 = vpop.f32.mrf.mxu1 }
0x110a   : > { %v3693_v45 = vadd.f32 %v4221_v46, %v3685_v4 }
0x110c   : > { %3697 = vst.msk [vmem:[%s664_s23 + $0x8] sm:$0xff] %vm717_vm0, %v3693_v45 }
0x110d   : > { %v3660_v13 = vpop.f32.mrf.mxu2  ;;  %v3679_v15 = vpop.f32.mrf.mxu3 }
0x110e   : > { %v3661_v44 = vadd.f32 %v3660_v13, %v3625_v43 }
0x1110   : > { %v3686_v30 = vadd.f32 %v3679_v15, %v3661_v44 }
0x1111   : > { %v3627_v16 = vpop.f32.mrf.mxu1 }
0x1112   : > { %v3694_v33 = vadd.f32 %v4221_v46, %v3686_v30 }
0x1114   : > { %3698 = vst.msk [vmem:[%s664_s23 + $0x10] sm:$0xff] %vm717_vm0, %v3694_v33 }
0x1115   : > { %v3662_v23 = vpop.f32.mrf.mxu2  ;;  %v3681_v31 = vpop.f32.mrf.mxu3 }
0x1116   : > { %v3663_v8 = vadd.f32 %v3662_v23, %v3627_v16 }
0x1118   : > { %v3687_v21 = vadd.f32 %v3681_v31, %v3663_v8 }
0x111a   : > { %v3695_v39 = vadd.f32 %v4221_v46, %v3687_v21 }
0x111c   : > { %3699 = vst.msk [vmem:[%s664_s23 + $0x18] sm:$0xff] %vm717_vm0, %v3695_v39 }
0x111d   : > { %4704 = shalt.err (!%p4701_p13)
}
0x111e   : > { %s4801_s27 = smov 128  }
0x111f   : > { %4104 = dma.vmem_to_hbm [thread:$0]  (%p4960_p2), %s3716_s21, 512, %s3718_s19, %s3701_s24, %s4801_s27, %s4801_s27, %s4798_s25  }
0x1120 PF: > { %s5989_s28 = sld [smem:[#allocation27_spill]]  ;;  %p4136_p0 = pnand %p3921_p4, %p4967_p7 }
0x1122   : > { %p4137_p5 = pneg %p4136_p0 }
0x1126   : > { %s3732_s23 = sand.u32 1, %s5989_s28  }
0x1127   : > { %s3733_s0 = scalar_lea.sflag [#allocation4], %s3732_s23 }
0x1128   : > { %4758 = dma.done.wait (%p4137_p5), %s3733_s0, 512  }
0x1129   : > { %4760 = vsyncadd (%p4137_p5), %s3733_s0, 4294966784  ;;  %s36_s30 = sadd.s32 1, %s4783_s30   ;;  %s5991_s29 = sld [smem:[#allocation28_spill]] }
0x112a   : > { %p33_p9 = scmp.ge.s32.totalorder %s36_s30, 4   ;;  %s5992_s27 = sld [smem:[#allocation33_spill]] }
0x112b   : > { %s5993_s28 = sld [smem:[#allocation30_spill]]  ;;  %s5995_s25 = smov %s4767_s26 }
0x112c   : > { %s5994_s17 = sld [smem:[#allocation31_spill]] }
0x112e   :  { %35 = sbr.rel (!%p33_p9) target bundleno = 19 (0x13), region = 168 }
0x112f   : > { %s5996_s26 = smov %s5991_s29 }
0x1132   : > { %s5997_s29 = smov %s5994_s17 }
0x1133   :  { %3739 = vsyncpa [#allocation3], 1 }
0x1134   :  { %3741 = vsyncpa [#allocation3 + $0x1], 1 }
0x1135   :  { %3742 = vsyncpa [#allocation8], 1 }
0x1136   :  { %3744 = vsyncpa [#allocation8 + $0x1], 1 }
0x1137   :  { %3745 = vsyncpa [#allocation11], 1 }
0x1138   :  { %3747 = vsyncpa [#allocation11 + $0x1], 1 }
0x1139   :  { %3748 = vsyncpa [#allocation14], 1 }
0x113a   :  { %3749 = vsyncpa [#allocation17], 1 }
0x113b   :  { %3750 = vsyncpa [#allocation4], 1 }
0x113c   :  { %3752 = vsyncpa [#allocation4 + $0x1], 1 }
0x113d   :  { %3753 = vsyncpa [#allocation5], 1 }
0x113e   :  { %3755 = vsyncpa [#allocation5 + $0x1], 1 }

</bundles_post_ra>
